<compile_context>
chip_gen: v7x
topology: tpu7x:2x2x1
jax: 0.10.0
libtpu: 0.0.40
codegen_flags: <defaults>
</compile_context>

<pallas_src>
import math

import jax
import jax.numpy as jnp
from jax.experimental import pallas as pl
from jax.experimental.pallas import tpu as pltpu


# ----------------------------- small utilities -------------------------------

def _round_up(x, m):
    return ((x + m - 1) // m) * m


def _lcm(a, b):
    return a * b // math.gcd(a, b)


# ----------------------------- in-kernel helpers ------------------------------

def _gelu(x):
    # TODO(synk): PyTorch nn.GELU() default is exact (erf-based); the tanh
    # approximation is used for a guaranteed Mosaic lowering (~1e-3 abs diff).
    return jax.nn.gelu(x, approximate=True)


def _layernorm(x, w, b, d_real, n_pad, eps=1e-5):
    # Padded lanes [d_real:] of x are zero by construction, so sums over the
    # padded width equal sums over the real features; statistics use d_real.
    inv_d = 1.0 / d_real
    mu = jnp.sum(x, axis=-1, keepdims=True) * inv_d
    xc = x - mu
    var = (jnp.sum(xc * xc, axis=-1, keepdims=True) - n_pad * (mu * mu)) * inv_d
    return xc * jax.lax.rsqrt(var + eps) * w + b


def _mxdot(a, w):
    # Feed the MXU in the weight dtype (bf16), accumulate in f32.
    return jnp.dot(a.astype(w.dtype), w, preferred_element_type=jnp.float32)


def _gru_gate(x, y, wy, ux, ug, gbias, Dp):
    """Fused GRU gate.  wy = [Wr|Wz|Wg] (Dp,3Dp) applied to y, ux = [Ur|Uz]
    (Dp,2Dp) applied to x, gbias = [0 | -bg] (1,2Dp).  3 matmuls instead of 6,
    one wide sigmoid over the fused [r|z] pre-activation."""
    gy = _mxdot(y, wy)                                    # (rows, 3*Dp)
    gx = _mxdot(x, ux)                                    # (rows, 2*Dp)
    rz = jax.nn.sigmoid(gy[:, :2 * Dp] + gx + gbias)      # [r | z]
    r = rz[:, :Dp]
    z = rz[:, Dp:]
    h_hat = jnp.tanh(gy[:, 2 * Dp:] + _mxdot(r * x, ug))
    return (1.0 - z) * x + z * h_hat


# ------------------------------ fused Pallas kernel ---------------------------

def _make_fused_kernel(B_tile, L, D, Dp, H, Fp):
    hd = D // H            # real head dim (softmax scale)
    hdp = Dp // H          # lane-padded per-head dim
    n_pad = Dp - D
    rows = B_tile * L
    scale = 1.0 / math.sqrt(hd)

    def kernel(x_ref, mask_ref, we_ref, be_ref, pos_ref,
               wqkv_ref, bqkv_ref, wgy_ref, wgx_ref, wsq_ref, gbias_ref,
               vvec_ref, hout_ref, mems_ref, h_scr):
        blk = pl.program_id(1)
        cdt = wqkv_ref.dtype   # MXU input dtype (bf16)

        # ---- embedding (first block step of each batch tile only) ----
        @pl.when(blk == 0)
        def _embed():
            x = x_ref[...].reshape(rows, Fp)
            e = _mxdot(x, we_ref[...]) + be_ref[...]
            e = _gelu(e).reshape(B_tile, L, Dp) + pos_ref[...]
            h_scr[...] = e

        # out_memories[blk] = input to this block (h.detach() in the reference).
        mems_ref[...] = h_scr[...].astype(mems_ref.dtype)

        vv = vvec_ref[...]                                # (7, Dp) f32
        ln1_w, ln1_b = vv[0:1], vv[1:2]
        ln2_w, ln2_b = vv[2:3], vv[3:4]
        b_out = vv[4:5]
        fc_b1, fc_b2 = vv[5:6], vv[6:7]
        gb = gbias_ref[...]                               # (2, 2Dp) f32

        h2 = h_scr[...].reshape(rows, Dp)                 # f32

        # ---- pre-LN + fused QKV projection (one lane-dense (rows,3Dp) matmul)
        qn = _layernorm(h2, ln1_w, ln1_b, D, n_pad)
        qkv = _mxdot(qn, wqkv_ref[...]) + bqkv_ref[...]   # (rows, 3Dp) f32
        qkv3 = qkv.reshape(B_tile, L, 3 * Dp)

        # ---- multi-head attention (per-head (L,L) scores, batched over tile)
        mask_add = mask_ref[...]                          # (B_tile, 1, L) additive
        # TODO(synk): per-head lane slices (hdp-wide, at padded-head boundaries)
        # kept instead of a single 4-D batched-head einsum for Mosaic-lowering
        # safety when hdp < 128.
        ctx = []
        for hh in range(H):
            q_h = qkv3[:, :, hh * hdp:(hh + 1) * hdp].astype(cdt)
            k_h = qkv3[:, :, Dp + hh * hdp:Dp + (hh + 1) * hdp].astype(cdt)
            v_h = qkv3[:, :, 2 * Dp + hh * hdp:2 * Dp + (hh + 1) * hdp].astype(cdt)
            sc = jnp.einsum('bqd,bkd->bqk', q_h, k_h,
                            preferred_element_type=jnp.float32) * scale
            sc = sc + mask_add                            # masked keys -> -1e20
            p = jax.nn.softmax(sc, axis=-1)
            ctx.append(jnp.einsum('bqk,bkd->bqd', p.astype(cdt), v_h,
                                  preferred_element_type=jnp.float32))
        ctx_full = jnp.concatenate(ctx, axis=-1).reshape(rows, Dp)
        y = _mxdot(ctx_full, wsq_ref[0]) + b_out          # single Wo matmul

        # ---- GRU gate 1: out = gate1(query=h, Y)
        out = _gru_gate(h2, y, wgy_ref[0], wgx_ref[0], wsq_ref[1], gb[0:1], Dp)

        # ---- position-wise FC: Linear -> GELU -> Linear -> GELU on LN2(out)
        e = _layernorm(out, ln2_w, ln2_b, D, n_pad)
        e = _gelu(_mxdot(e, wsq_ref[3]) + fc_b1)
        e = _gelu(_mxdot(e, wsq_ref[4]) + fc_b2)

        # ---- GRU gate 2: out = gate2(out, E)
        out2 = _gru_gate(out, e, wgy_ref[1], wgx_ref[1], wsq_ref[2], gb[1:2], Dp)

        out3 = out2.reshape(B_tile, L, Dp)
        h_scr[...] = out3                  # stays resident for the next block

        # h_out block index is invariant in blk -> write it once, on the last
        # block step (saves (nb-1) redundant rows*Dp vector stores per tile).
        @pl.when(blk == pl.num_programs(1) - 1)
        def _store():
            hout_ref[...] = out3.astype(hout_ref.dtype)

    return kernel


# ------------------------------ tuning / tiling --------------------------------

def _tpu_tuning():
    """Per-generation (target MXU-M rows, VMEM budget, megacore preference)."""
    kind = ""
    try:
        kind = jax.devices()[0].device_kind.lower()
    except Exception:
        pass
    if "v7" in kind:
        # 64 MiB physical VMEM per TC -> leave headroom; 2 TCs share the chip.
        return dict(target_rows=384, vmem_limit=48 << 20, prefer_multi_core=True)
    if "v6" in kind:
        # 918 TF/s vs ~1.4 TB/s HBM -> needs the largest rows to hide weight DMA.
        return dict(target_rows=640, vmem_limit=96 << 20, prefer_multi_core=False)
    if "v5e" in kind or "v5 lite" in kind or "v5lite" in kind:
        return dict(target_rows=256, vmem_limit=96 << 20, prefer_multi_core=False)
    # v4 / v5p / unknown: conservative defaults.
    return dict(target_rows=256, vmem_limit=64 << 20, prefer_multi_core=False)


def _vmem_estimate_bytes(B_tile, L, Fp, Dp, H):
    """Rough VMEM footprint of one grid step (weights double-buffered)."""
    rows = B_tile * L
    wb = 2  # bf16 weights
    per_block_w = 18 * Dp * Dp * wb                   # qkv(3) + gates(10) + wo/fc(5)
    per_block_v = (3 * Dp + 4 * Dp + 7 * Dp) * 4      # bqkv + gbias + vvec
    weights = 2 * (per_block_w + per_block_v)         # double-buffered per-block slabs
    weights += Fp * Dp * wb + (1 + L) * Dp * 4        # grid-invariant (single-buffered)
    acts = (2 * rows * Fp * 2 +                       # x input (bf16, double-buffered)
            2 * B_tile * L * 4 +                      # additive mask
            rows * Dp * 4 +                           # h_out block
            2 * rows * Dp * 2 +                       # mems block (bf16, double-buffered)
            rows * Dp * 4)                            # resident hidden-state scratch
    live = 12 * rows * Dp * 4 + 2 * B_tile * H * L * L * 4   # f32 intermediates
    return weights + acts + live


def _pick_batch_tile(N, L, Fp, Dp, H, tuning):
    """Largest batch tile that fits the VMEM budget; per-block weights are
    re-streamed once per tile, so bigger tiles = more weight reuse.  On v7x,
    shard the parallel axis across the 2 TensorCores only when each tile still
    meets the rows target."""
    budget = int(tuning["vmem_limit"] * 0.75)
    divs = [d for d in range(1, N + 1) if N % d == 0]
    fits = [d for d in divs if _vmem_estimate_bytes(d, L, Fp, Dp, H) <= budget] or [1]
    best = max(fits)
    if tuning["prefer_multi_core"]:
        good = [d for d in fits
                if (N // d) % 2 == 0 and d * L >= tuning["target_rows"]]
        if good:
            best = max(good)
    return best


def _spec(block_shape, index_map, *, single_buffer=False):
    """BlockSpec; grid-invariant inputs get single-buffered (halves their VMEM)."""
    if single_buffer:
        try:
            return pl.BlockSpec(block_shape, index_map, pipeline_mode=pl.Buffered(1))
        except (TypeError, AttributeError):   # older jax without pipeline_mode
            return pl.BlockSpec(block_shape, index_map)
    return pl.BlockSpec(block_shape, index_map)


# ------------------------------ pallas wrapper --------------------------------

def gated_transformer_xl_forward(params, h, memories, mask, memory_indices,
                                 num_heads, batch_tile=None):
    """Mirrors GatedTransformerXL.forward.

    `memories` and `memory_indices` are accepted but unused, exactly as in the
    reference PyTorch forward (each block is called as block(h, h, mask)).
    """
    N, L, Fi = h.shape
    D, Dp, Fp = params["embed_dim"], params["dp"], params["fp"]
    nb = params["wqkv"].shape[0]
    H = num_heads
    assert Fi == params["input_dim"]

    tuning = _tpu_tuning()
    B_tile = batch_tile or _pick_batch_tile(N, L, Fp, Dp, H, tuning)
    assert N % B_tile == 0

    # bf16 input (halves input DMA; kernel feeds the MXU in bf16 anyway) and a
    # precomputed additive key mask (0 / -1e20).
    x = jnp.pad(h, ((0, 0), (0, 0), (0, Fp - Fi))).astype(jnp.bfloat16)
    mask_add = jnp.where(mask.reshape(N, 1, L), 0.0, -1e20).astype(jnp.float32)
    pos = params["pos_table"][:L]

    kernel = _make_fused_kernel(B_tile, L, D, Dp, H, Fp)

    h_out, mems = pl.pallas_call(
        kernel,
        out_shape=(jax.ShapeDtypeStruct((N, L, Dp), jnp.float32),
                   # detached activations -> bf16 halves the memories writeback
                   jax.ShapeDtypeStruct((N, nb, L, Dp), jnp.bfloat16)),
        grid_spec=pltpu.PrefetchScalarGridSpec(
            num_scalar_prefetch=0,
            grid=(N // B_tile, nb),
            in_specs=[
                pl.BlockSpec((B_tile, L, Fp), lambda t, b: (t, 0, 0)),
                pl.BlockSpec((B_tile, 1, L), lambda t, b: (t, 0, 0)),
                # grid-invariant -> single buffered
                _spec((Fp, Dp), lambda t, b: (0, 0), single_buffer=True),
                _spec((1, Dp), lambda t, b: (0, 0), single_buffer=True),
                _spec((L, Dp), lambda t, b: (0, 0), single_buffer=True),
                # per-block weight slabs, indexed by the block grid axis
                # (prefetched for block b+1 while block b computes).
                # TODO(synk): consider pl.Buffered(3) on these on v6e if weight
                # DMA is still exposed after the rows/target_rows sizing.
                pl.BlockSpec((None, Dp, 3 * Dp), lambda t, b: (b, 0, 0)),
                pl.BlockSpec((None, 1, 3 * Dp), lambda t, b: (b, 0, 0)),
                pl.BlockSpec((None, 2, Dp, 3 * Dp), lambda t, b: (b, 0, 0, 0)),
                pl.BlockSpec((None, 2, Dp, 2 * Dp), lambda t, b: (b, 0, 0, 0)),
                pl.BlockSpec((None, 5, Dp, Dp), lambda t, b: (b, 0, 0, 0)),
                pl.BlockSpec((None, 2, 2 * Dp), lambda t, b: (b, 0, 0)),
                pl.BlockSpec((None, 7, Dp), lambda t, b: (b, 0, 0)),
            ],
            out_specs=(
                pl.BlockSpec((B_tile, L, Dp), lambda t, b: (t, 0, 0)),
                pl.BlockSpec((B_tile, None, L, Dp), lambda t, b: (t, b, 0, 0)),
            ),
            scratch_shapes=[pltpu.VMEM((B_tile, L, Dp), jnp.float32)],
        ),
        compiler_params=pltpu.CompilerParams(
            dimension_semantics=("parallel", "arbitrary"),
            vmem_limit_bytes=int(tuning["vmem_limit"]),
        ),
    )(x, mask_add, params["we"], params["be"], pos,
      params["wqkv"], params["bqkv"], params["wgy"], params["wgx"],
      params["wsq"], params["gbias"], params["vvec"])

    # strip the lane padding back to the logical model dim
    h_out = h_out[..., :D]
    mems = mems[..., :D]

    # TODO(synk): torch squeezes h after EVERY block; for degenerate N==1/L==1
    # that changes intermediate shapes, which is not replicated inside the
    # fused kernel.  Only the final output shape is mimicked here.
    h_final = jnp.squeeze(h_out)
    if h_final.ndim == 1:
        h_final = h_final[None, :]
    return h_final, mems


# ------------------------------ parameter setup -------------------------------

def init_params(key, input_dim, embed_dim, num_heads, num_blocks,
                max_episode_steps, gru_bias):
    """Synthetic parameters laid out like the PyTorch module ([in, out] weights)."""
    D = embed_dim

    def rand(k, shape, scl):
        return (scl * jax.random.normal(k, shape)).astype(jnp.float32)

    keys = jax.random.split(key, 2 + num_blocks)
    # TODO(synk): torch uses orthogonal init (gain sqrt(2)) for the embedding.
    params = {
        "we": rand(keys[0], (input_dim, D), math.sqrt(2.0 / input_dim)),
        "be": jnp.zeros((D,), jnp.float32),
        "pos_table": rand(keys[1], (max_episode_steps, D), 1.0),  # nn.Embedding ~ N(0,1)
        "blocks": [],
    }
    s = 1.0 / math.sqrt(D)
    for b in range(num_blocks):
        kb = jax.random.split(keys[2 + b], 24)

        def gate(i0):
            g = {n: rand(kb[i0 + j], (D, D), s)
                 for j, n in enumerate(("Wr", "Ur", "Wz", "Uz", "Wg", "Ug"))}
            g["bg"] = jnp.full((D,), gru_bias, jnp.float32)
            return g

        params["blocks"].append({
            "wq": rand(kb[0], (D, D), s), "wk": rand(kb[1], (D, D), s),
            "wv": rand(kb[2], (D, D), s), "wo": rand(kb[3], (D, D), s),
            "bq": rand(kb[4], (D,), s), "bk": rand(kb[5], (D,), s),
            "bv": rand(kb[6], (D,), s), "bo": rand(kb[7], (D,), s),
            "ln1_w": jnp.ones((D,), jnp.float32), "ln1_b": jnp.zeros((D,), jnp.float32),
            "ln2_w": jnp.ones((D,), jnp.float32), "ln2_b": jnp.zeros((D,), jnp.float32),
            "g1": gate(8), "g2": gate(14),
            "fc_w1": rand(kb[20], (D, D), s), "fc_w2": rand(kb[21], (D, D), s),
            "fc_b1": rand(kb[22], (D,), s), "fc_b2": rand(kb[23], (D,), s),
        })
    return params


def pack_params(raw, num_heads, param_dtype=jnp.bfloat16):
    """Pack raw params into fused, lane-dense (128-padded), bf16 kernel slabs.

    Padded lanes carry zero weights/biases, so padded activation lanes stay
    exactly zero through the whole network (see _layernorm for the only place
    that needs the real feature count)."""
    Fi, D = raw["we"].shape
    H = num_heads
    assert D % H == 0, "embed_dim must be divisible by num_heads"
    hd = D // H
    Dp = _round_up(D, _lcm(128, H))     # lane-padded model dim
    hdp = Dp // H                       # lane-padded per-head dim
    Fp = _round_up(Fi, 128)             # lane-padded input dim

    def pad_mat(w):                     # (D, D) -> (Dp, Dp)
        return jnp.pad(w, ((0, Dp - D), (0, Dp - D)))

    def pad_vec(v):                     # (D,) -> (Dp,)
        return jnp.pad(v, (0, Dp - D))

    def pad_head_cols(w):               # output dim grouped per head (Wq/Wk/Wv)
        w = w.reshape(D, H, hd)
        return jnp.pad(w, ((0, Dp - D), (0, 0), (0, hdp - hd))).reshape(Dp, Dp)

    def pad_head_rows(w):               # input dim grouped per head (Wo)
        w = w.reshape(H, hd, D)
        return jnp.pad(w, ((0, 0), (0, hdp - hd), (0, Dp - D))).reshape(Dp, Dp)

    def pad_head_vec(v):
        v = v.reshape(H, hd)
        return jnp.pad(v, ((0, 0), (0, hdp - hd))).reshape(Dp)

    wqkv, bqkv, wgy, wgx, wsq, gbias, vvec = [], [], [], [], [], [], []
    for blk in raw["blocks"]:
        wqkv.append(jnp.concatenate([pad_head_cols(blk["wq"]),
                                     pad_head_cols(blk["wk"]),
                                     pad_head_cols(blk["wv"])], axis=1))     # (Dp, 3Dp)
        bqkv.append(jnp.concatenate([pad_head_vec(blk["bq"]),
                                     pad_head_vec(blk["bk"]),
                                     pad_head_vec(blk["bv"])])[None, :])      # (1, 3Dp)

        def gate_slabs(g):
            wy = jnp.concatenate([pad_mat(g["Wr"]), pad_mat(g["Wz"]),
                                  pad_mat(g["Wg"])], axis=1)                  # (Dp, 3Dp)
            ux = jnp.concatenate([pad_mat(g["Ur"]), pad_mat(g["Uz"])], axis=1)  # (Dp, 2Dp)
            gb = jnp.concatenate([jnp.zeros((Dp,), jnp.float32), -pad_vec(g["bg"])])
            return wy, ux, gb

        wy1, ux1, gb1 = gate_slabs(blk["g1"])
        wy2, ux2, gb2 = gate_slabs(blk["g2"])
        wgy.append(jnp.stack([wy1, wy2], axis=0))                             # (2, Dp, 3Dp)
        wgx.append(jnp.stack([ux1, ux2], axis=0))                             # (2, Dp, 2Dp)
        gbias.append(jnp.stack([gb1, gb2], axis=0))                           # (2, 2Dp)
        wsq.append(jnp.stack([pad_head_rows(blk["wo"]),
                              pad_mat(blk["g1"]["Ug"]), pad_mat(blk["g2"]["Ug"]),
                              pad_mat(blk["fc_w1"]), pad_mat(blk["fc_w2"])],
                             axis=0))                                         # (5, Dp, Dp)
        vvec.append(jnp.stack([pad_vec(blk["ln1_w"]), pad_vec(blk["ln1_b"]),
                               pad_vec(blk["ln2_w"]), pad_vec(blk["ln2_b"]),
                               pad_vec(blk["bo"]),
                               pad_vec(blk["fc_b1"]), pad_vec(blk["fc_b2"])],
                              axis=0))                                        # (7, Dp)

    return {
        "embed_dim": D, "input_dim": Fi, "dp": Dp, "fp": Fp, "num_heads": H,
        "we": jnp.pad(raw["we"], ((0, Fp - Fi), (0, Dp - D))).astype(param_dtype),
        "be": pad_vec(raw["be"])[None, :],                                    # (1, Dp) f32
        "pos_table": jnp.pad(raw["pos_table"], ((0, 0), (0, Dp - D))),        # (T, Dp) f32
        "wqkv": jnp.stack(wqkv, 0).astype(param_dtype),   # (nb, Dp, 3Dp)
        "bqkv": jnp.stack(bqkv, 0),                       # (nb, 1, 3Dp) f32
        "wgy": jnp.stack(wgy, 0).astype(param_dtype),     # (nb, 2, Dp, 3Dp)
        "wgx": jnp.stack(wgx, 0).astype(param_dtype),     # (nb, 2, Dp, 2Dp)
        "wsq": jnp.stack(wsq, 0).astype(param_dtype),     # (nb, 5, Dp, Dp)
        "gbias": jnp.stack(gbias, 0),                     # (nb, 2, 2Dp) f32
        "vvec": jnp.stack(vvec, 0),                       # (nb, 7, Dp) f32
    }


# ------------------------------------ main ------------------------------------

if __name__ == "__main__":
    config = {"transformer": {"num_blocks": 2, "embed_dim": 32, "num_heads": 2,
                              "memory_length": 4, "gru_bias": 2.0}}
    input_dim = 24
    N, L = 2, 8
    max_episode_steps = 16
    D = config["transformer"]["embed_dim"]
    H = config["transformer"]["num_heads"]
    nb = config["transformer"]["num_blocks"]

    key = jax.random.PRNGKey(0)
    kp, kx = jax.random.split(key)
    raw = init_params(kp, input_dim, D, H, nb, max_episode_steps,
                      config["transformer"]["gru_bias"])
    params = pack_params(raw, num_heads=H, param_dtype=jnp.bfloat16)

    x = jax.random.normal(kx, (N, L, input_dim), jnp.float32)       # h (query)
    memories = jnp.zeros((N, L, nb, D), jnp.float32)                # unused in forward
    memory_indices = jnp.zeros((N, L), jnp.int32)                   # unused in forward
    mask = jnp.ones((N, L), dtype=bool).at[1, L - 1].set(False)

    h_out, out_memories = gated_transformer_xl_forward(
        params, x, memories, mask, memory_indices, num_heads=H)
    jax.block_until_ready((h_out, out_memories))

    assert h_out.shape == (N, L, D), h_out.shape
    assert out_memories.shape == (N, nb, L, D), out_memories.shape
    assert not bool(jnp.isnan(h_out).any()), "Transformer block returned NaN!"
    print("KERNEL_OK")
</pallas_src>

<mosaic_0001>
module attributes {stable_mosaic.version = 11 : i64} {
  func.func @kernel(%arg0: i32, %arg1: i32, %arg2: memref<2x8x128xbf16, #tpu.memory_space<vmem>>, %arg3: memref<2x1x8xf32, #tpu.memory_space<vmem>>, %arg4: memref<128x128xbf16, #tpu.memory_space<vmem>>, %arg5: memref<1x128xf32, #tpu.memory_space<vmem>>, %arg6: memref<8x128xf32, #tpu.memory_space<vmem>>, %arg7: memref<1x128x384xbf16, #tpu.memory_space<vmem>>, %arg8: memref<1x1x384xf32, #tpu.memory_space<vmem>>, %arg9: memref<1x2x128x384xbf16, #tpu.memory_space<vmem>>, %arg10: memref<1x2x128x256xbf16, #tpu.memory_space<vmem>>, %arg11: memref<1x5x128x128xbf16, #tpu.memory_space<vmem>>, %arg12: memref<1x2x256xf32, #tpu.memory_space<vmem>>, %arg13: memref<1x7x128xf32, #tpu.memory_space<vmem>>, %arg14: memref<2x8x128xf32, #tpu.memory_space<vmem>>, %arg15: memref<2x1x8x128xbf16, #tpu.memory_space<vmem>>, %arg16: memref<2x8x128xf32, #tpu.memory_space<vmem>>) attributes {dimension_semantics = [#tpu.dimension_semantics<parallel>, #tpu.dimension_semantics<arbitrary>], iteration_bounds = array<i64: 1, 2>, scalar_prefetch = 0 : i64, scratch_operands = 1 : i64, tpu.core_type = #tpu.core_type<tc>, window_params = [{transform_indices = @transform_0, window_bounds = array<i64: 2, 8, 128>}, {transform_indices = @transform_1, window_bounds = array<i64: 2, 1, 8>}, {pipeline_mode = #tpu.pipeline_mode<synchronous>, transform_indices = @transform_2, window_bounds = array<i64: 128, 128>}, {pipeline_mode = #tpu.pipeline_mode<synchronous>, transform_indices = @transform_3, window_bounds = array<i64: 1, 128>}, {pipeline_mode = #tpu.pipeline_mode<synchronous>, transform_indices = @transform_4, window_bounds = array<i64: 8, 128>}, {transform_indices = @transform_5, window_bounds = array<i64: 1, 128, 384>}, {transform_indices = @transform_6, window_bounds = array<i64: 1, 1, 384>}, {transform_indices = @transform_7, window_bounds = array<i64: 1, 2, 128, 384>}, {transform_indices = @transform_8, window_bounds = array<i64: 1, 2, 128, 256>}, {transform_indices = @transform_9, window_bounds = array<i64: 1, 5, 128, 128>}, {transform_indices = @transform_10, window_bounds = array<i64: 1, 2, 256>}, {transform_indices = @transform_11, window_bounds = array<i64: 1, 7, 128>}, {transform_indices = @transform_12, window_bounds = array<i64: 2, 8, 128>}, {transform_indices = @transform_13, window_bounds = array<i64: 2, 1, 8, 128>}]} {
    %c0_i32 = arith.constant 0 : i32
    %0 = arith.cmpi eq, %arg1, %c0_i32 : i32
    %1 = arith.extui %0 : i1 to i32
    %c0_i32_0 = arith.constant 0 : i32
    %2 = arith.cmpi ne, %1, %c0_i32_0 : i32
    scf.if %2 {
      %c0_106 = arith.constant 0 : index
      %c0_107 = arith.constant 0 : index
      %c0_108 = arith.constant 0 : index
      %244 = vector.load %arg2[%c0_106, %c0_107, %c0_108] : memref<2x8x128xbf16, #tpu.memory_space<vmem>>, vector<2x8x128xbf16>
      %245 = vector.shape_cast %244 : vector<2x8x128xbf16> to vector<16x128xbf16>
      %c0_109 = arith.constant 0 : index
      %c0_110 = arith.constant 0 : index
      %246 = vector.load %arg4[%c0_109, %c0_110] : memref<128x128xbf16, #tpu.memory_space<vmem>>, vector<128x128xbf16>
      %cst_111 = arith.constant dense<0.000000e+00> : vector<16x128xf32>
      %247 = tpu.matmul %245, %246, %cst_111 {dimension_numbers = #tpu.dot_dimension_numbers<[1], [0], [0], [1], [0, 0, 1, 1], [], []>} : vector<16x128xbf16>, vector<128x128xbf16>, vector<16x128xf32> -> vector<16x128xf32>
      %c0_112 = arith.constant 0 : index
      %c0_113 = arith.constant 0 : index
      %248 = vector.load %arg5[%c0_112, %c0_113] : memref<1x128xf32, #tpu.memory_space<vmem>>, vector<1x128xf32>
      %249 = vector.broadcast %248 : vector<1x128xf32> to vector<16x128xf32>
      %250 = arith.addf %247, %249 : vector<16x128xf32>
      %251 = arith.mulf %250, %250 : vector<16x128xf32>
      %252 = arith.mulf %250, %251 : vector<16x128xf32>
      %cst_114 = arith.constant 4.471500e-02 : f32
      %253 = vector.broadcast %cst_114 : f32 to vector<16x128xf32>
      %254 = arith.mulf %253, %252 : vector<16x128xf32>
      %255 = arith.addf %250, %254 : vector<16x128xf32>
      %cst_115 = arith.constant 0.797884583 : f32
      %256 = vector.broadcast %cst_115 : f32 to vector<16x128xf32>
      %257 = arith.mulf %256, %255 : vector<16x128xf32>
      %258 = math.tanh %257 : vector<16x128xf32>
      %cst_116 = arith.constant 1.000000e+00 : f32
      %259 = vector.broadcast %cst_116 : f32 to vector<16x128xf32>
      %260 = arith.addf %259, %258 : vector<16x128xf32>
      %cst_117 = arith.constant 5.000000e-01 : f32
      %261 = vector.broadcast %cst_117 : f32 to vector<16x128xf32>
      %262 = arith.mulf %261, %260 : vector<16x128xf32>
      %263 = arith.mulf %250, %262 : vector<16x128xf32>
      %264 = vector.shape_cast %263 : vector<16x128xf32> to vector<2x8x128xf32>
      %c0_118 = arith.constant 0 : index
      %c0_119 = arith.constant 0 : index
      %265 = vector.load %arg6[%c0_118, %c0_119] : memref<8x128xf32, #tpu.memory_space<vmem>>, vector<8x128xf32>
      %266 = vector.shape_cast %265 : vector<8x128xf32> to vector<1x8x128xf32>
      %267 = vector.broadcast %266 : vector<1x8x128xf32> to vector<2x8x128xf32>
      %268 = arith.addf %264, %267 : vector<2x8x128xf32>
      %c0_120 = arith.constant 0 : index
      %c0_121 = arith.constant 0 : index
      %c0_122 = arith.constant 0 : index
      %269 = vector.load %arg16[%c0_120, %c0_121, %c0_122] : memref<2x8x128xf32, #tpu.memory_space<vmem>>, vector<2x8x128xf32>
      tpu.vector_store %arg16[%c0_120, %c0_121, %c0_122], %268 {strides = array<i32>} : memref<2x8x128xf32, #tpu.memory_space<vmem>>, vector<2x8x128xf32>,
    } else {
    }
    %c0 = arith.constant 0 : index
    %c0_1 = arith.constant 0 : index
    %c0_2 = arith.constant 0 : index
    %3 = vector.load %arg16[%c0, %c0_1, %c0_2] : memref<2x8x128xf32, #tpu.memory_space<vmem>>, vector<2x8x128xf32>
    %4 = arith.truncf %3 : vector<2x8x128xf32> to vector<2x8x128xbf16>
    %c0_3 = arith.constant 0 : index
    %c0_4 = arith.constant 0 : index
    %c0_5 = arith.constant 0 : index
    %c0_6 = arith.constant 0 : index
    %5 = vector.load %arg15[%c0_3, %c0_4, %c0_5, %c0_6] : memref<2x1x8x128xbf16, #tpu.memory_space<vmem>>, vector<2x1x8x128xbf16>
    %6 = vector.shape_cast %5 : vector<2x1x8x128xbf16> to vector<2x8x128xbf16>
    %7 = vector.shape_cast %4 : vector<2x8x128xbf16> to vector<2x1x8x128xbf16>
    tpu.vector_store %arg15[%c0_3, %c0_4, %c0_5, %c0_6], %7 {strides = array<i32>} : memref<2x1x8x128xbf16, #tpu.memory_space<vmem>>, vector<2x1x8x128xbf16>,
    %c0_7 = arith.constant 0 : index
    %c0_8 = arith.constant 0 : index
    %c0_9 = arith.constant 0 : index
    %8 = vector.load %arg13[%c0_7, %c0_8, %c0_9] : memref<1x7x128xf32, #tpu.memory_space<vmem>>, vector<1x7x128xf32>
    %9 = vector.shape_cast %8 : vector<1x7x128xf32> to vector<7x128xf32>
    %10 = vector.extract_strided_slice %9 {offsets = [0, 0], sizes = [1, 128], strides = [1, 1]} : vector<7x128xf32> to vector<1x128xf32>
    %11 = vector.extract_strided_slice %9 {offsets = [1, 0], sizes = [1, 128], strides = [1, 1]} : vector<7x128xf32> to vector<1x128xf32>
    %12 = vector.extract_strided_slice %9 {offsets = [2, 0], sizes = [1, 128], strides = [1, 1]} : vector<7x128xf32> to vector<1x128xf32>
    %13 = vector.extract_strided_slice %9 {offsets = [3, 0], sizes = [1, 128], strides = [1, 1]} : vector<7x128xf32> to vector<1x128xf32>
    %14 = vector.extract_strided_slice %9 {offsets = [4, 0], sizes = [1, 128], strides = [1, 1]} : vector<7x128xf32> to vector<1x128xf32>
    %15 = vector.extract_strided_slice %9 {offsets = [5, 0], sizes = [1, 128], strides = [1, 1]} : vector<7x128xf32> to vector<1x128xf32>
    %16 = vector.extract_strided_slice %9 {offsets = [6, 0], sizes = [1, 128], strides = [1, 1]} : vector<7x128xf32> to vector<1x128xf32>
    %c0_10 = arith.constant 0 : index
    %c0_11 = arith.constant 0 : index
    %c0_12 = arith.constant 0 : index
    %17 = vector.load %arg12[%c0_10, %c0_11, %c0_12] : memref<1x2x256xf32, #tpu.memory_space<vmem>>, vector<1x2x256xf32>
    %18 = vector.shape_cast %17 : vector<1x2x256xf32> to vector<2x256xf32>
    %c0_13 = arith.constant 0 : index
    %c0_14 = arith.constant 0 : index
    %c0_15 = arith.constant 0 : index
    %19 = vector.load %arg16[%c0_13, %c0_14, %c0_15] : memref<2x8x128xf32, #tpu.memory_space<vmem>>, vector<2x8x128xf32>
    %20 = vector.shape_cast %19 : vector<2x8x128xf32> to vector<16x128xf32>
    %cst = arith.constant dense<0.000000e+00> : vector<16xf32>
    %21 = vector.multi_reduction <add>, %20, %cst [1] : vector<16x128xf32> to vector<16xf32>
    %22 = vector.shape_cast %21 : vector<16xf32> to vector<16x1xf32>
    %cst_16 = arith.constant 3.125000e-02 : f32
    %23 = vector.broadcast %cst_16 : f32 to vector<16x1xf32>
    %24 = arith.mulf %22, %23 : vector<16x1xf32>
    %25 = vector.broadcast %24 : vector<16x1xf32> to vector<16x128xf32>
    %26 = arith.subf %20, %25 : vector<16x128xf32>
    %27 = arith.mulf %26, %26 : vector<16x128xf32>
    %cst_17 = arith.constant dense<0.000000e+00> : vector<16xf32>
    %28 = vector.multi_reduction <add>, %27, %cst_17 [1] : vector<16x128xf32> to vector<16xf32>
    %29 = vector.shape_cast %28 : vector<16xf32> to vector<16x1xf32>
    %30 = arith.mulf %24, %24 : vector<16x1xf32>
    %cst_18 = arith.constant 9.600000e+01 : f32
    %31 = vector.broadcast %cst_18 : f32 to vector<16x1xf32>
    %32 = arith.mulf %31, %30 : vector<16x1xf32>
    %33 = arith.subf %29, %32 : vector<16x1xf32>
    %cst_19 = arith.constant 3.125000e-02 : f32
    %34 = vector.broadcast %cst_19 : f32 to vector<16x1xf32>
    %35 = arith.mulf %33, %34 : vector<16x1xf32>
    %cst_20 = arith.constant 9.99999974E-6 : f32
    %36 = vector.broadcast %cst_20 : f32 to vector<16x1xf32>
    %37 = arith.addf %35, %36 : vector<16x1xf32>
    %38 = math.rsqrt %37 : vector<16x1xf32>
    %39 = vector.broadcast %38 : vector<16x1xf32> to vector<16x128xf32>
    %40 = arith.mulf %26, %39 : vector<16x128xf32>
    %41 = vector.broadcast %10 : vector<1x128xf32> to vector<16x128xf32>
    %42 = arith.mulf %40, %41 : vector<16x128xf32>
    %43 = vector.broadcast %11 : vector<1x128xf32> to vector<16x128xf32>
    %44 = arith.addf %42, %43 : vector<16x128xf32>
    %c0_21 = arith.constant 0 : index
    %c0_22 = arith.constant 0 : index
    %c0_23 = arith.constant 0 : index
    %45 = vector.load %arg7[%c0_21, %c0_22, %c0_23] : memref<1x128x384xbf16, #tpu.memory_space<vmem>>, vector<1x128x384xbf16>
    %46 = vector.shape_cast %45 : vector<1x128x384xbf16> to vector<128x384xbf16>
    %47 = arith.truncf %44 : vector<16x128xf32> to vector<16x128xbf16>
    %cst_24 = arith.constant dense<0.000000e+00> : vector<16x384xf32>
    %48 = tpu.matmul %47, %46, %cst_24 {dimension_numbers = #tpu.dot_dimension_numbers<[1], [0], [0], [1], [0, 0, 1, 1], [], []>} : vector<16x128xbf16>, vector<128x384xbf16>, vector<16x384xf32> -> vector<16x384xf32>
    %c0_25 = arith.constant 0 : index
    %c0_26 = arith.constant 0 : index
    %c0_27 = arith.constant 0 : index
    %49 = vector.load %arg8[%c0_25, %c0_26, %c0_27] : memref<1x1x384xf32, #tpu.memory_space<vmem>>, vector<1x1x384xf32>
    %50 = vector.shape_cast %49 : vector<1x1x384xf32> to vector<1x384xf32>
    %51 = vector.broadcast %50 : vector<1x384xf32> to vector<16x384xf32>
    %52 = arith.addf %48, %51 : vector<16x384xf32>
    %53 = vector.shape_cast %52 : vector<16x384xf32> to vector<2x8x384xf32>
    %c0_28 = arith.constant 0 : index
    %c0_29 = arith.constant 0 : index
    %c0_30 = arith.constant 0 : index
    %54 = vector.load %arg3[%c0_28, %c0_29, %c0_30] : memref<2x1x8xf32, #tpu.memory_space<vmem>>, vector<2x1x8xf32>
    %55 = vector.extract_strided_slice %53 {offsets = [0, 0, 0], sizes = [2, 8, 64], strides = [1, 1, 1]} : vector<2x8x384xf32> to vector<2x8x64xf32>
    %56 = arith.truncf %55 : vector<2x8x64xf32> to vector<2x8x64xbf16>
    %57 = vector.extract_strided_slice %53 {offsets = [0, 0, 128], sizes = [2, 8, 64], strides = [1, 1, 1]} : vector<2x8x384xf32> to vector<2x8x64xf32>
    %58 = arith.truncf %57 : vector<2x8x64xf32> to vector<2x8x64xbf16>
    %59 = vector.extract_strided_slice %53 {offsets = [0, 0, 256], sizes = [2, 8, 64], strides = [1, 1, 1]} : vector<2x8x384xf32> to vector<2x8x64xf32>
    %60 = arith.truncf %59 : vector<2x8x64xf32> to vector<2x8x64xbf16>
    "tpu.trace_start"() <{level = 10 : i32, message = "bqd,bkd->bqk"}> : () -> ()
    %cst_31 = arith.constant dense<0.000000e+00> : vector<2x8x8xf32>
    %61 = tpu.matmul %56, %58, %cst_31 {dimension_numbers = #tpu.dot_dimension_numbers<[2], [2], [1], [1], [0, 0, 0, 1, 1, 1], [0], [0]>} : vector<2x8x64xbf16>, vector<2x8x64xbf16>, vector<2x8x8xf32> -> vector<2x8x8xf32>
    "tpu.trace_stop"() : () -> ()
    %cst_32 = arith.constant 2.500000e-01 : f32
    %62 = vector.broadcast %cst_32 : f32 to vector<2x8x8xf32>
    %63 = arith.mulf %61, %62 : vector<2x8x8xf32>
    %64 = vector.broadcast %54 : vector<2x1x8xf32> to vector<2x8x8xf32>
    %65 = arith.addf %63, %64 : vector<2x8x8xf32>
    %cst_33 = arith.constant dense<0xFF800000> : vector<2x8xf32>
    %66 = vector.multi_reduction <maximumf>, %65, %cst_33 [2] : vector<2x8x8xf32> to vector<2x8xf32>
    %cst_34 = arith.constant 0xFF800000 : f32
    %67 = vector.broadcast %cst_34 : f32 to vector<2x8xf32>
    %68 = arith.maximumf %67, %66 : vector<2x8xf32>
    %69 = vector.shape_cast %68 : vector<2x8xf32> to vector<2x8x1xf32>
    %70 = vector.broadcast %69 : vector<2x8x1xf32> to vector<2x8x8xf32>
    %71 = arith.subf %65, %70 : vector<2x8x8xf32>
    %72 = math.exp %71 : vector<2x8x8xf32>
    %cst_35 = arith.constant dense<0.000000e+00> : vector<2x8xf32>
    %73 = vector.multi_reduction <add>, %72, %cst_35 [2] : vector<2x8x8xf32> to vector<2x8xf32>
    %74 = vector.shape_cast %73 : vector<2x8xf32> to vector<2x8x1xf32>
    %75 = vector.broadcast %74 : vector<2x8x1xf32> to vector<2x8x8xf32>
    %76 = arith.divf %72, %75 : vector<2x8x8xf32>
    %77 = arith.truncf %76 : vector<2x8x8xf32> to vector<2x8x8xbf16>
    "tpu.trace_start"() <{level = 10 : i32, message = "bqk,bkd->bqd"}> : () -> ()
    %cst_36 = arith.constant dense<0.000000e+00> : vector<2x8x64xf32>
    %78 = tpu.matmul %77, %60, %cst_36 {dimension_numbers = #tpu.dot_dimension_numbers<[2], [1], [1], [2], [0, 0, 0, 1, 1, 2], [0], [0]>} : vector<2x8x8xbf16>, vector<2x8x64xbf16>, vector<2x8x64xf32> -> vector<2x8x64xf32>
    "tpu.trace_stop"() : () -> ()
    %79 = vector.extract_strided_slice %53 {offsets = [0, 0, 64], sizes = [2, 8, 64], strides = [1, 1, 1]} : vector<2x8x384xf32> to vector<2x8x64xf32>
    %80 = arith.truncf %79 : vector<2x8x64xf32> to vector<2x8x64xbf16>
    %81 = vector.extract_strided_slice %53 {offsets = [0, 0, 192], sizes = [2, 8, 64], strides = [1, 1, 1]} : vector<2x8x384xf32> to vector<2x8x64xf32>
    %82 = arith.truncf %81 : vector<2x8x64xf32> to vector<2x8x64xbf16>
    %83 = vector.extract_strided_slice %53 {offsets = [0, 0, 320], sizes = [2, 8, 64], strides = [1, 1, 1]} : vector<2x8x384xf32> to vector<2x8x64xf32>
    %84 = arith.truncf %83 : vector<2x8x64xf32> to vector<2x8x64xbf16>
    "tpu.trace_start"() <{level = 10 : i32, message = "bqd,bkd->bqk"}> : () -> ()
    %cst_37 = arith.constant dense<0.000000e+00> : vector<2x8x8xf32>
    %85 = tpu.matmul %80, %82, %cst_37 {dimension_numbers = #tpu.dot_dimension_numbers<[2], [2], [1], [1], [0, 0, 0, 1, 1, 1], [0], [0]>} : vector<2x8x64xbf16>, vector<2x8x64xbf16>, vector<2x8x8xf32> -> vector<2x8x8xf32>
    "tpu.trace_stop"() : () -> ()
    %cst_38 = arith.constant 2.500000e-01 : f32
    %86 = vector.broadcast %cst_38 : f32 to vector<2x8x8xf32>
    %87 = arith.mulf %85, %86 : vector<2x8x8xf32>
    %88 = vector.broadcast %54 : vector<2x1x8xf32> to vector<2x8x8xf32>
    %89 = arith.addf %87, %88 : vector<2x8x8xf32>
    %cst_39 = arith.constant dense<0xFF800000> : vector<2x8xf32>
    %90 = vector.multi_reduction <maximumf>, %89, %cst_39 [2] : vector<2x8x8xf32> to vector<2x8xf32>
    %cst_40 = arith.constant 0xFF800000 : f32
    %91 = vector.broadcast %cst_40 : f32 to vector<2x8xf32>
    %92 = arith.maximumf %91, %90 : vector<2x8xf32>
    %93 = vector.shape_cast %92 : vector<2x8xf32> to vector<2x8x1xf32>
    %94 = vector.broadcast %93 : vector<2x8x1xf32> to vector<2x8x8xf32>
    %95 = arith.subf %89, %94 : vector<2x8x8xf32>
    %96 = math.exp %95 : vector<2x8x8xf32>
    %cst_41 = arith.constant dense<0.000000e+00> : vector<2x8xf32>
    %97 = vector.multi_reduction <add>, %96, %cst_41 [2] : vector<2x8x8xf32> to vector<2x8xf32>
    %98 = vector.shape_cast %97 : vector<2x8xf32> to vector<2x8x1xf32>
    %99 = vector.broadcast %98 : vector<2x8x1xf32> to vector<2x8x8xf32>
    %100 = arith.divf %96, %99 : vector<2x8x8xf32>
    %101 = arith.truncf %100 : vector<2x8x8xf32> to vector<2x8x8xbf16>
    "tpu.trace_start"() <{level = 10 : i32, message = "bqk,bkd->bqd"}> : () -> ()
    %cst_42 = arith.constant dense<0.000000e+00> : vector<2x8x64xf32>
    %102 = tpu.matmul %101, %84, %cst_42 {dimension_numbers = #tpu.dot_dimension_numbers<[2], [1], [1], [2], [0, 0, 0, 1, 1, 2], [0], [0]>} : vector<2x8x8xbf16>, vector<2x8x64xbf16>, vector<2x8x64xf32> -> vector<2x8x64xf32>
    "tpu.trace_stop"() : () -> ()
    %103 = tpu.concatenate %78, %102 in 2 : vector<2x8x64xf32>, vector<2x8x64xf32> -> vector<2x8x128xf32>
    %104 = vector.shape_cast %103 : vector<2x8x128xf32> to vector<16x128xf32>
    %c0_43 = arith.constant 0 : index
    %c0_44 = arith.constant 0 : index
    %c0_45 = arith.constant 0 : index
    %c0_46 = arith.constant 0 : index
    %105 = vector.load %arg11[%c0_43, %c0_44, %c0_45, %c0_46] : memref<1x5x128x128xbf16, #tpu.memory_space<vmem>>, vector<1x1x128x128xbf16>
    %106 = vector.shape_cast %105 : vector<1x1x128x128xbf16> to vector<128x128xbf16>
    %107 = arith.truncf %104 : vector<16x128xf32> to vector<16x128xbf16>
    %cst_47 = arith.constant dense<0.000000e+00> : vector<16x128xf32>
    %108 = tpu.matmul %107, %106, %cst_47 {dimension_numbers = #tpu.dot_dimension_numbers<[1], [0], [0], [1], [0, 0, 1, 1], [], []>} : vector<16x128xbf16>, vector<128x128xbf16>, vector<16x128xf32> -> vector<16x128xf32>
    %109 = vector.broadcast %14 : vector<1x128xf32> to vector<16x128xf32>
    %110 = arith.addf %108, %109 : vector<16x128xf32>
    %c0_48 = arith.constant 0 : index
    %c0_49 = arith.constant 0 : index
    %c0_50 = arith.constant 0 : index
    %c0_51 = arith.constant 0 : index
    %111 = vector.load %arg9[%c0_48, %c0_49, %c0_50, %c0_51] : memref<1x2x128x384xbf16, #tpu.memory_space<vmem>>, vector<1x1x128x384xbf16>
    %112 = vector.shape_cast %111 : vector<1x1x128x384xbf16> to vector<128x384xbf16>
    %c0_52 = arith.constant 0 : index
    %c0_53 = arith.constant 0 : index
    %c0_54 = arith.constant 0 : index
    %c0_55 = arith.constant 0 : index
    %113 = vector.load %arg10[%c0_52, %c0_53, %c0_54, %c0_55] : memref<1x2x128x256xbf16, #tpu.memory_space<vmem>>, vector<1x1x128x256xbf16>
    %114 = vector.shape_cast %113 : vector<1x1x128x256xbf16> to vector<128x256xbf16>
    %c0_56 = arith.constant 0 : index
    %c1 = arith.constant 1 : index
    %c0_57 = arith.constant 0 : index
    %c0_58 = arith.constant 0 : index
    %115 = vector.load %arg11[%c0_56, %c1, %c0_57, %c0_58] : memref<1x5x128x128xbf16, #tpu.memory_space<vmem>>, vector<1x1x128x128xbf16>
    %116 = vector.shape_cast %115 : vector<1x1x128x128xbf16> to vector<128x128xbf16>
    %117 = vector.extract_strided_slice %18 {offsets = [0, 0], sizes = [1, 256], strides = [1, 1]} : vector<2x256xf32> to vector<1x256xf32>
    %118 = arith.truncf %110 : vector<16x128xf32> to vector<16x128xbf16>
    %cst_59 = arith.constant dense<0.000000e+00> : vector<16x384xf32>
    %119 = tpu.matmul %118, %112, %cst_59 {dimension_numbers = #tpu.dot_dimension_numbers<[1], [0], [0], [1], [0, 0, 1, 1], [], []>} : vector<16x128xbf16>, vector<128x384xbf16>, vector<16x384xf32> -> vector<16x384xf32>
    %120 = arith.truncf %20 : vector<16x128xf32> to vector<16x128xbf16>
    %cst_60 = arith.constant dense<0.000000e+00> : vector<16x256xf32>
    %121 = tpu.matmul %120, %114, %cst_60 {dimension_numbers = #tpu.dot_dimension_numbers<[1], [0], [0], [1], [0, 0, 1, 1], [], []>} : vector<16x128xbf16>, vector<128x256xbf16>, vector<16x256xf32> -> vector<16x256xf32>
    %122 = vector.extract_strided_slice %119 {offsets = [0, 0], sizes = [16, 256], strides = [1, 1]} : vector<16x384xf32> to vector<16x256xf32>
    %123 = arith.addf %122, %121 : vector<16x256xf32>
    %124 = vector.broadcast %117 : vector<1x256xf32> to vector<16x256xf32>
    %125 = arith.addf %123, %124 : vector<16x256xf32>
    %126 = arith.negf %125 : vector<16x256xf32>
    %127 = math.exp %126 : vector<16x256xf32>
    %cst_61 = arith.constant 1.000000e+00 : f32
    %128 = vector.broadcast %cst_61 : f32 to vector<16x256xf32>
    %129 = arith.addf %128, %127 : vector<16x256xf32>
    %130 = arith.divf %128, %129 : vector<16x256xf32>
    %131 = vector.extract_strided_slice %130 {offsets = [0, 0], sizes = [16, 128], strides = [1, 1]} : vector<16x256xf32> to vector<16x128xf32>
    %132 = vector.extract_strided_slice %130 {offsets = [0, 128], sizes = [16, 128], strides = [1, 1]} : vector<16x256xf32> to vector<16x128xf32>
    %133 = vector.extract_strided_slice %119 {offsets = [0, 256], sizes = [16, 128], strides = [1, 1]} : vector<16x384xf32> to vector<16x128xf32>
    %134 = arith.mulf %131, %20 : vector<16x128xf32>
    %135 = arith.truncf %134 : vector<16x128xf32> to vector<16x128xbf16>
    %cst_62 = arith.constant dense<0.000000e+00> : vector<16x128xf32>
    %136 = tpu.matmul %135, %116, %cst_62 {dimension_numbers = #tpu.dot_dimension_numbers<[1], [0], [0], [1], [0, 0, 1, 1], [], []>} : vector<16x128xbf16>, vector<128x128xbf16>, vector<16x128xf32> -> vector<16x128xf32>
    %137 = arith.addf %133, %136 : vector<16x128xf32>
    %138 = math.tanh %137 : vector<16x128xf32>
    %cst_63 = arith.constant 1.000000e+00 : f32
    %139 = vector.broadcast %cst_63 : f32 to vector<16x128xf32>
    %140 = arith.subf %139, %132 : vector<16x128xf32>
    %141 = arith.mulf %140, %20 : vector<16x128xf32>
    %142 = arith.mulf %132, %138 : vector<16x128xf32>
    %143 = arith.addf %141, %142 : vector<16x128xf32>
    %cst_64 = arith.constant dense<0.000000e+00> : vector<16xf32>
    %144 = vector.multi_reduction <add>, %143, %cst_64 [1] : vector<16x128xf32> to vector<16xf32>
    %145 = vector.shape_cast %144 : vector<16xf32> to vector<16x1xf32>
    %cst_65 = arith.constant 3.125000e-02 : f32
    %146 = vector.broadcast %cst_65 : f32 to vector<16x1xf32>
    %147 = arith.mulf %145, %146 : vector<16x1xf32>
    %148 = vector.broadcast %147 : vector<16x1xf32> to vector<16x128xf32>
    %149 = arith.subf %143, %148 : vector<16x128xf32>
    %150 = arith.mulf %149, %149 : vector<16x128xf32>
    %cst_66 = arith.constant dense<0.000000e+00> : vector<16xf32>
    %151 = vector.multi_reduction <add>, %150, %cst_66 [1] : vector<16x128xf32> to vector<16xf32>
    %152 = vector.shape_cast %151 : vector<16xf32> to vector<16x1xf32>
    %153 = arith.mulf %147, %147 : vector<16x1xf32>
    %cst_67 = arith.constant 9.600000e+01 : f32
    %154 = vector.broadcast %cst_67 : f32 to vector<16x1xf32>
    %155 = arith.mulf %154, %153 : vector<16x1xf32>
    %156 = arith.subf %152, %155 : vector<16x1xf32>
    %cst_68 = arith.constant 3.125000e-02 : f32
    %157 = vector.broadcast %cst_68 : f32 to vector<16x1xf32>
    %158 = arith.mulf %156, %157 : vector<16x1xf32>
    %cst_69 = arith.constant 9.99999974E-6 : f32
    %159 = vector.broadcast %cst_69 : f32 to vector<16x1xf32>
    %160 = arith.addf %158, %159 : vector<16x1xf32>
    %161 = math.rsqrt %160 : vector<16x1xf32>
    %162 = vector.broadcast %161 : vector<16x1xf32> to vector<16x128xf32>
    %163 = arith.mulf %149, %162 : vector<16x128xf32>
    %164 = vector.broadcast %12 : vector<1x128xf32> to vector<16x128xf32>
    %165 = arith.mulf %163, %164 : vector<16x128xf32>
    %166 = vector.broadcast %13 : vector<1x128xf32> to vector<16x128xf32>
    %167 = arith.addf %165, %166 : vector<16x128xf32>
    %c0_70 = arith.constant 0 : index
    %c3 = arith.constant 3 : index
    %c0_71 = arith.constant 0 : index
    %c0_72 = arith.constant 0 : index
    %168 = vector.load %arg11[%c0_70, %c3, %c0_71, %c0_72] : memref<1x5x128x128xbf16, #tpu.memory_space<vmem>>, vector<1x1x128x128xbf16>
    %169 = vector.shape_cast %168 : vector<1x1x128x128xbf16> to vector<128x128xbf16>
    %170 = arith.truncf %167 : vector<16x128xf32> to vector<16x128xbf16>
    %cst_73 = arith.constant dense<0.000000e+00> : vector<16x128xf32>
    %171 = tpu.matmul %170, %169, %cst_73 {dimension_numbers = #tpu.dot_dimension_numbers<[1], [0], [0], [1], [0, 0, 1, 1], [], []>} : vector<16x128xbf16>, vector<128x128xbf16>, vector<16x128xf32> -> vector<16x128xf32>
    %172 = vector.broadcast %15 : vector<1x128xf32> to vector<16x128xf32>
    %173 = arith.addf %171, %172 : vector<16x128xf32>
    %174 = arith.mulf %173, %173 : vector<16x128xf32>
    %175 = arith.mulf %173, %174 : vector<16x128xf32>
    %cst_74 = arith.constant 4.471500e-02 : f32
    %176 = vector.broadcast %cst_74 : f32 to vector<16x128xf32>
    %177 = arith.mulf %176, %175 : vector<16x128xf32>
    %178 = arith.addf %173, %177 : vector<16x128xf32>
    %cst_75 = arith.constant 0.797884583 : f32
    %179 = vector.broadcast %cst_75 : f32 to vector<16x128xf32>
    %180 = arith.mulf %179, %178 : vector<16x128xf32>
    %181 = math.tanh %180 : vector<16x128xf32>
    %cst_76 = arith.constant 1.000000e+00 : f32
    %182 = vector.broadcast %cst_76 : f32 to vector<16x128xf32>
    %183 = arith.addf %182, %181 : vector<16x128xf32>
    %cst_77 = arith.constant 5.000000e-01 : f32
    %184 = vector.broadcast %cst_77 : f32 to vector<16x128xf32>
    %185 = arith.mulf %184, %183 : vector<16x128xf32>
    %186 = arith.mulf %173, %185 : vector<16x128xf32>
    %c0_78 = arith.constant 0 : index
    %c4 = arith.constant 4 : index
    %c0_79 = arith.constant 0 : index
    %c0_80 = arith.constant 0 : index
    %187 = vector.load %arg11[%c0_78, %c4, %c0_79, %c0_80] : memref<1x5x128x128xbf16, #tpu.memory_space<vmem>>, vector<1x1x128x128xbf16>
    %188 = vector.shape_cast %187 : vector<1x1x128x128xbf16> to vector<128x128xbf16>
    %189 = arith.truncf %186 : vector<16x128xf32> to vector<16x128xbf16>
    %cst_81 = arith.constant dense<0.000000e+00> : vector<16x128xf32>
    %190 = tpu.matmul %189, %188, %cst_81 {dimension_numbers = #tpu.dot_dimension_numbers<[1], [0], [0], [1], [0, 0, 1, 1], [], []>} : vector<16x128xbf16>, vector<128x128xbf16>, vector<16x128xf32> -> vector<16x128xf32>
    %191 = vector.broadcast %16 : vector<1x128xf32> to vector<16x128xf32>
    %192 = arith.addf %190, %191 : vector<16x128xf32>
    %193 = arith.mulf %192, %192 : vector<16x128xf32>
    %194 = arith.mulf %192, %193 : vector<16x128xf32>
    %cst_82 = arith.constant 4.471500e-02 : f32
    %195 = vector.broadcast %cst_82 : f32 to vector<16x128xf32>
    %196 = arith.mulf %195, %194 : vector<16x128xf32>
    %197 = arith.addf %192, %196 : vector<16x128xf32>
    %cst_83 = arith.constant 0.797884583 : f32
    %198 = vector.broadcast %cst_83 : f32 to vector<16x128xf32>
    %199 = arith.mulf %198, %197 : vector<16x128xf32>
    %200 = math.tanh %199 : vector<16x128xf32>
    %cst_84 = arith.constant 1.000000e+00 : f32
    %201 = vector.broadcast %cst_84 : f32 to vector<16x128xf32>
    %202 = arith.addf %201, %200 : vector<16x128xf32>
    %cst_85 = arith.constant 5.000000e-01 : f32
    %203 = vector.broadcast %cst_85 : f32 to vector<16x128xf32>
    %204 = arith.mulf %203, %202 : vector<16x128xf32>
    %205 = arith.mulf %192, %204 : vector<16x128xf32>
    %c0_86 = arith.constant 0 : index
    %c1_87 = arith.constant 1 : index
    %c0_88 = arith.constant 0 : index
    %c0_89 = arith.constant 0 : index
    %206 = vector.load %arg9[%c0_86, %c1_87, %c0_88, %c0_89] : memref<1x2x128x384xbf16, #tpu.memory_space<vmem>>, vector<1x1x128x384xbf16>
    %207 = vector.shape_cast %206 : vector<1x1x128x384xbf16> to vector<128x384xbf16>
    %c0_90 = arith.constant 0 : index
    %c1_91 = arith.constant 1 : index
    %c0_92 = arith.constant 0 : index
    %c0_93 = arith.constant 0 : index
    %208 = vector.load %arg10[%c0_90, %c1_91, %c0_92, %c0_93] : memref<1x2x128x256xbf16, #tpu.memory_space<vmem>>, vector<1x1x128x256xbf16>
    %209 = vector.shape_cast %208 : vector<1x1x128x256xbf16> to vector<128x256xbf16>
    %c0_94 = arith.constant 0 : index
    %c2 = arith.constant 2 : index
    %c0_95 = arith.constant 0 : index
    %c0_96 = arith.constant 0 : index
    %210 = vector.load %arg11[%c0_94, %c2, %c0_95, %c0_96] : memref<1x5x128x128xbf16, #tpu.memory_space<vmem>>, vector<1x1x128x128xbf16>
    %211 = vector.shape_cast %210 : vector<1x1x128x128xbf16> to vector<128x128xbf16>
    %212 = vector.extract_strided_slice %18 {offsets = [1, 0], sizes = [1, 256], strides = [1, 1]} : vector<2x256xf32> to vector<1x256xf32>
    %213 = arith.truncf %205 : vector<16x128xf32> to vector<16x128xbf16>
    %cst_97 = arith.constant dense<0.000000e+00> : vector<16x384xf32>
    %214 = tpu.matmul %213, %207, %cst_97 {dimension_numbers = #tpu.dot_dimension_numbers<[1], [0], [0], [1], [0, 0, 1, 1], [], []>} : vector<16x128xbf16>, vector<128x384xbf16>, vector<16x384xf32> -> vector<16x384xf32>
    %215 = arith.truncf %143 : vector<16x128xf32> to vector<16x128xbf16>
    %cst_98 = arith.constant dense<0.000000e+00> : vector<16x256xf32>
    %216 = tpu.matmul %215, %209, %cst_98 {dimension_numbers = #tpu.dot_dimension_numbers<[1], [0], [0], [1], [0, 0, 1, 1], [], []>} : vector<16x128xbf16>, vector<128x256xbf16>, vector<16x256xf32> -> vector<16x256xf32>
    %217 = vector.extract_strided_slice %214 {offsets = [0, 0], sizes = [16, 256], strides = [1, 1]} : vector<16x384xf32> to vector<16x256xf32>
    %218 = arith.addf %217, %216 : vector<16x256xf32>
    %219 = vector.broadcast %212 : vector<1x256xf32> to vector<16x256xf32>
    %220 = arith.addf %218, %219 : vector<16x256xf32>
    %221 = arith.negf %220 : vector<16x256xf32>
    %222 = math.exp %221 : vector<16x256xf32>
    %cst_99 = arith.constant 1.000000e+00 : f32
    %223 = vector.broadcast %cst_99 : f32 to vector<16x256xf32>
    %224 = arith.addf %223, %222 : vector<16x256xf32>
    %225 = arith.divf %223, %224 : vector<16x256xf32>
    %226 = vector.extract_strided_slice %225 {offsets = [0, 0], sizes = [16, 128], strides = [1, 1]} : vector<16x256xf32> to vector<16x128xf32>
    %227 = vector.extract_strided_slice %225 {offsets = [0, 128], sizes = [16, 128], strides = [1, 1]} : vector<16x256xf32> to vector<16x128xf32>
    %228 = vector.extract_strided_slice %214 {offsets = [0, 256], sizes = [16, 128], strides = [1, 1]} : vector<16x384xf32> to vector<16x128xf32>
    %229 = arith.mulf %226, %143 : vector<16x128xf32>
    %230 = arith.truncf %229 : vector<16x128xf32> to vector<16x128xbf16>
    %cst_100 = arith.constant dense<0.000000e+00> : vector<16x128xf32>
    %231 = tpu.matmul %230, %211, %cst_100 {dimension_numbers = #tpu.dot_dimension_numbers<[1], [0], [0], [1], [0, 0, 1, 1], [], []>} : vector<16x128xbf16>, vector<128x128xbf16>, vector<16x128xf32> -> vector<16x128xf32>
    %232 = arith.addf %228, %231 : vector<16x128xf32>
    %233 = math.tanh %232 : vector<16x128xf32>
    %cst_101 = arith.constant 1.000000e+00 : f32
    %234 = vector.broadcast %cst_101 : f32 to vector<16x128xf32>
    %235 = arith.subf %234, %227 : vector<16x128xf32>
    %236 = arith.mulf %235, %143 : vector<16x128xf32>
    %237 = arith.mulf %227, %233 : vector<16x128xf32>
    %238 = arith.addf %236, %237 : vector<16x128xf32>
    %239 = vector.shape_cast %238 : vector<16x128xf32> to vector<2x8x128xf32>
    %c0_102 = arith.constant 0 : index
    %c0_103 = arith.constant 0 : index
    %c0_104 = arith.constant 0 : index
    %240 = vector.load %arg16[%c0_102, %c0_103, %c0_104] : memref<2x8x128xf32, #tpu.memory_space<vmem>>, vector<2x8x128xf32>
    tpu.vector_store %arg16[%c0_102, %c0_103, %c0_104], %239 {strides = array<i32>} : memref<2x8x128xf32, #tpu.memory_space<vmem>>, vector<2x8x128xf32>,
    %c1_i32 = arith.constant 1 : i32
    %241 = arith.cmpi eq, %arg1, %c1_i32 : i32
    %242 = arith.extui %241 : i1 to i32
    %c0_i32_105 = arith.constant 0 : i32
    %243 = arith.cmpi ne, %242, %c0_i32_105 : i32
    scf.if %243 {
      %c0_106 = arith.constant 0 : index
      %c0_107 = arith.constant 0 : index
      %c0_108 = arith.constant 0 : index
      %244 = vector.load %arg14[%c0_106, %c0_107, %c0_108] : memref<2x8x128xf32, #tpu.memory_space<vmem>>, vector<2x8x128xf32>
      tpu.vector_store %arg14[%c0_106, %c0_107, %c0_108], %239 {strides = array<i32>} : memref<2x8x128xf32, #tpu.memory_space<vmem>>, vector<2x8x128xf32>,
    } else {
    }
    return
  }
  func.func @transform_0(%arg0: i32, %arg1: i32) -> (i32, i32, i32) {
    %c0_i32 = arith.constant 0 : i32
    %c0_i32_0 = arith.constant 0 : i32
    %c0_i32_1 = arith.constant 0 : i32
    return %arg0, %c0_i32, %c0_i32_0 : i32, i32, i32
  }
  func.func @transform_1(%arg0: i32, %arg1: i32) -> (i32, i32, i32) {
    %c0_i32 = arith.constant 0 : i32
    %c0_i32_0 = arith.constant 0 : i32
    %c0_i32_1 = arith.constant 0 : i32
    return %arg0, %c0_i32, %c0_i32_0 : i32, i32, i32
  }
  func.func @transform_2(%arg0: i32, %arg1: i32) -> (i32, i32) {
    %c0_i32 = arith.constant 0 : i32
    %c0_i32_0 = arith.constant 0 : i32
    %c0_i32_1 = arith.constant 0 : i32
    return %c0_i32, %c0_i32_0 : i32, i32
  }
  func.func @transform_3(%arg0: i32, %arg1: i32) -> (i32, i32) {
    %c0_i32 = arith.constant 0 : i32
    %c0_i32_0 = arith.constant 0 : i32
    %c0_i32_1 = arith.constant 0 : i32
    return %c0_i32, %c0_i32_0 : i32, i32
  }
  func.func @transform_4(%arg0: i32, %arg1: i32) -> (i32, i32) {
    %c0_i32 = arith.constant 0 : i32
    %c0_i32_0 = arith.constant 0 : i32
    %c0_i32_1 = arith.constant 0 : i32
    return %c0_i32, %c0_i32_0 : i32, i32
  }
  func.func @transform_5(%arg0: i32, %arg1: i32) -> (i32, i32, i32) {
    %c0_i32 = arith.constant 0 : i32
    %c0_i32_0 = arith.constant 0 : i32
    %c0_i32_1 = arith.constant 0 : i32
    return %arg1, %c0_i32, %c0_i32_0 : i32, i32, i32
  }
  func.func @transform_6(%arg0: i32, %arg1: i32) -> (i32, i32, i32) {
    %c0_i32 = arith.constant 0 : i32
    %c0_i32_0 = arith.constant 0 : i32
    %c0_i32_1 = arith.constant 0 : i32
    return %arg1, %c0_i32, %c0_i32_0 : i32, i32, i32
  }
  func.func @transform_7(%arg0: i32, %arg1: i32) -> (i32, i32, i32, i32) {
    %c0_i32 = arith.constant 0 : i32
    %c0_i32_0 = arith.constant 0 : i32
    %c0_i32_1 = arith.constant 0 : i32
    %c0_i32_2 = arith.constant 0 : i32
    return %arg1, %c0_i32, %c0_i32_0, %c0_i32_1 : i32, i32, i32, i32
  }
  func.func @transform_8(%arg0: i32, %arg1: i32) -> (i32, i32, i32, i32) {
    %c0_i32 = arith.constant 0 : i32
    %c0_i32_0 = arith.constant 0 : i32
    %c0_i32_1 = arith.constant 0 : i32
    %c0_i32_2 = arith.constant 0 : i32
    return %arg1, %c0_i32, %c0_i32_0, %c0_i32_1 : i32, i32, i32, i32
  }
  func.func @transform_9(%arg0: i32, %arg1: i32) -> (i32, i32, i32, i32) {
    %c0_i32 = arith.constant 0 : i32
    %c0_i32_0 = arith.constant 0 : i32
    %c0_i32_1 = arith.constant 0 : i32
    %c0_i32_2 = arith.constant 0 : i32
    return %arg1, %c0_i32, %c0_i32_0, %c0_i32_1 : i32, i32, i32, i32
  }
  func.func @transform_10(%arg0: i32, %arg1: i32) -> (i32, i32, i32) {
    %c0_i32 = arith.constant 0 : i32
    %c0_i32_0 = arith.constant 0 : i32
    %c0_i32_1 = arith.constant 0 : i32
    return %arg1, %c0_i32, %c0_i32_0 : i32, i32, i32
  }
  func.func @transform_11(%arg0: i32, %arg1: i32) -> (i32, i32, i32) {
    %c0_i32 = arith.constant 0 : i32
    %c0_i32_0 = arith.constant 0 : i32
    %c0_i32_1 = arith.constant 0 : i32
    return %arg1, %c0_i32, %c0_i32_0 : i32, i32, i32
  }
  func.func @transform_12(%arg0: i32, %arg1: i32) -> (i32, i32, i32) {
    %c0_i32 = arith.constant 0 : i32
    %c0_i32_0 = arith.constant 0 : i32
    %c0_i32_1 = arith.constant 0 : i32
    return %arg0, %c0_i32, %c0_i32_0 : i32, i32, i32
  }
  func.func @transform_13(%arg0: i32, %arg1: i32) -> (i32, i32, i32, i32) {
    %c0_i32 = arith.constant 0 : i32
    %c0_i32_0 = arith.constant 0 : i32
    %c0_i32_1 = arith.constant 0 : i32
    return %arg0, %arg1, %c0_i32, %c0_i32_0 : i32, i32, i32, i32
  }
}

</mosaic_0001>

<bundles_post_ra>
// kernel: tpu_custom_call.1
= control target key start
LH: loop header
LB: loop body
LE: loop exit
PB: predicated region body
PF: predicated region fallthrough
CT: control target
= control target key end

     0   :  { %s6266_s0 = inlined_call_operand.hbm [shape: bf16[2,8,128], index: 0, kind: input, shape index: {}]   ;;  %s6267_s1 = inlined_call_operand.hbm [shape: f32[2,1,8], index: 1, kind: input, shape index: {}]   ;;  %s6268_s2 = inlined_call_operand.hbm [shape: bf16[128,128], index: 2, kind: input, shape index: {}]   ;;  %s6269_s3 = inlined_call_operand.hbm [shape: f32[1,128], index: 3, kind: input, shape index: {}]   ;;  %s6270_s4 = inlined_call_operand.hbm [shape: f32[8,128], index: 4, kind: input, shape index: {}]   ;;  %s6271_s5 = inlined_call_operand.hbm [shape: bf16[2,128,384], index: 5, kind: input, shape index: {}]   ;;  %s6272_s6 = inlined_call_operand.hbm [shape: f32[2,1,384], index: 6, kind: input, shape index: {}]   ;;  %s6273_s7 = inlined_call_operand.hbm [shape: bf16[2,2,128,384], index: 7, kind: input, shape index: {}]   ;;  %s6274_s8 = inlined_call_operand.hbm [shape: bf16[2,2,128,256], index: 8, kind: input, shape index: {}]   ;;  %s6275_s9 = inlined_call_operand.hbm [shape: bf16[2,5,128,128], index: 9, kind: input, shape index: {}]   ;;  %s6276_s10 = inlined_call_operand.hbm [shape: f32[2,2,256], index: 10, kind: input, shape index: {}]   ;;  %s6277_s11 = inlined_call_operand.hbm [shape: f32[2,7,128], index: 11, kind: input, shape index: {}]   ;;  %s6278_s12 = inlined_call_operand.hbm [shape: f32[2,8,128], index: 12, kind: output, shape index: {0}]   ;;  %s6279_s13 = inlined_call_operand.hbm [shape: bf16[2,2,8,128], index: 13, kind: output, shape index: {1}]  }
   0x1   :  { %6313 = sst [smem:[#allocation47_spill]] %s6267_s1 }
   0x2   :  { %6314 = sst [smem:[#allocation48_spill]] %s6269_s3 }
   0x3   :  { %6315 = sst [smem:[#allocation49_spill]] %s6271_s5 }
   0x4   :  { %6316 = sst [smem:[#allocation50_spill]] %s6273_s7 }
   0x5   :  { %6317 = sst [smem:[#allocation51_spill]] %s6278_s12 }
   0x6   :  { %6318 = sst [smem:[#allocation52_spill]] %s6279_s13 }
   0x7   :  { %19 = vsyncpa [#allocation4], 0 }
   0x8   :  { %20 = vsyncpa [#allocation7], 0 }
   0x9   :  { %21 = vsyncpa [#allocation10], 0 }
   0xa   :  { %22 = vsyncpa [#allocation13], 0 }
   0xb   :  { %24 = vsyncpa [#allocation13 + $0x1], 0 }
   0xc   :  { %25 = vsyncpa [#allocation16], 0 }
   0xd   :  { %27 = vsyncpa [#allocation16 + $0x1], 0 }
   0xe   :  { %28 = vsyncpa [#allocation19], 0 }
   0xf   :  { %30 = vsyncpa [#allocation19 + $0x1], 0 }
  0x10   :  { %31 = vsyncpa [#allocation22], 0 }
  0x11   :  { %33 = vsyncpa [#allocation22 + $0x1], 0 }
  0x12   :  { %34 = vsyncpa [#allocation5], 0 }
  0x13   :  { %35 = vsyncpa [#allocation25], 0 }
  0x14   :  { %37 = vsyncpa [#allocation25 + $0x1], 0  ;;  %s5285_s25 = smov 0   ;;  %s5287_s26 = smov 0  }
  0x15   :  { %s5289_s27 = smov 0   ;;  %s5291_s28 = smov 0  }
  0x16   :  { %s5293_s29 = smov 0   ;;  %s5295_s30 = smov 0  }
  0x17 LB: > { %6319 = sst [smem:[#allocation35_spill]] %s5162_s25  ;;  %s5316_s14 = sadd.s32 4294967295, %s5182_s30   ;;  %s5182_s30 = sphi %s5295_s30, %s43_s30   ;;  %s5178_s29 = sphi %s5293_s29, %s6389_s29   ;;  %s5174_s28 = sphi %s5291_s28, %s6388_s28   ;;  %s5170_s27 = sphi %s5289_s27, %s6386_s27   ;;  %s5166_s26 = sphi %s5287_s26, %s6385_s26   ;;  %s5162_s25 = sphi %s5285_s25, %s6384_s25  }
  0x18   : > { %6320 = sst [smem:[#allocation36_spill]] %s5166_s26  ;;  %s3570_s15 = sadd.s32 4294967294, %s5182_s30  }
  0x19   : > { %6321 = sst [smem:[#allocation37_spill]] %s5170_s27  ;;  %p184_p0 = scmp.ne.s32.totalorder %s5170_s27, %s5166_s26 }
  0x1a   : > { %6322 = sst [smem:[#allocation38_spill]] %s5174_s28  ;;  %p185_p1 = scmp.eq.s32.totalorder %s5182_s30, 0 }
  0x1b   : > { %6323 = sst [smem:[#allocation39_spill]] %s5182_s30  ;;  %p190_p2 = scmp.ne.s32.totalorder %s5166_s26, %s5162_s25 }
  0x1c   : > { %6324 = sst [smem:[#allocation40_spill]] %s5316_s14  ;;  %p6287_p3 = scmp.eq.s32.totalorder %s5316_s14, 0 }
  0x1d   : > { %p6286_p4 = scmp.eq.s32.totalorder %s5316_s14, 1  ;;  %p5327_p5 = por %p185_p1, %p184_p0 }
  0x1e   : > { %p404_p6 = scmp.eq.s32.totalorder %s3570_s15, 1  ;;  %p5333_p7 = por %p6287_p3, %p190_p2 }
  0x1f   : > { %p5339_p8 = por %p6286_p4, %p184_p0  ;;  %p3571_p10 = scmp.ge.s32.totalorder %s5182_s30, 1 }
  0x20   : > { %s6326_s18 = scalar_select %p5333_p7, 1, 0 }
  0x21   : > { %s6328_s19 = scalar_select %p5339_p8, 1, 0 }
  0x22   : > { %6327 = sst [smem:[#allocation41_spill]] %s6326_s18  ;;  %p5343_p9 = por %p404_p6, %p190_p2 }
  0x23   : > { %6329 = sst [smem:[#allocation42_spill]] %s6328_s19  ;;  %p411_p11 = scmp.lt.s32.totalorder %s5182_s30, 3 }
  0x24   : > { %s6330_s20 = scalar_select %p5343_p9, 1, 0 }
  0x25   : > { %p5349_p12 = pnand %p3571_p10, %p411_p11  ;;  %s5184_s22 = smov [#allocation6]  }
  0x26   : > { %6331 = sst [smem:[#allocation43_spill]] %s6330_s20  ;;  %s442_s23 = sshll.u32 %s5184_s22, 4  ;;  %s5353_s23 = int_to_ptr.vmem [resolvable:$true] %s442_s23 }
  0x27   : > { %s6332_s21 = scalar_select %p5349_p12, 1, 0 }
  0x28   : > { %p4292_p13 = pneg %p5349_p12  ;;  %p4339_p1 = scmp.lt.s32.totalorder %s5182_s30, 2 }
  0x29   : > { %6333 = sst [smem:[#allocation44_spill]] %s6332_s21  ;;  %s5185_s15 = smov [#allocation9]  }
  0x2a   : > { %p5361_p2 = pnand %p4292_p13, %p6287_p3  ;;  %s469_s16 = sshll.u32 %s5185_s15, 4  ;;  %s5371_s16 = int_to_ptr.vmem [resolvable:$true] %s469_s16 }
  0x2b   : > { %p5367_p6 = pnand %p4339_p1, %p5327_p5  ;;  %s6336_s1 = sld [smem:[#allocation47_spill]] }
  0x2c   : > { %s6334_s24 = scalar_select %p5361_p2, 1, 0 }
  0x2d   : > { %s6335_s20 = scalar_select %p5367_p6, 1, 0 }
  0x2e   : > { %p5381_p11 = pneg %p5361_p2 }
  0x30   : > { %s6337_s28 = scalar_select %p5381_p11, 1, 0 }
  0x31   : > { %s4696_s13 = scalar_lea.hbm %s6336_s1, 32 }
  0x32   : > { %p4697_p10 = scmp.ne.s32.totalorder %s6336_s1, %s4696_s13  ;;  %p4703_p1 = scmp.lt.u32.totalorder %s4696_s13, %s6336_s1 }
  0x34   : > { %p4699_p5 = pnand %p5381_p11, %p4697_p10 }
  0x36   : > { %p4700_p13 = pneg %p4699_p5 }
  0x38   : > { %p4705_p0 = pnand %p4703_p1, %p4700_p13 }
  0x3a   : > { %4708 = shalt.err (!%p4705_p0)
}
  0x3b   : > { %s4709_s12 = scalar_lea.vmem %s5353_s23, 32  ;;  %p4717_p8 = scmp.lt.s32.totalorder %s5353_s23, %s5353_s23 }
  0x3c   : > { %p4710_p4 = scmp.ne.s32.totalorder %s5353_s23, %s4709_s12  ;;  %p4718_p7 = scmp.lt.s32.totalorder %s4709_s12, %s4709_s12 }
  0x3e   : > { %p4712_p3 = pnand %p4710_p4, %p5381_p11  ;;  %p4719_p10 = por %p4718_p7, %p4717_p8 }
  0x40   : > { %p4713_p9 = pneg %p4712_p3 }
  0x42   : > { %p4720_p5 = pnand %p4719_p10, %p4713_p9 }
  0x44   : > { %4723 = shalt.err (!%p4720_p5)
}
  0x45   : > { %s5186_s25 = smov 16   ;;  %s5187_s13 = smov 1  }
  0x46   : > { %4298 = dma.hbm_to_vmem [thread:$0]  (!%p5361_p2), %s6336_s1, 32, %s5353_s23, [#allocation7], %s5186_s25, %s5186_s25, %s5187_s13  }
  0x47   : > { %s6338_s3 = sld [smem:[#allocation48_spill]] }
  0x4d   : > { %s4724_s18 = scalar_lea.hbm %s6338_s3, 16 }
  0x4e   : > { %p4725_p3 = scmp.ne.s32.totalorder %s6338_s3, %s4724_s18  ;;  %p4731_p8 = scmp.lt.u32.totalorder %s4724_s18, %s6338_s3 }
  0x50   : > { %p4727_p4 = pnand %p4725_p3, %p5381_p11 }
  0x52   : > { %p4728_p7 = pneg %p4727_p4 }
  0x54   : > { %p4733_p9 = pnand %p4731_p8, %p4728_p7 }
  0x56   : > { %4736 = shalt.err (!%p4733_p9)
}
  0x57   : > { %s4737_s23 = scalar_lea.vmem %s5371_s16, 16  ;;  %s4744_s26 = scalar_lea.vmem %s5371_s16, 32 }
  0x58   : > { %p4738_p0 = scmp.ne.s32.totalorder %s5371_s16, %s4737_s23  ;;  %p4745_p10 = scmp.lt.s32.totalorder %s5371_s16, %s5371_s16 }
  0x59   : > { %p4746_p5 = scmp.lt.s32.totalorder %s4744_s26, %s4737_s23 }
  0x5a   : > { %p4740_p13 = pnand %p4738_p0, %p5381_p11 }
  0x5b   : > { %p4747_p3 = por %p4746_p5, %p4745_p10 }
  0x5c   : > { %p4741_p1 = pneg %p4740_p13 }
  0x5e   : > { %p4748_p4 = pnand %p4747_p3, %p4741_p1 }
  0x60   : > { %4751 = shalt.err (!%p4748_p4)
}
  0x61   : > { %4304 = dma.hbm_to_vmem [thread:$0]  (!%p5361_p2), %s6338_s3, 16, %s5371_s16, [#allocation10]  }
  0x62   : > { %s52_s21 = sadd.s32 1, %s5178_s29  ;;  %s5428_s25 = sand.u32 1, %s5182_s30  }
  0x63   : > { %p53_p7 = scmp.ge.s32.totalorder %s52_s21, 2  ;;  %s5431_s13 = sand.u32 1, %s5170_s27  }
  0x64   : > { %s4241_s19 = smul.u32 3072, %s5178_s29  ;;  %s6340_s5 = sld [smem:[#allocation49_spill]] }
  0x65   : > { %s6391_s21 = smov (%p53_p7, %s52_s21), 0  ;;  %s4240_s22 = smul.u32 192, %s5431_s13 }
  0x66   : > { %6339 = sst [smem:[#allocation45_spill]] %s6391_s21  ;;  %s174_s16 = ssub.s32 %s5178_s29, %s6391_s21 }
  0x67   : > { %p175_p8 = scmp.eq.s32.totalorder %s174_s16, 0  ;;  %s495_s23 = scalar_lea.vmem [#allocation12], %s4240_s22 }
  0x68   : > { %s502_s26 = sshll.u32 %s495_s23, 4  ;;  %s6341_s14 = sadd.s32 1, %s5170_s27  ;;  %s5449_s26 = int_to_ptr.vmem [resolvable:$true] %s502_s26 }
  0x69   : > { %s5447_s18 = scalar_select %p175_p8, %s5170_s27, %s6341_s14  }
  0x6a   : > { %s5440_s12 = scalar_lea.hbm %s6340_s5, %s4241_s19  ;;  %s6307_s1 = scalar_lea.sflag [#allocation13], %s5428_s25 }
  0x6b   : > { %6342 = sst [smem:[#allocation46_spill]] %s5447_s18  ;;  %s4752_s3 = scalar_lea.hbm %s5440_s12, 3072 }
  0x6c   : > { %p4753_p9 = scmp.ne.s32.totalorder %s5440_s12, %s4752_s3  ;;  %p5456_p0 = pneg %p5367_p6 }
  0x6d   : > { %s4757_s15 = scalar_lea.hbm %s6340_s5, 6144  ;;  %p4758_p10 = scmp.lt.u32.totalorder %s5440_s12, %s6340_s5 }
  0x6e   : > { %s6343_s19 = scalar_select %p5456_p0, 1, 0 }
  0x6f   : > { %p4755_p13 = pnand %p5456_p0, %p4753_p9  ;;  %p4759_p5 = scmp.lt.u32.totalorder %s4757_s15, %s4752_s3 }
  0x70   : > { %p4761_p4 = scmp.lt.u32.totalorder %s4752_s3, %s5440_s12 }
  0x71   : > { %p4756_p1 = pneg %p4755_p13  ;;  %p4760_p3 = por %p4759_p5, %p4758_p10 }
  0x73   : > { %p4762_p7 = por %p4761_p4, %p4760_p3 }
  0x75   : > { %p4763_p8 = pnand %p4762_p7, %p4756_p1 }
  0x77   : > { %4766 = shalt.err (!%p4763_p8)
}
  0x78   : > { %s4767_s14 = scalar_lea.vmem %s5449_s26, 3072  ;;  %s5188_s17 = smov [#allocation12]  }
  0x79   : > { %p4768_p9 = scmp.ne.s32.totalorder %s5449_s26, %s4767_s14  ;;  %s4772_s22 = sshll.u32 %s5188_s17, 4  ;;  %s4773_s22 = int_to_ptr.vmem [resolvable:$false] %s4772_s22 }
  0x7a   : > { %s4774_s16 = scalar_lea.vmem %s4773_s22, 6144  ;;  %p4775_p2 = scmp.lt.s32.totalorder %s5449_s26, %s4773_s22 }
  0x7b   : > { %p4770_p13 = pnand %p4768_p9, %p5456_p0  ;;  %p4776_p11 = scmp.lt.s32.totalorder %s4774_s16, %s4767_s14 }
  0x7d   : > { %p4771_p12 = pneg %p4770_p13  ;;  %p4777_p10 = por %p4776_p11, %p4775_p2 }
  0x7f   : > { %p4778_p5 = pnand %p4777_p10, %p4771_p12 }
  0x81   : > { %4781 = shalt.err (!%p4778_p5)
}
  0x82   : > { %s5189_s3 = smov 192   ;;  %s5190_s15 = smov 12  }
  0x83   : > { %4311 = dma.hbm_to_vmem [thread:$0]  (!%p5367_p6), %s5440_s12, 3072, %s5449_s26, %s6307_s1, %s5189_s3, %s5189_s3, %s5190_s15  }
  0x84   : > { %s4244_s23 = smul.u32 384, %s5431_s13  ;;  %s6344_s7 = sld [smem:[#allocation50_spill]] }
  0x85   : > { %s4245_s14 = smul.u32 6144, %s5178_s29  ;;  %s6306_s27 = scalar_lea.sflag [#allocation16], %s5428_s25 }
  0x86   : > { %s535_s5 = scalar_lea.vmem [#allocation15], %s4244_s23  ;;  %s4246_s18 = smul.u32 320, %s5431_s13 }
  0x87   : > { %s542_s21 = sshll.u32 %s535_s5, 4  ;;  %s5491_s21 = int_to_ptr.vmem [resolvable:$true] %s542_s21 }
  0x8a   : > { %s5489_s16 = scalar_lea.hbm %s6344_s7, %s4245_s14  ;;  %s4787_s14 = scalar_lea.hbm %s6344_s7, 12288 }
  0x8b   : > { %s4782_s30 = scalar_lea.hbm %s5489_s16, 6144  ;;  %p4788_p1 = scmp.lt.u32.totalorder %s5489_s16, %s6344_s7 }
  0x8c   : > { %p4783_p12 = scmp.ne.s32.totalorder %s5489_s16, %s4782_s30  ;;  %p4789_p3 = scmp.lt.u32.totalorder %s4787_s14, %s4782_s30 }
  0x8d   : > { %p4791_p7 = scmp.lt.u32.totalorder %s4782_s30, %s5489_s16 }
  0x8e   : > { %p4785_p2 = pnand %p4783_p12, %p5456_p0  ;;  %p4790_p4 = por %p4789_p3, %p4788_p1 }
  0x90   : > { %p4786_p11 = pneg %p4785_p2  ;;  %p4792_p8 = por %p4791_p7, %p4790_p4 }
  0x92   : > { %p4793_p9 = pnand %p4792_p8, %p4786_p11 }
  0x94   : > { %4796 = shalt.err (!%p4793_p9)
}
  0x95   : > { %s4797_s5 = scalar_lea.vmem %s5491_s21, 6144  ;;  %s5191_s23 = smov [#allocation15]  }
  0x96   : > { %p4798_p13 = scmp.ne.s32.totalorder %s5491_s21, %s4797_s5  ;;  %s4802_s12 = sshll.u32 %s5191_s23, 4  ;;  %s4803_s12 = int_to_ptr.vmem [resolvable:$false] %s4802_s12 }
  0x97   : > { %s4804_s26 = scalar_lea.vmem %s4803_s12, 12288  ;;  %p4805_p12 = scmp.lt.s32.totalorder %s5491_s21, %s4803_s12 }
  0x98   : > { %p4800_p10 = pnand %p4798_p13, %p5456_p0  ;;  %p4806_p2 = scmp.lt.s32.totalorder %s4804_s26, %s4797_s5 }
  0x9a   : > { %p4801_p5 = pneg %p4800_p10  ;;  %p4807_p1 = por %p4806_p2, %p4805_p12 }
  0x9c   : > { %p4808_p3 = pnand %p4807_p1, %p4801_p5 }
  0x9e   : > { %4811 = shalt.err (!%p4808_p3)
}
  0x9f   : > { %4317 = dma.hbm_to_vmem [thread:$0]  (!%p5367_p6), %s5489_s16, 6144, %s5491_s21, %s6306_s27, %s5189_s3, %s5189_s3, %s5190_s15  }
  0xa0   : > { %s4247_s30 = smul.u32 5120, %s5178_s29  ;;  %s577_s14 = scalar_lea.vmem [#allocation18], %s4246_s18 }
  0xa1   : > { %s584_s17 = sshll.u32 %s577_s14, 4  ;;  %s574_s12 = scalar_lea.sflag [#allocation19], %s5428_s25  ;;  %s5529_s17 = int_to_ptr.vmem [resolvable:$true] %s584_s17 }
  0xa2   : > { %s5527_s23 = scalar_lea.hbm %s6275_s9, %s4247_s30  ;;  %s4817_s3 = scalar_lea.hbm %s6275_s9, 10240 }
  0xa3   : > { %s4812_s26 = scalar_lea.hbm %s5527_s23, 5120  ;;  %p4818_p8 = scmp.lt.u32.totalorder %s5527_s23, %s6275_s9 }
  0xa4   : > { %p4813_p11 = scmp.ne.s32.totalorder %s5527_s23, %s4812_s26  ;;  %p4819_p9 = scmp.lt.u32.totalorder %s4817_s3, %s4812_s26 }
  0xa5   : > { %p4821_p10 = scmp.lt.u32.totalorder %s4812_s26, %s5527_s23 }
  0xa6   : > { %p4815_p4 = pnand %p4813_p11, %p5456_p0  ;;  %p4820_p13 = por %p4819_p9, %p4818_p8 }
  0xa8   : > { %p4816_p7 = pneg %p4815_p4  ;;  %p4822_p5 = por %p4821_p10, %p4820_p13 }
  0xaa   : > { %p4823_p12 = pnand %p4822_p5, %p4816_p7 }
  0xac   : > { %4826 = shalt.err (!%p4823_p12)
}
  0xad   : > { %s4827_s30 = scalar_lea.vmem %s5529_s17, 5120  ;;  %s5192_s14 = smov [#allocation18]  }
  0xae   : > { %p4828_p2 = scmp.ne.s32.totalorder %s5529_s17, %s4827_s30  ;;  %s4832_s22 = sshll.u32 %s5192_s14, 4  ;;  %s4833_s22 = int_to_ptr.vmem [resolvable:$false] %s4832_s22 }
  0xaf   : > { %s4834_s5 = scalar_lea.vmem %s4833_s22, 10240  ;;  %p4835_p11 = scmp.lt.s32.totalorder %s5529_s17, %s4833_s22 }
  0xb0   : > { %p4830_p1 = pnand %p4828_p2, %p5456_p0  ;;  %p4836_p4 = scmp.lt.s32.totalorder %s4834_s5, %s4827_s30 }
  0xb2   : > { %p4831_p3 = pneg %p4830_p1  ;;  %p4837_p8 = por %p4836_p4, %p4835_p11 }
  0xb4   : > { %p4838_p9 = pnand %p4837_p8, %p4831_p3 }
  0xb6   : > { %4841 = shalt.err (!%p4838_p9)
}
  0xb7   : > { %s5193_s26 = smov 64   ;;  %s5194_s21 = smov 4  }
  0xb8   : > { %4323 = dma.hbm_to_vmem [thread:$0]  (!%p5367_p6), %s5527_s23, 5120, %s5529_s17, %s574_s12, %s5193_s26, %s5193_s26, %s5194_s21  }
  0xb9   : > { %s5195_s18 = smov [#allocation3]   ;;  %s5196_s15 = smov [#allocation8]  }
  0xba   : > { %s426_s3 = sshll.u32 %s5195_s18, 4  ;;  %s455_s16 = sshll.u32 %s5196_s15, 4  ;;  %s427_s3 = int_to_ptr.vmem [resolvable:$true] %s426_s3  ;;  %s456_s16 = int_to_ptr.vmem [resolvable:$true] %s455_s16 }
  0xbb   : > { %s4842_s22 = scalar_lea.hbm %s6266_s0, 128  ;;  %p6345_p13 = scmp.ne.s32.totalorder %s6337_s28, 0 }
  0xbc   : > { %p4843_p7 = scmp.ne.s32.totalorder %s6266_s0, %s4842_s22  ;;  %p4849_p12 = scmp.lt.u32.totalorder %s4842_s22, %s6266_s0 }
  0xbe   : > { %p4845_p10 = pnand %p4843_p7, %p6345_p13 }
  0xc0   : > { %p4846_p5 = pneg %p4845_p10 }
  0xc2   : > { %p4851_p2 = pnand %p4849_p12, %p4846_p5 }
  0xc4   : > { %4854 = shalt.err (!%p4851_p2)
}
  0xc5   : > { %s4855_s17 = scalar_lea.vmem %s427_s3, 128  ;;  %p4863_p4 = scmp.lt.s32.totalorder %s427_s3, %s427_s3 }
  0xc6   : > { %p4856_p1 = scmp.ne.s32.totalorder %s427_s3, %s4855_s17  ;;  %p4864_p8 = scmp.lt.s32.totalorder %s4855_s17, %s4855_s17 }
  0xc8   : > { %p4858_p3 = pnand %p4856_p1, %p6345_p13  ;;  %p4865_p9 = por %p4864_p8, %p4863_p4 }
  0xca   : > { %p4859_p11 = pneg %p4858_p3 }
  0xcc   : > { %p4866_p6 = pnand %p4865_p9, %p4859_p11 }
  0xce   : > { %4869 = shalt.err (!%p4866_p6)
}
  0xcf   : > { %p6346_p7 = scmp.ne.s32.totalorder %s6334_s24, 0  ;;  %s4870_s18 = scalar_lea.hbm %s6268_s2, 1024 }
  0xd0   : > { %p4871_p10 = scmp.ne.s32.totalorder %s6268_s2, %s4870_s18  ;;  %p4877_p12 = scmp.lt.u32.totalorder %s4870_s18, %s6268_s2 }
  0xd1   : > { %4295 = dma.hbm_to_vmem [thread:$0]  (!%p6346_p7), %s6266_s0, 128, %s427_s3, [#allocation4], %s5193_s26, %s5193_s26, %s5194_s21  }
  0xd2   : > { %p4873_p6 = pnand %p4871_p10, %p6345_p13 }
  0xd4   : > { %p4874_p5 = pneg %p4873_p6 }
  0xd6   : > { %p4879_p2 = pnand %p4877_p12, %p4874_p5 }
  0xd8   : > { %4882 = shalt.err (!%p4879_p2)
}
  0xd9   : > { %s4883_s5 = scalar_lea.vmem %s456_s16, 1024  ;;  %p4891_p4 = scmp.lt.s32.totalorder %s456_s16, %s456_s16 }
  0xda   : > { %p4884_p1 = scmp.ne.s32.totalorder %s456_s16, %s4883_s5  ;;  %p4892_p8 = scmp.lt.s32.totalorder %s4883_s5, %s4883_s5 }
  0xdc   : > { %p4886_p3 = pnand %p4884_p1, %p6345_p13  ;;  %p4893_p9 = por %p4892_p8, %p4891_p4 }
  0xde   : > { %p4887_p11 = pneg %p4886_p3 }
  0xe0   : > { %p4894_p0 = pnand %p4893_p9, %p4887_p11 }
  0xe2   : > { %4897 = shalt.err (!%p4894_p0)
}
  0xe3   : > { %4301 = dma.hbm_to_vmem [thread:$0]  (!%p6346_p7), %s6268_s2, 1024, %s456_s16, [#allocation7], %s5193_s26, %s5193_s26, %s5194_s21  }
  0xe4   : > { %s5197_s1 = smov [#allocation11]   ;;  %s4242_s27 = smul.u32 3, %s5431_s13 }
  0xe5   : > { %s480_s7 = sshll.u32 %s5197_s1, 4  ;;  %s4243_s23 = smul.u32 48, %s5178_s29  ;;  %s481_s7 = int_to_ptr.vmem [resolvable:$true] %s480_s7 }
  0xe6   : > { %s4898_s30 = scalar_lea.hbm %s6270_s4, 128 }
  0xe7   : > { %p4899_p0 = scmp.ne.s32.totalorder %s6270_s4, %s4898_s30  ;;  %p4905_p5 = scmp.lt.u32.totalorder %s4898_s30, %s6270_s4 }
  0xe9   : > { %p4901_p10 = pnand %p4899_p0, %p6345_p13 }
  0xeb   : > { %p4902_p6 = pneg %p4901_p10 }
  0xed   : > { %p4907_p12 = pnand %p4905_p5, %p4902_p6 }
  0xef   : > { %4910 = shalt.err (!%p4907_p12)
}
  0xf0   : > { %s4911_s26 = scalar_lea.vmem %s481_s7, 128  ;;  %p4919_p11 = scmp.lt.s32.totalorder %s481_s7, %s481_s7 }
  0xf1   : > { %p4912_p2 = scmp.ne.s32.totalorder %s481_s7, %s4911_s26  ;;  %p4920_p4 = scmp.lt.s32.totalorder %s4911_s26, %s4911_s26 }
  0xf3   : > { %p4914_p1 = pnand %p4912_p2, %p6345_p13  ;;  %p4921_p8 = por %p4920_p4, %p4919_p11 }
  0xf5   : > { %p4915_p3 = pneg %p4914_p1 }
  0xf7   : > { %p4922_p9 = pnand %p4921_p8, %p4915_p3 }
  0xf9   : > { %4925 = shalt.err (!%p4922_p9)
}
  0xfa   : > { %4307 = dma.hbm_to_vmem [thread:$0]  (!%p6346_p7), %s6270_s4, 128, %s481_s7, [#allocation10]  }
  0xfb   : > { %s5623_s18 = scalar_lea.hbm %s6272_s6, %s4243_s23  ;;  %s516_s28 = scalar_lea.vmem [#allocation14], %s4242_s27 }
  0xfc   : > { %s524_s15 = sshll.u32 %s516_s28, 4  ;;  %s3581_s30 = sshll.u32 %s5431_s13, 8  ;;  %s525_s15 = int_to_ptr.vmem [resolvable:$true] %s524_s15 }
  0xfd   : > { %s4926_s24 = scalar_lea.hbm %s5623_s18, 48  ;;  %p6347_p0 = scmp.ne.s32.totalorder %s6343_s19, 0 }
  0xfe   : > { %p4927_p13 = scmp.ne.s32.totalorder %s5623_s18, %s4926_s24  ;;  %s4931_s22 = scalar_lea.hbm %s6272_s6, 96 }
  0xff   : > { %p4932_p7 = scmp.lt.u32.totalorder %s5623_s18, %s6272_s6  ;;  %p4933_p5 = scmp.lt.u32.totalorder %s4931_s22, %s4926_s24 }
 0x100   : > { %p4929_p10 = pnand %p4927_p13, %p6347_p0  ;;  %p4935_p2 = scmp.lt.u32.totalorder %s4926_s24, %s5623_s18 }
 0x101   : > { %p4934_p12 = por %p4933_p5, %p4932_p7 }
 0x102   : > { %p4930_p6 = pneg %p4929_p10 }
 0x103   : > { %p4936_p1 = por %p4935_p2, %p4934_p12 }
 0x105   : > { %p4937_p3 = pnand %p4936_p1, %p4930_p6 }
 0x107   : > { %4940 = shalt.err (!%p4937_p3)
}
 0x108   : > { %s4941_s27 = scalar_lea.vmem %s525_s15, 48  ;;  %s5198_s3 = smov [#allocation14]  }
 0x109   : > { %p4942_p11 = scmp.ne.s32.totalorder %s525_s15, %s4941_s27  ;;  %s4946_s26 = sshll.u32 %s5198_s3, 4  ;;  %s4947_s26 = int_to_ptr.vmem [resolvable:$false] %s4946_s26 }
 0x10a   : > { %s4948_s21 = scalar_lea.vmem %s4947_s26, 96  ;;  %p4949_p9 = scmp.lt.s32.totalorder %s525_s15, %s4947_s26 }
 0x10b   : > { %p4944_p4 = pnand %p4942_p11, %p6347_p0  ;;  %p4950_p13 = scmp.lt.s32.totalorder %s4948_s21, %s4941_s27 }
 0x10d   : > { %p4945_p8 = pneg %p4944_p4  ;;  %p4951_p10 = por %p4950_p13, %p4949_p9 }
 0x10f   : > { %p4952_p5 = pnand %p4951_p10, %p4945_p8 }
 0x111   : > { %4955 = shalt.err (!%p4952_p5)
}
 0x112   : > { %p6348_p7 = scmp.ne.s32.totalorder %s6335_s20, 0  ;;  %s6349_s16 = scalar_lea.sflag [#allocation13], %s5428_s25 }
 0x113   : > { %s3892_s17 = sshll.u32 %s5178_s29, 12  ;;  %s556_s1 = scalar_lea.vmem [#allocation17], %s3581_s30 }
 0x114   : > { %4314 = dma.hbm_to_vmem [thread:$0]  (!%p6348_p7), %s5623_s18, 48, %s525_s15, %s6349_s16  }
 0x115   : > { %s563_s28 = sshll.u32 %s556_s1, 4  ;;  %s5651_s7 = scalar_lea.hbm %s6274_s8, %s3892_s17  ;;  %s5653_s28 = int_to_ptr.vmem [resolvable:$true] %s563_s28 }
 0x116   : > { %s4956_s22 = scalar_lea.hbm %s5651_s7, 4096  ;;  %s4961_s30 = scalar_lea.hbm %s6274_s8, 8192 }
 0x117   : > { %p4957_p6 = scmp.ne.s32.totalorder %s5651_s7, %s4956_s22  ;;  %p4962_p1 = scmp.lt.u32.totalorder %s5651_s7, %s6274_s8 }
 0x118   : > { %p4963_p3 = scmp.lt.u32.totalorder %s4961_s30, %s4956_s22  ;;  %p4965_p4 = scmp.lt.u32.totalorder %s4956_s22, %s5651_s7 }
 0x119   : > { %p4959_p12 = pnand %p4957_p6, %p6347_p0 }
 0x11a   : > { %p4964_p11 = por %p4963_p3, %p4962_p1 }
 0x11b   : > { %p4960_p2 = pneg %p4959_p12 }
 0x11c   : > { %p4966_p8 = por %p4965_p4, %p4964_p11 }
 0x11e   : > { %p4967_p9 = pnand %p4966_p8, %p4960_p2 }
 0x120   : > { %4970 = shalt.err (!%p4967_p9)
}
 0x121   : > { %s4971_s27 = scalar_lea.vmem %s5653_s28, 4096  ;;  %s5199_s3 = smov [#allocation17]  }
 0x122   : > { %p4972_p13 = scmp.ne.s32.totalorder %s5653_s28, %s4971_s27  ;;  %s4976_s26 = sshll.u32 %s5199_s3, 4  ;;  %s4977_s26 = int_to_ptr.vmem [resolvable:$false] %s4976_s26 }
 0x123   : > { %s4978_s21 = scalar_lea.vmem %s4977_s26, 8192  ;;  %p4979_p6 = scmp.lt.s32.totalorder %s5653_s28, %s4977_s26 }
 0x124   : > { %p4974_p10 = pnand %p4972_p13, %p6347_p0  ;;  %p4980_p12 = scmp.lt.s32.totalorder %s4978_s21, %s4971_s27 }
 0x126   : > { %p4975_p5 = pneg %p4974_p10  ;;  %p4981_p1 = por %p4980_p12, %p4979_p6 }
 0x128   : > { %p4982_p3 = pnand %p4981_p1, %p4975_p5 }
 0x12a   : > { %4985 = shalt.err (!%p4982_p3)
}
 0x12b   : > { %s5200_s16 = smov 128   ;;  %s5201_s17 = smov 8  }
 0x12c   : > { %s6350_s1 = scalar_lea.sflag [#allocation16], %s5428_s25  ;;  %s3585_s24 = sshll.u32 %s5431_s13, 2 }
 0x12d   : > { %4320 = dma.hbm_to_vmem [thread:$0]  (!%p6348_p7), %s5651_s7, 4096, %s5653_s28, %s6350_s1, %s5200_s16, %s5200_s16, %s5201_s17  }
 0x12e   : > { %s3893_s14 = sshll.u32 %s5178_s29, 6  ;;  %s598_s30 = scalar_lea.vmem [#allocation20], %s3585_s24 }
 0x12f   : > { %s5683_s15 = scalar_lea.hbm %s6276_s10, %s3893_s14  ;;  %s606_s5 = sshll.u32 %s598_s30, 4  ;;  %s607_s5 = int_to_ptr.vmem [resolvable:$true] %s606_s5 }
 0x130   : > { %s3588_s23 = sshll.u32 %s5431_s13, 3  ;;  %s4986_s27 = scalar_lea.hbm %s5683_s15, 64 }
 0x131   : > { %p4987_p2 = scmp.ne.s32.totalorder %s5683_s15, %s4986_s27  ;;  %s4991_s3 = scalar_lea.hbm %s6276_s10, 128 }
 0x132   : > { %p4992_p8 = scmp.lt.u32.totalorder %s5683_s15, %s6276_s10  ;;  %p4993_p9 = scmp.lt.u32.totalorder %s4991_s3, %s4986_s27 }
 0x133   : > { %p4989_p11 = pnand %p4987_p2, %p6347_p0  ;;  %p4995_p10 = scmp.lt.u32.totalorder %s4986_s27, %s5683_s15 }
 0x134   : > { %p4994_p13 = por %p4993_p9, %p4992_p8 }
 0x135   : > { %p4990_p4 = pneg %p4989_p11 }
 0x136   : > { %p4996_p5 = por %p4995_p10, %p4994_p13 }
 0x138   : > { %p4997_p6 = pnand %p4996_p5, %p4990_p4 }
 0x13a   : > { %5000 = shalt.err (!%p4997_p6)
}
 0x13b   : > { %s5001_s16 = scalar_lea.vmem %s607_s5, 64  ;;  %s5202_s17 = smov [#allocation20]  }
 0x13c   : > { %p5002_p12 = scmp.ne.s32.totalorder %s607_s5, %s5001_s16  ;;  %s5006_s1 = sshll.u32 %s5202_s17, 4  ;;  %s5007_s1 = int_to_ptr.vmem [resolvable:$false] %s5006_s1 }
 0x13d   : > { %s5008_s24 = scalar_lea.vmem %s5007_s1, 128  ;;  %p5009_p2 = scmp.lt.s32.totalorder %s607_s5, %s5007_s1 }
 0x13e   : > { %p5004_p1 = pnand %p5002_p12, %p6347_p0  ;;  %p5010_p11 = scmp.lt.s32.totalorder %s5008_s24, %s5001_s16 }
 0x140   : > { %p5005_p3 = pneg %p5004_p1  ;;  %p5011_p7 = por %p5010_p11, %p5009_p2 }
 0x142   : > { %p5012_p8 = pnand %p5011_p7, %p5005_p3 }
 0x144   : > { %5015 = shalt.err (!%p5012_p8)
}
 0x145   : > { %p6351_p9 = scmp.ne.s32.totalorder %s6335_s20, 0  ;;  %s3589_s14 = sshll.u32 %s5178_s29, 7 }
 0x146   : > { %s5709_s30 = scalar_lea.hbm %s6277_s11, %s3589_s14  ;;  %s617_s27 = scalar_lea.vmem [#allocation21], %s3588_s23 }
 0x147   : > { %4326 = dma.hbm_to_vmem [thread:$0]  (!%p6351_p9), %s5683_s15, 64, %s607_s5, %s574_s12  }
 0x148   : > { %s624_s28 = sshll.u32 %s617_s27, 4  ;;  %s614_s25 = scalar_lea.sflag [#allocation22], %s5431_s13  ;;  %s625_s28 = int_to_ptr.vmem [resolvable:$true] %s624_s28 }
 0x149   : > { %s5016_s7 = scalar_lea.hbm %s5709_s30, 128  ;;  %s5021_s5 = scalar_lea.hbm %s6277_s11, 256 }
 0x14a   : > { %p5017_p7 = scmp.ne.s32.totalorder %s5709_s30, %s5016_s7  ;;  %p5022_p10 = scmp.lt.u32.totalorder %s5709_s30, %s6277_s11 }
 0x14b   : > { %p5023_p5 = scmp.lt.u32.totalorder %s5021_s5, %s5016_s7  ;;  %p5025_p12 = scmp.lt.u32.totalorder %s5016_s7, %s5709_s30 }
 0x14c   : > { %p5019_p4 = pnand %p5017_p7, %p6347_p0 }
 0x14d   : > { %p5024_p6 = por %p5023_p5, %p5022_p10 }
 0x14e   : > { %p5020_p13 = pneg %p5019_p4 }
 0x14f   : > { %p5026_p1 = por %p5025_p12, %p5024_p6 }
 0x151   : > { %p5027_p3 = pnand %p5026_p1, %p5020_p13 }
 0x153   : > { %5030 = shalt.err (!%p5027_p3)
}
 0x154   : > { %s5031_s13 = scalar_lea.vmem %s625_s28, 128  ;;  %s5203_s23 = smov [#allocation21]  }
 0x155   : > { %p5032_p2 = scmp.ne.s32.totalorder %s625_s28, %s5031_s13  ;;  %s5036_s21 = sshll.u32 %s5203_s23, 4  ;;  %s5037_s21 = int_to_ptr.vmem [resolvable:$false] %s5036_s21 }
 0x156   : > { %s5038_s16 = scalar_lea.vmem %s5037_s21, 256  ;;  %p5039_p7 = scmp.lt.s32.totalorder %s625_s28, %s5037_s21 }
 0x157   : > { %p5034_p11 = pnand %p5032_p2, %p6347_p0  ;;  %p5040_p4 = scmp.lt.s32.totalorder %s5038_s16, %s5031_s13 }
 0x159   : > { %p5035_p8 = pneg %p5034_p11  ;;  %p5041_p9 = por %p5040_p4, %p5039_p7 }
 0x15b   : > { %p5042_p5 = pnand %p5041_p9, %p5035_p8 }
 0x15d   : > { %5045 = shalt.err (!%p5042_p5)
}
 0x15e   : > { %p6352_p10 = scmp.ne.s32.totalorder %s6335_s20, 0  ;;  %s6353_s17 = sld [smem:[#allocation44_spill]] }
 0x160   : > { %4329 = dma.hbm_to_vmem [thread:$0]  (!%p6352_p10), %s5709_s30, 128, %s625_s28, %s614_s25  }
 0x164   : > { %p6354_p13 = scmp.ne.s32.totalorder %s6353_s17, 0 }
 0x165   : > { %s6355_s1 = sld [smem:[#allocation40_spill]] (!%p6354_p13) }
 0x166   : > { %633 = sbr.rel (%p6354_p13) target bundleno = 4751 (0x128f), region = 68 }
 0x16b   : > { %p6356_p6 = scmp.eq.s32.totalorder (!%p6354_p13), %s6355_s1, 0 }
 0x16d   : > { %5125 = dma.done.wait (%p6356_p6), [#allocation4], 128   ;;  %p6357_p0 = pmov %p6356_p6 }
 0x16f   : > { %5127 = vsyncadd (%p6357_p0), [#allocation4], 4294967168  ;;  %p6358_p12 = pmov %p6357_p0 }
 0x170   : > { %p6359_p1 = pmov %p6357_p0 }
 0x171   : > { %5129 = dma.done.wait (%p6358_p12), [#allocation7], 1056  }
 0x172   : > { %5131 = vsyncadd (%p6359_p1), [#allocation7], 4294966240  ;;  %p6360_p9 = pmov %p6357_p0 }
 0x173   : > { %p6361_p3 = pmov %p6357_p0 }
 0x174   : > { %5133 = dma.done.wait (%p6360_p9), [#allocation10], 144  }
 0x175   : > { %5135 = vsyncadd (%p6361_p3), [#allocation10], 4294967152  ;;  %s6362_s20 = sld [smem:[#allocation36_spill]]  ;;  %s655_s24 = sand.u32 1, %s6355_s1  }
 0x176   : > { %s6363_s19 = sld [smem:[#allocation41_spill]]  ;;  %s656_s18 = scalar_lea.sflag [#allocation13], %s655_s24 }
 0x17b   : > { %s5747_s14 = sand.u32 1, %s6362_s20  }
 0x17c   : > { %s4248_s22 = smul.u32 192, %s5747_s14  ;;  %p6364_p2 = scmp.ne.s32.totalorder %s6363_s19, 0 }
 0x17e   : > { %s5750_s30 = scalar_lea.vmem [#allocation12], %s4248_s22 }
 0x17f   : > { %5137 = dma.done.wait (%p6364_p2), %s656_s18, 3120  }
 0x180   : > { %5139 = vsyncadd (%p6364_p2), %s656_s18, 4294964176  ;;  %s4249_s27 = smul.u32 3, %s5747_s14  ;;  %s674_s7 = scalar_lea.sflag [#allocation16], %s655_s24 }
 0x181   : > { %s4250_s28 = smul.u32 384, %s5747_s14 }
 0x182   : > { %s5758_s25 = scalar_lea.vmem [#allocation14], %s4249_s27 }
 0x183   : > { %s5760_s12 = scalar_lea.vmem [#allocation15], %s4250_s28 }
 0x184   : > { %5141 = dma.done.wait (%p6364_p2), %s674_s7, 10240  }
 0x185   : > { %5143 = vsyncadd (%p6364_p2), %s674_s7, 4294957056  ;;  %s3596_s15 = sshll.u32 %s5747_s14, 8  ;;  %s4251_s5 = smul.u32 320, %s5747_s14 }
 0x186   : > { %s5768_s3 = scalar_lea.vmem [#allocation17], %s3596_s15  ;;  %s692_s26 = scalar_lea.sflag [#allocation19], %s655_s24 }
 0x187   : > { %s5770_s13 = scalar_lea.vmem [#allocation18], %s4251_s5 }
 0x188   : > { %5145 = dma.done.wait (%p6364_p2), %s692_s26, 5184  }
 0x189   : > { %5147 = vsyncadd (%p6364_p2), %s692_s26, 4294962112  ;;  %s3597_s23 = sshll.u32 %s5747_s14, 2  ;;  %s3598_s21 = sshll.u32 %s5747_s14, 3 }
 0x18a   : > { %s5778_s16 = scalar_lea.vmem [#allocation20], %s3597_s23  ;;  %s710_s17 = scalar_lea.sflag [#allocation22], %s5747_s14 }
 0x18b   : > { %s5781_s1 = scalar_lea.vmem [#allocation21], %s3598_s21 }
 0x18c   : > { %5149 = dma.done.wait (%p6364_p2), %s710_s17, 128  }
 0x18d   : > { %5151 = vsyncadd (%p6364_p2), %s710_s17, 4294967168  ;;  %s5787_s20 = scalar_lea.vmem [#allocation24], %s3598_s21  ;;  %s6365_s24 = sld [smem:[#allocation38_spill]] }
 0x193   : > { %p3600_p11 = scmp.ne.s32.totalorder %s6365_s24, 0 }
 0x194   : > { %v4419_v0 = vld [vmem:[#allocation8] sm:$0xff] (!%p3600_p11)   ;;  %v5204_v1 = vmov (!%p3600_p11), 0.0   ;;  %v4420_v2 = vld [vmem:[#allocation8 + $0x8] sm:$0xff] (!%p3600_p11)   ;;  %vm5205_vm0 = vmmov (!%p3600_p11), 0   ;;  %v4421_v3 = vld [vmem:[#allocation8 + $0x10] sm:$0xff] (!%p3600_p11)  }
 0x195   : > { %794 = sbr.rel (%p3600_p11) target bundleno = 683 (0x2ab), region = 120  ;;  %3996 = vmatprep.subr.bf16.mxu0 (!%p3600_p11), %v5204_v1  ;;  %4012 = vmatprep.mubr.msk.bf16.mxu0 (!%p3600_p11), %vm5205_vm0, %v5204_v1  ;;  %v4422_v4 = vld [vmem:[#allocation8 + $0x18] sm:$0xff] (!%p3600_p11)   ;;  %v4423_v5 = vld [vmem:[#allocation8 + $0x20] sm:$0xff] (!%p3600_p11)   ;;  %v4424_v6 = vld [vmem:[#allocation8 + $0x28] sm:$0xff] (!%p3600_p11)  }
 0x196   : > { %3997 = vmatpush3.bf16.msra.mxu0 (!%p3600_p11), %v4419_v0  ;;  %v4425_v7 = vld [vmem:[#allocation8 + $0x30] sm:$0xff] (!%p3600_p11)   ;;  %v4426_v8 = vld [vmem:[#allocation8 + $0x38] sm:$0xff] (!%p3600_p11)   ;;  %v3601_v10 = vld [vmem:[#allocation9] ss:$0 sm:$0xff] (!%p3600_p11) }
 0x197   : > { %3998 = vmatprep.subr.bf16.mxu0 (!%p3600_p11), %v5204_v1  ;;  %v4427_v9 = vld [vmem:[#allocation3] sm:$0xff] (!%p3600_p11)   ;;  %v933_v32 = vld [vmem:[#allocation11] sm:$0xff] (!%p3600_p11) }
 0x19a   : > { %3999 = vmatpush3.bf16.msra.mxu0 (!%p3600_p11), %v4420_v2 }
 0x19b   : > { %4000 = vmatprep.subr.bf16.mxu0 (!%p3600_p11), %v5204_v1 }
 0x19e   : > { %4001 = vmatpush3.bf16.msra.mxu0 %v4421_v3 }
 0x19f   : > { %4002 = vmatprep.subr.bf16.mxu0 %v5204_v1 }
 0x1a2   : > { %4003 = vmatpush3.bf16.msra.mxu0 %v4422_v4 }
 0x1a3   : > { %4004 = vmatprep.subr.bf16.mxu0 %v5204_v1 }
 0x1a6   : > { %4005 = vmatpush3.bf16.msra.mxu0 %v4423_v5 }
 0x1a7   : > { %4006 = vmatprep.subr.bf16.mxu0 %v5204_v1 }
 0x1aa   : > { %4007 = vmatpush3.bf16.msra.mxu0 %v4424_v6 }
 0x1ab   : > { %4008 = vmatprep.subr.bf16.mxu0 %v5204_v1 }
 0x1ae   : > { %4009 = vmatpush3.bf16.msra.mxu0 %v4425_v7 }
 0x1af   : > { %4010 = vmatprep.subr.bf16.mxu0 %v5204_v1 }
 0x1b2   : > { %4011 = vmatpush3.bf16.msra.mxu0 %v4426_v8 }
 0x1b5   : > { %4013 = vmatmul.mubr.bf16.vlgmr.msra.gmra.mrb[0].mxu0 %v4427_v9 }
 0x288   : > { %v908_v11 = vpop.f32.mrb[0].mxu0 }
 0x289   : > { %v909_v12 = vadd.f32 %v3601_v10, %v908_v11  ;;  %v4014_v13 = vpop.f32.mrb[1].mxu0 }
 0x28a   : > { %v911_v14 = vpop.f32.mrb[2].mxu0 }
 0x28b   : > { %v915_v15 = vmul.f32 %v909_v12, %v909_v12  ;;  %v912_v16 = vadd.f32 %v3601_v10, %v911_v14  ;;  %v4015_v17 = vpop.f32.mrb[3].mxu0 }
 0x28d   : > { %v917_v18 = vmul.f32 %v915_v15, %v909_v12  ;;  %v916_v19 = vmul.f32 %v912_v16, %v912_v16 }
 0x28f   : > { %v919_v20 = vmul.f32 0.044715, %v917_v18  ;;  %v918_v21 = vmul.f32 %v916_v19, %v912_v16 }
 0x291   : > { %v921_v22 = vadd.f32 %v919_v20, %v909_v12  ;;  %v920_v23 = vmul.f32 0.044715, %v918_v21 }
 0x293   : > { %v923_v24 = vmul.f32 0.7978846, %v921_v22  ;;  %v922_v25 = vadd.f32 %v920_v23, %v912_v16 }
 0x295   : > { %4428 = vtanh.f32 %v923_v24  ;;  %v924_v26 = vmul.f32 0.7978846, %v922_v25 }
 0x297   : > { %4430 = vtanh.f32 %v924_v26 }
 0x29f   : > { %v4429_v27 = vpop.eup %4428 }
 0x2a0   : > { %v927_v28 = vadd.f32 1.0, %v4429_v27 }
 0x2a1   : > { %v4431_v29 = vpop.eup %4430 }
 0x2a2   : > { %v929_v30 = vmul.f32 0.5, %v927_v28  ;;  %v928_v31 = vadd.f32 1.0, %v4431_v29 }
 0x2a4   : > { %v931_v33 = vmul.f32 %v929_v30, %v909_v12  ;;  %v930_v34 = vmul.f32 0.5, %v928_v31 }
 0x2a6   : > { %v934_v35 = vadd.f32 %v933_v32, %v931_v33  ;;  %v932_v36 = vmul.f32 %v930_v34, %v912_v16 }
 0x2a8   : > { %936 = vst [vmem:[#allocation2] sm:$0xff] %v934_v35  ;;  %v935_v37 = vadd.f32 %v933_v32, %v932_v36 }
 0x2aa   : > { %937 = vst [vmem:[#allocation2 + $0x8] sm:$0xff] %v935_v37 }
 0x2ab PF: > { %v4437_v40 = vld [vmem:[%s5750_s30 + $0x4] ss:$12 sps:$4 sm:$0xff]   ;;  %v4439_v41 = vld [vmem:[%s5750_s30] ss:$12 sps:$4 sm:$0xff]   ;;  %v5206_v42 = vmov 0.0   ;;  %v5207_v4 = vmov 0   ;;  %v976_v20 = vlaneseq }
 0x2ac   : > { %4016 = vmatprep.subr.bf16.mxu1 %v5206_v42  ;;  %v4440_v43 = vld [vmem:[%s5750_s30 + $0x8] ss:$12 sps:$4 sm:$0xff]   ;;  %1166 = vmatprep.subr.bf16.mxu0 %v4437_v40  ;;  %v4443_v53 = vld [vmem:[%s5750_s30 + $0x18] ss:$12 sps:$4 sm:$0xff]   ;;  %v4444_v54 = vld [vmem:[%s5750_s30 + $0x20] ss:$12 sps:$4 sm:$0xff]  }
 0x2ad   : > { %1167 = vmatpush1.bf16.msra.mxu0 %v4439_v41  ;;  %4017 = vmatpush3.bf16.msra.mxu1 %v4440_v43  ;;  %v4441_v52 = vld [vmem:[%s5750_s30 + $0x1c] ss:$12 sps:$4 sm:$0xff]   ;;  %v4445_v55 = vld [vmem:[%s5750_s30 + $0x34] ss:$12 sps:$4 sm:$0xff]   ;;  %v4448_v57 = vld [vmem:[%s5750_s30 + $0x38] ss:$12 sps:$4 sm:$0xff]  }
 0x2ae   : > { %4018 = vmatprep.subr.bf16.mxu1 %v5206_v42  ;;  %1168 = vmatprep.subr.bf16.mxu0 %v4441_v52  ;;  %v4447_v56 = vld [vmem:[%s5750_s30 + $0x30] ss:$12 sps:$4 sm:$0xff]   ;;  %v4449_v58 = vld [vmem:[%s5750_s30 + $0x4c] ss:$12 sps:$4 sm:$0xff]   ;;  %v4451_v59 = vld [vmem:[%s5750_s30 + $0x48] ss:$12 sps:$4 sm:$0xff]  }
 0x2af   : > { %v946_v38 = vld [vmem:[#allocation2] sm:$0xff]  ;;  %v4453_v61 = vld [vmem:[%s5750_s30 + $0x64] ss:$12 sps:$4 sm:$0xff]   ;;  %v4456_v63 = vld [vmem:[%s5750_s30 + $0x68] ss:$12 sps:$4 sm:$0xff]   ;;  %1198 = vmatprep.mubr.bf16.mxu0 %v5207_v4  ;;  %vm5208_vm1 = vmmov 0  }
 0x2b0   : > { %948 = vadd.xlane.f32.xlu0 %v946_v38  ;;  %v4452_v60 = vld [vmem:[%s5750_s30 + $0x50] ss:$12 sps:$4 sm:$0xff]   ;;  %v4455_v62 = vld [vmem:[%s5750_s30 + $0x60] ss:$12 sps:$4 sm:$0xff]   ;;  %v4459_v1 = vld [vmem:[%s5750_s30 + $0x78] ss:$12 sps:$4 sm:$0xff]   ;;  %4032 = vmatprep.mubr.msk.bf16.mxu1 %vm5208_vm1, %v5206_v42 }
 0x2b1   : > { %v947_v39 = vld [vmem:[#allocation2 + $0x8] sm:$0xff]  ;;  %1169 = vmatpush1.bf16.msra.mxu0 %v4443_v53  ;;  %4019 = vmatpush3.bf16.msra.mxu1 %v4444_v54  ;;  %v4460_v2 = vld [vmem:[%s5750_s30 + $0x80] ss:$12 sps:$4 sm:$0xff]   ;;  %v4463_v5 = vld [vmem:[%s5750_s30 + $0x90] ss:$12 sps:$4 sm:$0xff]   ;;  %v5835_v23 = vshrl.u32 %v976_v20, 7 }
 0x2b2   : > { %4020 = vmatprep.subr.bf16.mxu1 %v5206_v42  ;;  %1170 = vmatprep.subr.bf16.mxu0 %v4445_v55  ;;  %v4457_v0 = vld [vmem:[%s5750_s30 + $0x7c] ss:$12 sps:$4 sm:$0xff]   ;;  %v4461_v3 = vld [vmem:[%s5750_s30 + $0x94] ss:$12 sps:$4 sm:$0xff]   ;;  %v4464_v6 = vld [vmem:[%s5750_s30 + $0x98] ss:$12 sps:$4 sm:$0xff]  }
 0x2b3   : > { %v4465_v7 = vld [vmem:[%s5750_s30 + $0xac] ss:$12 sps:$4 sm:$0xff]   ;;  %v4467_v8 = vld [vmem:[%s5750_s30 + $0xa8] ss:$12 sps:$4 sm:$0xff]   ;;  %v4468_v9 = vld [vmem:[%s5750_s30 + $0xb0] ss:$12 sps:$4 sm:$0xff]  }
 0x2b4   : > { %950 = vadd.xlane.f32.xlu0 %v947_v39  ;;  %v5838_v24 = vsub.s32 0, %v5835_v23  ;;  %v5841_v25 = vld [vmem:[%s5781_s1] sm:$0x7f]  ;;  %v5847_v29 = vsub.s32 1, %v5835_v23  ;;  %vm1258_vm2 = vcmask 523264   ;;  %vm1395_vm3 = vcmask 1043456  }
 0x2b5   : > { %1171 = vmatpush1.bf16.msra.mxu0 %v4447_v56  ;;  %4021 = vmatpush3.bf16.msra.mxu1 %v4448_v57  ;;  %vm1367_vm4 = vcmask 64512   ;;  %s5209_s19 = smov 64   ;;  %s6366_s22 = sld [smem:[#allocation38_spill]] }
 0x2b6   : > { %4022 = vmatprep.subr.bf16.mxu1 %v5206_v42  ;;  %1172 = vmatprep.subr.bf16.mxu0 %v4449_v58  ;;  %v979_v28 = vrot.slane %v5841_v25, %v5838_v24  ;;  %v985_v33 = vrot.slane %v5841_v25, %v5847_v29 }
 0x2b9   : > { %1173 = vmatpush1.bf16.msra.mxu0 %v4451_v59  ;;  %4023 = vmatpush3.bf16.msra.mxu1 %v4452_v60 }
 0x2ba   : > { %4024 = vmatprep.subr.bf16.mxu1 %v5206_v42  ;;  %1174 = vmatprep.subr.bf16.mxu0 %v4453_v61 }
 0x2bb   : > { %p3885_p8 = scmp.ne.s32.totalorder %s6366_s22, 1 }
 0x2bd   : > { %1175 = vmatpush1.bf16.msra.mxu0 %v4455_v62  ;;  %4025 = vmatpush3.bf16.msra.mxu1 %v4456_v63 }
 0x2be   : > { %1176 = vmatprep.subr.bf16.mxu0 %v4457_v0  ;;  %4026 = vmatprep.subr.bf16.mxu1 %v5206_v42 }
 0x2c1   : > { %1177 = vmatpush1.bf16.msra.mxu0 %v4459_v1  ;;  %4027 = vmatpush3.bf16.msra.mxu1 %v4460_v2 }
 0x2c2   : > { %1178 = vmatprep.subr.bf16.mxu0 %v4461_v3  ;;  %4028 = vmatprep.subr.bf16.mxu1 %v5206_v42  ;;  %v5880_v3 = vld [vmem:[#allocation6] ss:$0 sm:$0xff] }
 0x2c5   : > { %1179 = vmatpush1.bf16.msra.mxu0 %v4463_v5  ;;  %4029 = vmatpush3.bf16.msra.mxu1 %v4464_v6 }
 0x2c6   : > { %1180 = vmatprep.subr.bf16.mxu0 %v4465_v7  ;;  %4030 = vmatprep.subr.bf16.mxu1 %v5206_v42 }
 0x2c9   : > { %1181 = vmatpush1.bf16.msra.mxu0 %v4467_v8  ;;  %4031 = vmatpush3.bf16.msra.mxu1 %v4468_v9 }
 0x2ca   : > { %4036 = vmatprep.subr.bf16.mxu1 %v5206_v42  ;;  %4060 = vmatprep.subr.bf16.mxu0 %v5206_v42 }
 0x33d   : > { %v949_v44 = vpop.xlane.xlu0 %948 }
 0x33e   : > { %v952_v45 = vmul.f32 0.03125, %v949_v44 }
 0x340   : > { %v5795_v46 = vsub.f32 %v946_v38, %v952_v45  ;;  %v962_v10 = vmul.f32 %v952_v45, %v952_v45  ;;  %v1021_v38 = vld [vmem:[%s5758_s25] sm:$0x7] }
 0x341   : > { %v951_v47 = vpop.xlane.xlu0 %950  ;;  %v1030_v40 = vrot.slane %v1021_v38, %v5847_v29  ;;  %v1026_v53 = vrot.slane %v1021_v38, %v5838_v24 }
 0x342   : > { %v953_v48 = vmul.f32 0.03125, %v951_v47  ;;  %v956_v49 = vmul.f32 %v5795_v46, %v5795_v46  ;;  %v964_v12 = vmul.f32 96.0, %v962_v10 }
 0x344   : > { %v5799_v50 = vsub.f32 %v947_v39, %v953_v48  ;;  %958 = vadd.xlane.f32.xlu1 %v956_v49  ;;  %v963_v11 = vmul.f32 %v953_v48, %v953_v48  ;;  %v5858_v39 = vsub.s32 2, %v5835_v23 }
 0x346   : > { %v957_v51 = vmul.f32 %v5799_v50, %v5799_v50  ;;  %v965_v16 = vmul.f32 96.0, %v963_v11  ;;  %v1034_v44 = vrot.slane %v1021_v38, %v5858_v39 }
 0x348   : > { %960 = vadd.xlane.f32.xlu1 %v957_v51 }
 0x3d1   : > { %v959_v13 = vpop.xlane.xlu1 %958 }
 0x3d2   : > { %v966_v14 = vsub.f32 %v959_v13, %v964_v12  ;;  %v5884_v12 = vld [vmem:[#allocation6 + $0x1] ss:$0 sm:$0xff] }
 0x3d4   : > { %v968_v15 = vmul.f32 0.03125, %v966_v14 }
 0x3d5   : > { %v961_v17 = vpop.xlane.xlu1 %960 }
 0x3d6   : > { %v970_v18 = vadd.f32 1e-05, %v968_v15  ;;  %v967_v19 = vsub.f32 %v961_v17, %v965_v16 }
 0x3d8   : > { %4621 = vrsqrt.f32 %v970_v18  ;;  %v969_v21 = vmul.f32 0.03125, %v967_v19 }
 0x3da   : > { %v971_v22 = vadd.f32 1e-05, %v969_v21 }
 0x3dc   : > { %4623 = vrsqrt.f32 %v971_v22 }
 0x3e2   : > { %v4622_v26 = vpop.eup %4621 }
 0x3e3   : > { %v974_v27 = vmul.f32 %v4622_v26, %v5795_v46 }
 0x3e5   : > { %v980_v32 = vmul.f32 %v979_v28, %v974_v27 }
 0x3e6   : > { %v4624_v30 = vpop.eup %4623 }
 0x3e7   : > { %v975_v31 = vmul.f32 %v4624_v30, %v5799_v50  ;;  %v986_v35 = vadd.f32 %v985_v33, %v980_v32 }
 0x3e9   : > { %v981_v34 = vmul.f32 %v979_v28, %v975_v31 }
 0x3eb   : > { %v987_v36 = vadd.f32 %v985_v33, %v981_v34 }
 0x3ed   : > { %v1020_v37 = vpack.c.bf16 %v987_v36, %v986_v35 }
 0x3ef   : > { %1199 = vmatmul.mubr.bf16.vlgmr.msra.gmra.mrb[0].mxu0 %v1020_v37  ;;  %4033 = vmatmul.mubr.bf16.vlgmr.msra.gmra.mrb[0].mxu1 %v1020_v37 }
 0x3f0   : > { %4038 = vmatprep.mubr.msk.bf16.mxu1 %vm5208_vm1, %v5206_v42  ;;  %4062 = vmatprep.mubr.msk.bf16.mxu0 %vm5208_vm1, %v5206_v42 }
 0x4c2   : > { %v1200_v41 = vpop.f32.mrb[0].mxu0  ;;  %v1243_v43 = vpop.f32.mrb[0].mxu1 }
 0x4c3   : > { %v1202_v45 = vpop.f32.mrb[1].mxu0  ;;  %v4034_v46 = vpop.f32.mrb[1].mxu1  ;;  %v1201_v57 = vadd.f32 %v1200_v41, %v1026_v53  ;;  %v1244_v60 = vadd.f32 %v1243_v43, %v1034_v44 }
 0x4c4   : > { %v1203_v47 = vadd.f32 %v1202_v45, %v1030_v40  ;;  %v1204_v48 = vpop.f32.mrb[2].mxu0  ;;  %v1246_v49 = vpop.f32.mrb[2].mxu1 }
 0x4c5   : > { %v5862_v50 = vadd.f32 %v1246_v49, %v1034_v44  ;;  %v1206_v51 = vpop.f32.mrb[3].mxu0  ;;  %v4035_v52 = vpop.f32.mrb[3].mxu1  ;;  %v1252_v59 = vpack.c.bf16 %v1201_v57, %v1201_v57  ;;  %v1205_v62 = vadd.f32 %v1204_v48, %v1026_v53  ;;  %v5872_v63 = vpack.c.bf16 %v1244_v60, %v1244_v60 }
 0x4c6   : > { %v1254_v54 = vpack.c.bf16 %v1203_v47, %v1203_v47  ;;  %v1207_v56 = vadd.f32 %v1206_v51, %v1030_v40 }
 0x4c7   : > { %v1253_v0 = vpack.c.bf16 %v1205_v62, %v1205_v62  ;;  %v1397_v1 = vsel %vm1395_vm3, %v5872_v63, 0  ;;  %v1257_v40 = vpack.c.bf16 %v5862_v50, %v5862_v50 }
 0x4c8   : > { %v1263_v55 = vsel %vm1258_vm2, %v1254_v54, 0  ;;  %v1255_v58 = vpack.c.bf16 %v1207_v56, %v1207_v56 }
 0x4c9   : > { %4037 = vmatpush3.bf16.xpose.msra.mxu1 %v1263_v55  ;;  %v1443_v45 = vsel %vm1395_vm3, %v1257_v40, 0 }
 0x4ca   : > { %4042 = vmatprep.subr.bf16.mxu1 %v5206_v42  ;;  %v1309_v61 = vsel %vm1258_vm2, %v1255_v58, 0 }
 0x4d0   : > { %4039 = vmatmul.mubr.msk.bf16.vlgmr.msra.gmra.mrb[4].mxu1 %vm1258_vm2, %v1252_v59 }
 0x4d1   : > { %4043 = vmatpush3.bf16.xpose.msra.mxu1 %v1309_v61  ;;  %4044 = vmatprep.mubr.msk.bf16.mxu1 %vm5208_vm1, %v5206_v42 }
 0x4d2   : > { %4048 = vmatprep.subr.bf16.mxu1 %v5206_v42 }
 0x4d8   : > { %4045 = vmatmul.mubr.msk.bf16.vlgmr.msra.gmra.mrb[8].mxu1 %vm1258_vm2, %v1253_v0 }
 0x4d9   : > { %4049 = vmatpush3.bf16.msra.mxu1 %v1397_v1  ;;  %4050 = vmatprep.mubr.msk.bf16.mxu1 %vm5208_vm1, %v5206_v42 }
 0x4da   : > { %4054 = vmatprep.subr.bf16.mxu1 %v5206_v42 }
 0x5a3   : > { %v1299_v2 = vpop.f32.mrb[4].mxu1 }
 0x5a4   : > { %v1351_v5 = vmul.f32 0.25, %v1299_v2  ;;  %v4040_v6 = vpop.f32.mrb[5].mxu1 }
 0x5a5   : > { %v1302_v7 = vpop.f32.mrb[6].mxu1 }
 0x5a6   : > { %v4041_v8 = vpop.f32.mrb[7].mxu1  ;;  %v1365_v9 = vadd.f32 %v5880_v3, %v1351_v5 }
 0x5a8   : > { %v1368_v10 = vsel %vm1367_vm4, %v1365_v9, -inf }
 0x5a9   : > { %1369 = vmax.xlane.f32.xlu0 %v1368_v10 }
 0x5ab   : > { %v1345_v11 = vpop.f32.mrb[8].mxu1 }
 0x5ac   : > { %v1352_v13 = vmul.f32 0.25, %v1345_v11  ;;  %v4046_v14 = vpop.f32.mrb[9].mxu1 }
 0x5ad   : > { %v1348_v15 = vpop.f32.mrb[10].mxu1 }
 0x5ae   : > { %v4047_v16 = vpop.f32.mrb[11].mxu1  ;;  %v1366_v17 = vadd.f32 %v5884_v12, %v1352_v13 }
 0x5b0   : > { %v1371_v18 = vsel %vm1367_vm4, %v1366_v17, -inf }
 0x5b1   : > { %1372 = vmax.xlane.f32.xlu1 %v1371_v18 }
 0x5c2   : > { %1541 = vrot.lane.b32.xlu1 %v1255_v58, %s5209_s19 }
 0x636   : > { %v1370_v19 = vpop.xlane.xlu0 %1369 }
 0x637   : > { %v1374_v20 = vsub.f32 %v1365_v9, %v1370_v19 }
 0x639   : > { %v1376_v21 = vmul.f32 1.442695, %v1374_v20 }
 0x63b   : > { %4625 = vpow2.f32 %v1376_v21 }
 0x63e   : > { %v1373_v22 = vpop.xlane.xlu1 %1372 }
 0x63f   : > { %v1375_v26 = vsub.f32 %v1366_v17, %v1373_v22 }
 0x641   : > { %v1378_v27 = vmul.f32 1.442695, %v1375_v26 }
 0x642   : > { %v1542_v34 = vpop.permute.xlu1 %1541 }
 0x643   : > { %4627 = vpow2.f32 %v1378_v27  ;;  %v1547_v49 = vsel %vm1258_vm2, %v1542_v34, 0 }
 0x645   : > { %v4626_v28 = vpop.eup %4625 }
 0x646   : > { %v1380_v30 = vsel %vm1367_vm4, %v4626_v28, 0.0 }
 0x647   : > { %1381 = vadd.xlane.f32.xlu0 %v1380_v30 }
 0x64d   : > { %v4628_v31 = vpop.eup %4627 }
 0x64e   : > { %v1383_v32 = vsel %vm1367_vm4, %v4628_v31, 0.0 }
 0x64f   : > { %1384 = vadd.xlane.f32.xlu1 %v1383_v32 }
 0x65d   : > { %1489 = vrot.lane.b32.xlu0 %v1254_v54, %s5209_s19 }
 0x660   : > { %1486 = vrot.lane.b32.xlu1 %v1252_v59, %s5209_s19 }
 0x664   : > { %1538 = vrot.lane.b32.xlu1 %v1253_v0, %s5209_s19 }
 0x6d4   : > { %v1382_v33 = vpop.xlane.xlu0 %1381 }
 0x6d5   : > { %4629 = vrcp.f32 %v1382_v33 }
 0x6d8   : > { %v1490_v35 = vpop.permute.xlu0 %1489 }
 0x6d9   : > { %v1495_v36 = vsel %vm1258_vm2, %v1490_v35, 0 }
 0x6da   : > { %4061 = vmatpush3.bf16.xpose.msra.mxu0 %v1495_v36  ;;  %v4469_v36 = vld [vmem:[%s5770_s13] sm:$0xff]  }
 0x6db   : > { %4072 = vmatprep.subr.bf16.mxu0 %v5206_v42 }
 0x6dc   : > { %v1385_v37 = vpop.xlane.xlu1 %1384 }
 0x6dd   : > { %4631 = vrcp.f32 %v1385_v37  ;;  %v4470_v37 = vld [vmem:[%s5770_s13 + $0x8] sm:$0xff]  }
 0x6df   : > { %v4630_v38 = vpop.eup %4629 }
 0x6e0   : > { %v1387_v41 = vmul.f32 %v4630_v38, %v4626_v28  ;;  %v1487_v43 = vpop.permute.xlu1 %1486  ;;  %v4471_v38 = vld [vmem:[%s5770_s13 + $0x10] sm:$0xff]  }
 0x6e1   : > { %4063 = vmatmul.mubr.msk.bf16.vlgmr.msra.gmra.mrb[4].mxu0 %vm1258_vm2, %v1487_v43  ;;  %v4474_v43 = vld [vmem:[%s5770_s13 + $0x28] sm:$0xff]  }
 0x6e2   : > { %v1390_v44 = vpack.c.bf16 %v1387_v41, %v1387_v41  ;;  %4074 = vmatprep.mubr.msk.bf16.mxu0 %vm5208_vm1, %v5206_v42  ;;  %v4473_v41 = vld [vmem:[%s5770_s13 + $0x20] sm:$0xff]  }
 0x6e4   : > { %4051 = vmatmul.mubr.msk.bf16.vlgmr.msra.gmra.mrb[12].mxu1 %vm1367_vm4, %v1390_v44  ;;  %v1539_v50 = vpop.permute.xlu1 %1538  ;;  %v4475_v44 = vld [vmem:[%s5770_s13 + $0x30] sm:$0xff]  }
 0x6e5   : > { %4055 = vmatpush3.bf16.msra.mxu1 %v1443_v45  ;;  %4056 = vmatprep.mubr.msk.bf16.mxu1 %vm5208_vm1, %v5206_v42  ;;  %v4476_v45 = vld [vmem:[%s5770_s13 + $0x38] sm:$0xff]  }
 0x6e6   : > { %4066 = vmatprep.subr.bf16.mxu1 %v5206_v42 }
 0x6e7   : > { %v4632_v46 = vpop.eup %4631 }
 0x6e8   : > { %v1389_v47 = vmul.f32 %v4632_v46, %v4628_v31 }
 0x6ea   : > { %v1391_v48 = vpack.c.bf16 %v1389_v47, %v1389_v47 }
 0x6ec   : > { %4057 = vmatmul.mubr.msk.bf16.vlgmr.msra.gmra.mrb[16].mxu1 %vm1367_vm4, %v1391_v48 }
 0x6ed   : > { %4068 = vmatprep.mubr.msk.bf16.mxu1 %vm5208_vm1, %v5206_v42 }
 0x6ee   : > { %4067 = vmatpush3.bf16.xpose.msra.mxu1 %v1547_v49  ;;  %v4477_v49 = vld [vmem:[%s5760_s12] ss:$12 sps:$4 sm:$0xff]  }
 0x6ef   : > { %4078 = vmatprep.subr.bf16.mxu1 %v5206_v42 }
 0x6f5   : > { %4069 = vmatmul.mubr.msk.bf16.vlgmr.msra.gmra.mrb[20].mxu1 %vm1258_vm2, %v1539_v50  ;;  %v4479_v50 = vld [vmem:[%s5760_s12 + $0x4] ss:$12 sps:$4 sm:$0xff]  }
 0x6f6   : > { %4080 = vmatprep.mubr.msk.bf16.mxu1 %vm5208_vm1, %v5206_v42 }
 0x7b4   : > { %v1531_v51 = vpop.f32.mrb[4].mxu0 }
 0x7b5   : > { %v1589_v52 = vmul.f32 0.25, %v1531_v51  ;;  %v4064_v53 = vpop.f32.mrb[5].mxu0 }
 0x7b6   : > { %v1534_v54 = vpop.f32.mrb[6].mxu0  ;;  %v4481_v53 = vld [vmem:[%s5760_s12 + $0x18] ss:$12 sps:$4 sm:$0xff]  }
 0x7b7   : > { %v5914_v55 = vpop.f32.mrb[12].mxu1  ;;  %v4065_v56 = vpop.f32.mrb[7].mxu0  ;;  %v1591_v57 = vadd.f32 %v5880_v3, %v1589_v52  ;;  %v4483_v52 = vld [vmem:[%s5760_s12 + $0x1c] ss:$12 sps:$4 sm:$0xff]  }
 0x7b8   : > { %v4052_v58 = vpop.f32.mrb[13].mxu1  ;;  %v4487_v56 = vld [vmem:[%s5760_s12 + $0x34] ss:$12 sps:$4 sm:$0xff]  }
 0x7b9   : > { %v1436_v59 = vpop.f32.mrb[14].mxu1  ;;  %v1593_v60 = vsel %vm1367_vm4, %v1591_v57, -inf }
 0x7ba   : > { %1594 = vmax.xlane.f32.xlu0 %v1593_v60  ;;  %v4053_v61 = vpop.f32.mrb[15].mxu1  ;;  %v4485_v60 = vld [vmem:[%s5760_s12 + $0x30] ss:$12 sps:$4 sm:$0xff]  }
 0x7bf   : > { %v5918_v62 = vpop.f32.mrb[16].mxu1 }
 0x7c0   : > { %v4058_v0 = vpop.f32.mrb[17].mxu1 }
 0x7c1   : > { %v1482_v1 = vpop.f32.mrb[18].mxu1  ;;  %v4491_v0 = vld [vmem:[%s5760_s12 + $0x4c] ss:$12 sps:$4 sm:$0xff]  }
 0x7c2   : > { %v4059_v2 = vpop.f32.mrb[19].mxu1  ;;  %v4489_v1 = vld [vmem:[%s5760_s12 + $0x48] ss:$12 sps:$4 sm:$0xff]  }
 0x7c3   : > { %v4495_v2 = vld [vmem:[%s5760_s12 + $0x64] ss:$12 sps:$4 sm:$0xff]  }
 0x7c8   : > { %v1583_v5 = vpop.f32.mrb[20].mxu1 }
 0x7c9   : > { %v1590_v6 = vmul.f32 0.25, %v1583_v5  ;;  %v4070_v7 = vpop.f32.mrb[21].mxu1  ;;  %v4493_v5 = vld [vmem:[%s5760_s12 + $0x60] ss:$12 sps:$4 sm:$0xff]  }
 0x7ca   : > { %v1586_v8 = vpop.f32.mrb[22].mxu1  ;;  %v4497_v7 = vld [vmem:[%s5760_s12 + $0x78] ss:$12 sps:$4 sm:$0xff]  }
 0x7cb   : > { %v4071_v9 = vpop.f32.mrb[23].mxu1  ;;  %v1592_v10 = vadd.f32 %v5884_v12, %v1590_v6  ;;  %v4499_v6 = vld [vmem:[%s5760_s12 + $0x7c] ss:$12 sps:$4 sm:$0xff]   ;;  %v4503_v8 = vld [vmem:[%s5760_s12 + $0x94] ss:$12 sps:$4 sm:$0xff]  }
 0x7cc   : > { %v4501_v9 = vld [vmem:[%s5760_s12 + $0x90] ss:$12 sps:$4 sm:$0xff]  }
 0x7cd   : > { %v1596_v3 = vsel %vm1367_vm4, %v1592_v10, -inf }
 0x7ce   : > { %1597 = vmax.xlane.f32.xlu1 %v1596_v3 }
 0x7df   : > { %1667 = vrot.lane.b32.xlu1 %v1257_v40, %s5209_s19  ;;  %v4472_v40 = vld [vmem:[%s5770_s13 + $0x18] sm:$0xff]  }
 0x847   : > { %v1595_v11 = vpop.xlane.xlu0 %1594 }
 0x848   : > { %v1599_v13 = vsub.f32 %v1591_v57, %v1595_v11 }
 0x84a   : > { %v1601_v14 = vmul.f32 1.442695, %v1599_v13 }
 0x84c   : > { %4633 = vpow2.f32 %v1601_v14 }
 0x856   : > { %v4634_v15 = vpop.eup %4633 }
 0x857   : > { %v1605_v16 = vsel %vm1367_vm4, %v4634_v15, 0.0 }
 0x858   : > { %1606 = vadd.xlane.f32.xlu0 %v1605_v16 }
 0x85b   : > { %v1598_v17 = vpop.xlane.xlu1 %1597 }
 0x85c   : > { %v1600_v18 = vsub.f32 %v1592_v10, %v1598_v17  ;;  %v4484_v17 = vld [vmem:[%s5760_s12 + $0x20] ss:$12 sps:$4 sm:$0xff]  }
 0x85e   : > { %v1603_v19 = vmul.f32 1.442695, %v1600_v18  ;;  %v4488_v18 = vld [vmem:[%s5760_s12 + $0x38] ss:$12 sps:$4 sm:$0xff]  }
 0x85f   : > { %v1668_v20 = vpop.permute.xlu1 %1667 }
 0x860   : > { %4635 = vpow2.f32 %v1603_v19  ;;  %v1673_v12 = vsel %vm1395_vm3, %v1668_v20, 0  ;;  %v4500_v19 = vld [vmem:[%s5760_s12 + $0x80] ss:$12 sps:$4 sm:$0xff]   ;;  %v4504_v20 = vld [vmem:[%s5760_s12 + $0x98] ss:$12 sps:$4 sm:$0xff]  }
 0x861   : > { %4079 = vmatpush3.bf16.msra.mxu1 %v1673_v12  ;;  %v4507_v12 = vld [vmem:[%s5760_s12 + $0xac] ss:$12 sps:$4 sm:$0xff]  }
 0x862   : > { %2029 = vmatprep.subr.bf16.mxu1 %v4479_v50  ;;  %v4527_v50 = vld [vmem:[%s5768_s3 + $0x60] ss:$8 sps:$4 sm:$0xff]  }
 0x86a   : > { %v4636_v21 = vpop.eup %4635 }
 0x86b   : > { %v1608_v22 = vsel %vm1367_vm4, %v4636_v21, 0.0 }
 0x86c   : > { %1609 = vadd.xlane.f32.xlu0 %v1608_v22  ;;  %v4508_v22 = vld [vmem:[%s5760_s12 + $0xb0] ss:$12 sps:$4 sm:$0xff]  }
 0x882   : > { %1618 = vrot.lane.b32.xlu0 %v5872_v63, %s5209_s19 }
 0x8e5   : > { %v1607_v26 = vpop.xlane.xlu0 %1606 }
 0x8e6   : > { %4637 = vrcp.f32 %v1607_v26  ;;  %v4511_v26 = vld [vmem:[%s5768_s3 + $0x4] ss:$8 sps:$4 sm:$0xff]  }
 0x8f0   : > { %v4638_v27 = vpop.eup %4637 }
 0x8f1   : > { %v1612_v30 = vmul.f32 %v4638_v27, %v4634_v15  ;;  %v4480_v15 = vld [vmem:[%s5760_s12 + $0x8] ss:$12 sps:$4 sm:$0xff]   ;;  %v1744_v27 = vsub.s32 4, %v5835_v23 }
 0x8f3   : > { %v1615_v33 = vpack.c.bf16 %v1612_v30, %v1612_v30 }
 0x8f9   : > { %v1610_v28 = vpop.xlane.xlu0 %1609 }
 0x8fa   : > { %4639 = vrcp.f32 %v1610_v28  ;;  %v1745_v28 = vrot.slane %v5841_v25, %v1744_v27 }
 0x8fd   : > { %v1619_v31 = vpop.permute.xlu0 %1618 }
 0x8fe   : > { %v1624_v32 = vsel %vm1395_vm3, %v1619_v31, 0 }
 0x8ff   : > { %4073 = vmatpush3.bf16.msra.mxu0 %v1624_v32 }
 0x900   : > { %4084 = vmatprep.subr.bf16.mxu0 %v5206_v42 }
 0x902   : > { %4075 = vmatmul.mubr.msk.bf16.vlgmr.msra.gmra.mrb[8].mxu0 %vm1367_vm4, %v1615_v33 }
 0x903   : > { %4100 = vmatprep.mubr.msk.bf16.mxu0 %vm5208_vm1, %v5206_v42  ;;  %4085 = vmatpush3.bf16.msra.mxu0 %v4469_v36 }
 0x904   : > { %v4640_v63 = vpop.eup %4639  ;;  %4086 = vmatprep.subr.bf16.mxu0 %v5206_v42 }
 0x905   : > { %v1614_v34 = vmul.f32 %v4640_v63, %v4636_v21  ;;  %v4505_v21 = vld [vmem:[%s5760_s12 + $0xa8] ss:$12 sps:$4 sm:$0xff]  }
 0x907   : > { %v1616_v35 = vpack.c.bf16 %v1614_v34, %v1614_v34  ;;  %4087 = vmatpush3.bf16.msra.mxu0 %v4470_v37  ;;  %v4514_v37 = vld [vmem:[%s5768_s3 + $0x14] ss:$8 sps:$4 sm:$0xff]  }
 0x908   : > { %4088 = vmatprep.subr.bf16.mxu0 %v5206_v42 }
 0x909   : > { %4081 = vmatmul.mubr.msk.bf16.vlgmr.msra.gmra.mrb[24].mxu1 %vm1367_vm4, %v1616_v35  ;;  %v4509_v35 = vld [vmem:[%s5768_s3] ss:$8 sps:$4 sm:$0xff]  }
 0x90a   : > { %2061 = vmatprep.mubr.bf16.mxu1 %v5207_v4  ;;  %2030 = vmatpush1.bf16.msra.mxu1 %v4477_v49  ;;  %v4529_v49 = vld [vmem:[%s5768_s3 + $0x64] ss:$8 sps:$4 sm:$0xff]  }
 0x90b   : > { %4089 = vmatpush3.bf16.msra.mxu0 %v4471_v38  ;;  %2031 = vmatprep.subr.bf16.mxu1 %v4483_v52  ;;  %v4512_v38 = vld [vmem:[%s5768_s3 + $0x10] ss:$8 sps:$4 sm:$0xff]  }
 0x90c   : > { %4090 = vmatprep.subr.bf16.mxu0 %v5206_v42  ;;  %v4530_v52 = vld [vmem:[%s5768_s3 + $0x70] ss:$8 sps:$4 sm:$0xff]  }
 0x90e   : > { %2032 = vmatpush1.bf16.msra.mxu1 %v4481_v53  ;;  %v6011_v53 = vld [vmem:[#allocation2] sm:$0xff] }
 0x90f   : > { %4091 = vmatpush3.bf16.msra.mxu0 %v4472_v40  ;;  %2033 = vmatprep.subr.bf16.mxu1 %v4487_v56  ;;  %v4517_v40 = vld [vmem:[%s5768_s3 + $0x24] ss:$8 sps:$4 sm:$0xff]  }
 0x910   : > { %4092 = vmatprep.subr.bf16.mxu0 %v5206_v42 }
 0x912   : > { %2034 = vmatpush1.bf16.msra.mxu1 %v4485_v60  ;;  %v4536_v60 = vld [vmem:[%s5770_s13 + $0x58] sm:$0xff]  }
 0x913   : > { %4093 = vmatpush3.bf16.msra.mxu0 %v4473_v41  ;;  %2035 = vmatprep.subr.bf16.mxu1 %v4491_v0  ;;  %v4515_v41 = vld [vmem:[%s5768_s3 + $0x20] ss:$8 sps:$4 sm:$0xff]  }
 0x914   : > { %4094 = vmatprep.subr.bf16.mxu0 %v5206_v42  ;;  %v4538_v0 = vld [vmem:[%s5770_s13 + $0x68] sm:$0xff]  }
 0x916   : > { %2036 = vmatpush1.bf16.msra.mxu1 %v4489_v1  ;;  %v4539_v1 = vld [vmem:[%s5770_s13 + $0x70] sm:$0xff]  }
 0x917   : > { %4095 = vmatpush3.bf16.msra.mxu0 %v4474_v43  ;;  %2037 = vmatprep.subr.bf16.mxu1 %v4495_v2  ;;  %v4520_v43 = vld [vmem:[%s5768_s3 + $0x34] ss:$8 sps:$4 sm:$0xff]  }
 0x918   : > { %4096 = vmatprep.subr.bf16.mxu0 %v5206_v42  ;;  %v4540_v2 = vld [vmem:[%s5770_s13 + $0x78] sm:$0xff]  }
 0x91a   : > { %2038 = vmatpush1.bf16.msra.mxu1 %v4493_v5  ;;  %v6037_v5 = vld [vmem:[%s5778_s16] sm:$0xf] }
 0x91b   : > { %4097 = vmatpush3.bf16.msra.mxu0 %v4475_v44  ;;  %2039 = vmatprep.subr.bf16.mxu1 %v4499_v6  ;;  %v4518_v44 = vld [vmem:[%s5768_s3 + $0x30] ss:$8 sps:$4 sm:$0xff]   ;;  %v2245_v6 = vrot.slane %v6037_v5, %v5838_v24 }
 0x91c   : > { %4098 = vmatprep.subr.bf16.mxu0 %v5206_v42 }
 0x91e   : > { %2040 = vmatpush1.bf16.msra.mxu1 %v4497_v7  ;;  %v2255_v7 = vrot.slane %v2245_v6, %v5838_v24  ;;  %v4545_v6 = vld [vmem:[%s5770_s13 + $0xe0] sm:$0xff]  }
 0x91f   : > { %4099 = vmatpush3.bf16.msra.mxu0 %v4476_v45  ;;  %2041 = vmatprep.subr.bf16.mxu1 %v4503_v8  ;;  %v4523_v45 = vld [vmem:[%s5768_s3 + $0x44] ss:$8 sps:$4 sm:$0xff]  }
 0x920   : > { %4104 = vmatprep.subr.bf16.mxu0 %v5206_v42 }
 0x922   : > { %2042 = vmatpush1.bf16.msra.mxu1 %v4501_v9 }
 0x923   : > { %2043 = vmatprep.subr.bf16.mxu1 %v4507_v12 }
 0x926   : > { %2044 = vmatpush1.bf16.msra.mxu1 %v4505_v21 }
 0x927   : > { %2194 = vmatprep.subr.bf16.mxu1 %v4511_v26 }
 0x9d5   : > { %v1660_v46 = vpop.f32.mrb[8].mxu0 }
 0x9d6   : > { %v4076_v47 = vpop.f32.mrb[9].mxu0 }
 0x9d7   : > { %v1663_v48 = vpop.f32.mrb[10].mxu0  ;;  %v4526_v47 = vld [vmem:[%s5768_s3 + $0x54] ss:$8 sps:$4 sm:$0xff]  }
 0x9d8   : > { %v4077_v51 = vpop.f32.mrb[11].mxu0  ;;  %v4524_v48 = vld [vmem:[%s5768_s3 + $0x50] ss:$8 sps:$4 sm:$0xff]  }
 0x9d9   : > { %v4532_v51 = vld [vmem:[%s5768_s3 + $0x74] ss:$8 sps:$4 sm:$0xff]  }
 0x9dc   : > { %v1709_v54 = vpop.f32.mrb[24].mxu1 }
 0x9dd   : > { %v4432_v57 = vpack.i.bf16 %v1709_v54, %v1660_v46  ;;  %v4082_v58 = vpop.f32.mrb[25].mxu1  ;;  %v4521_v46 = vld [vmem:[%s5768_s3 + $0x40] ss:$8 sps:$4 sm:$0xff]  }
 0x9de   : > { %v1712_v59 = vpop.f32.mrb[26].mxu1  ;;  %v6013_v54 = vld [vmem:[#allocation2 + $0x8] sm:$0xff]  ;;  %v4534_v58 = vld [vmem:[%s5770_s13 + $0x48] sm:$0xff]  }
 0x9df   : > { %4433 = vrot.lane.b32.xlu1 %v4432_v57, %s5209_s19  ;;  %v4083_v61 = vpop.f32.mrb[27].mxu1  ;;  %v2113_v56 = vpack.c.bf16 %v6013_v54, %v6011_v53  ;;  %v4533_v57 = vld [vmem:[%s5770_s13 + $0x40] sm:$0xff]   ;;  %v4535_v59 = vld [vmem:[%s5770_s13 + $0x50] sm:$0xff]  }
 0x9e0   : > { %v4537_v61 = vld [vmem:[%s5770_s13 + $0x60] sm:$0xff]  }
 0xa51   : > { %v4434_v10 = vpop.permute.xlu1 %4433 }
 0xa52   : > { %v4436_v3 = vunpack.i.h.bf16 %v4434_v10  ;;  %v4435_v11 = vunpack.i.l.bf16 %v4434_v10 }
 0xa54   : > { %v1724_v13 = vsel %vm1258_vm2, %v5918_v62, %v4436_v3  ;;  %v1723_v14 = vsel %vm1258_vm2, %v5914_v55, %v4435_v11  ;;  %v4492_v55 = vld [vmem:[%s5760_s12 + $0x50] ss:$12 sps:$4 sm:$0xff]   ;;  %v4496_v62 = vld [vmem:[%s5760_s12 + $0x68] ss:$12 sps:$4 sm:$0xff]  }
 0xa55   : > { %v1741_v16 = vpack.c.bf16 %v1724_v13, %v1723_v14 }
 0xa57   : > { %4101 = vmatmul.mubr.bf16.vlgmr.msra.gmra.mrb[12].mxu0 %v1741_v16 }
 0xa58   : > { %4105 = vmatpush3.bf16.msra.mxu0 %v4480_v15  ;;  %4120 = vmatprep.mubr.msk.bf16.mxu0 %vm5208_vm1, %v5206_v42 }
 0xa59   : > { %4106 = vmatprep.subr.bf16.mxu0 %v5206_v42 }
 0xa5c   : > { %4107 = vmatpush3.bf16.msra.mxu0 %v4484_v17 }
 0xa5d   : > { %4108 = vmatprep.subr.bf16.mxu0 %v5206_v42 }
 0xa60   : > { %4109 = vmatpush3.bf16.msra.mxu0 %v4488_v18 }
 0xa61   : > { %4110 = vmatprep.subr.bf16.mxu0 %v5206_v42 }
 0xa64   : > { %4111 = vmatpush3.bf16.msra.mxu0 %v4492_v55 }
 0xa65   : > { %4112 = vmatprep.subr.bf16.mxu0 %v5206_v42 }
 0xa68   : > { %4113 = vmatpush3.bf16.msra.mxu0 %v4496_v62 }
 0xa69   : > { %4114 = vmatprep.subr.bf16.mxu0 %v5206_v42 }
 0xa6c   : > { %4115 = vmatpush3.bf16.msra.mxu0 %v4500_v19 }
 0xa6d   : > { %4116 = vmatprep.subr.bf16.mxu0 %v5206_v42 }
 0xa70   : > { %4117 = vmatpush3.bf16.msra.mxu0 %v4504_v20 }
 0xa71   : > { %4118 = vmatprep.subr.bf16.mxu0 %v5206_v42 }
 0xa74   : > { %4119 = vmatpush3.bf16.msra.mxu0 %v4508_v22  ;;  %v2249_v22 = vrot.slane %v6037_v5, %v5858_v39 }
 0xa75   : > { %4124 = vmatprep.subr.bf16.mxu0 %v5206_v42 }
 0xa76   : > { %v2259_v26 = vrot.slane %v2249_v22, %v5838_v24  ;;  %v2428_v22 = vsub.s32 3, %v5835_v23 }
 0xb2a   : > { %v1828_v30 = vpop.f32.mrb[12].mxu0 }
 0xb2b   : > { %v4102_v31 = vpop.f32.mrb[13].mxu0  ;;  %v1829_v33 = vadd.f32 %v1828_v30, %v1745_v28 }
 0xb2c   : > { %v1831_v32 = vpop.f32.mrb[14].mxu0 }
 0xb2d   : > { %v1832_v63 = vadd.f32 %v1831_v32, %v1745_v28  ;;  %v4103_v34 = vpop.f32.mrb[15].mxu0 }
 0xb2f   : > { %v1900_v36 = vpack.c.bf16 %v1832_v63, %v1829_v33 }
 0xb31   : > { %2062 = vmatmul.mubr.bf16.vlgmr.msra.gmra.mrb[28].mxu1 %v1900_v36  ;;  %4121 = vmatmul.mubr.bf16.vlgmr.msra.gmra.mrb[16].mxu0 %v1900_v36 }
 0xb32   : > { %2195 = vmatpush1.bf16.msra.mxu1 %v4509_v35  ;;  %2226 = vmatprep.mubr.bf16.mxu1 %v5207_v4 }
 0xb33   : > { %2196 = vmatprep.subr.bf16.mxu1 %v4514_v37  ;;  %4140 = vmatprep.mubr.msk.bf16.mxu0 %vm5208_vm1, %v5206_v42 }
 0xb34   : > { %4125 = vmatpush3.bf16.msra.mxu0 %v4533_v57 }
 0xb35   : > { %4126 = vmatprep.subr.bf16.mxu0 %v5206_v42 }
 0xb36   : > { %2197 = vmatpush1.bf16.msra.mxu1 %v4512_v38 }
 0xb37   : > { %2198 = vmatprep.subr.bf16.mxu1 %v4517_v40 }
 0xb38   : > { %4127 = vmatpush3.bf16.msra.mxu0 %v4534_v58 }
 0xb39   : > { %4128 = vmatprep.subr.bf16.mxu0 %v5206_v42 }
 0xb3a   : > { %2199 = vmatpush1.bf16.msra.mxu1 %v4515_v41 }
 0xb3b   : > { %2200 = vmatprep.subr.bf16.mxu1 %v4520_v43 }
 0xb3c   : > { %4129 = vmatpush3.bf16.msra.mxu0 %v4535_v59 }
 0xb3d   : > { %4130 = vmatprep.subr.bf16.mxu0 %v5206_v42 }
 0xb3e   : > { %2201 = vmatpush1.bf16.msra.mxu1 %v4518_v44 }
 0xb3f   : > { %2202 = vmatprep.subr.bf16.mxu1 %v4523_v45 }
 0xb40   : > { %4131 = vmatpush3.bf16.msra.mxu0 %v4536_v60 }
 0xb41   : > { %4132 = vmatprep.subr.bf16.mxu0 %v5206_v42 }
 0xb42   : > { %2203 = vmatpush1.bf16.msra.mxu1 %v4521_v46 }
 0xb43   : > { %2204 = vmatprep.subr.bf16.mxu1 %v4526_v47 }
 0xb44   : > { %4133 = vmatpush3.bf16.msra.mxu0 %v4537_v61 }
 0xb45   : > { %4134 = vmatprep.subr.bf16.mxu0 %v5206_v42 }
 0xb46   : > { %2205 = vmatpush1.bf16.msra.mxu1 %v4524_v48 }
 0xb47   : > { %2206 = vmatprep.subr.bf16.mxu1 %v4529_v49 }
 0xb48   : > { %4135 = vmatpush3.bf16.msra.mxu0 %v4538_v0  ;;  %v4542_v0 = vld [vmem:[%s5770_s13 + $0xc8] sm:$0xff]  }
 0xb49   : > { %4136 = vmatprep.subr.bf16.mxu0 %v5206_v42 }
 0xb4a   : > { %2207 = vmatpush1.bf16.msra.mxu1 %v4527_v50 }
 0xb4b   : > { %2208 = vmatprep.subr.bf16.mxu1 %v4532_v51 }
 0xb4c   : > { %4137 = vmatpush3.bf16.msra.mxu0 %v4539_v1  ;;  %v4543_v1 = vld [vmem:[%s5770_s13 + $0xd0] sm:$0xff]  }
 0xb4d   : > { %4138 = vmatprep.subr.bf16.mxu0 %v5206_v42 }
 0xb4e   : > { %2209 = vmatpush1.bf16.msra.mxu1 %v4530_v52  ;;  %v4541_v52 = vld [vmem:[%s5770_s13 + $0xc0] sm:$0xff]  }
 0xb4f   : > { %4144 = vmatprep.subr.bf16.mxu1 %v5206_v42 }
 0xb50   : > { %4139 = vmatpush3.bf16.msra.mxu0 %v4540_v2  ;;  %v4544_v2 = vld [vmem:[%s5770_s13 + $0xd8] sm:$0xff]  }
 0xb51   : > { %2227 = vmatmul.mubr.bf16.vlgmr.msra.gmra.mrb[28].mxu1 %v2113_v56  ;;  %4164 = vmatprep.subr.bf16.mxu0 %v5206_v42 }
 0xb52   : > { %4160 = vmatprep.mubr.msk.bf16.mxu1 %vm5208_vm1, %v5206_v42  ;;  %4145 = vmatpush3.bf16.msra.mxu1 %v4541_v52 }
 0xb53   : > { %4146 = vmatprep.subr.bf16.mxu1 %v5206_v42 }
 0xb56   : > { %4147 = vmatpush3.bf16.msra.mxu1 %v4542_v0 }
 0xb57   : > { %4148 = vmatprep.subr.bf16.mxu1 %v5206_v42 }
 0xb5a   : > { %4149 = vmatpush3.bf16.msra.mxu1 %v4543_v1 }
 0xb5b   : > { %4150 = vmatprep.subr.bf16.mxu1 %v5206_v42 }
 0xb5e   : > { %4151 = vmatpush3.bf16.msra.mxu1 %v4544_v2 }
 0xb5f   : > { %4152 = vmatprep.subr.bf16.mxu1 %v5206_v42 }
 0xb62   : > { %4153 = vmatpush3.bf16.msra.mxu1 %v4545_v6 }
 0xb63   : > { %4154 = vmatprep.subr.bf16.mxu1 %v5206_v42 }
 0xc24   : > { %v2228_v8 = vpop.f32.mrb[28].mxu1 }
 0xc25   : > { %v2260_v9 = vadd.f32 %v2255_v7, %v2228_v8  ;;  %v2230_v10 = vpop.f32.mrb[29].mxu1  ;;  %v4547_v8 = vld [vmem:[%s5770_s13 + $0xf0] sm:$0xff]  }
 0xc26   : > { %v2232_v3 = vpop.f32.mrb[30].mxu1  ;;  %v2261_v27 = vadd.f32 %v2259_v26, %v2230_v10 }
 0xc27   : > { %v3709_v11 = vmul.f32 -1.442695, %v2260_v9  ;;  %v2262_v13 = vadd.f32 %v2255_v7, %v2232_v3  ;;  %v2234_v14 = vpop.f32.mrb[31].mxu1  ;;  %v4546_v7 = vld [vmem:[%s5770_s13 + $0xe8] sm:$0xff]   ;;  %v4548_v9 = vld [vmem:[%s5770_s13 + $0xf8] sm:$0xff]  }
 0xc28   : > { %v2263_v28 = vadd.f32 %v2259_v26, %v2234_v14  ;;  %v3710_v30 = vmul.f32 -1.442695, %v2261_v27  ;;  %4155 = vmatpush3.bf16.msra.mxu1 %v4546_v7 }
 0xc29   : > { %4641 = vpow2.f32 %v3709_v11  ;;  %v3711_v15 = vmul.f32 -1.442695, %v2262_v13  ;;  %4156 = vmatprep.subr.bf16.mxu1 %v5206_v42 }
 0xc2a   : > { %v3712_v31 = vmul.f32 -1.442695, %v2263_v28 }
 0xc2b   : > { %4643 = vpow2.f32 %v3711_v15 }
 0xc2c   : > { %4157 = vmatpush3.bf16.msra.mxu1 %v4547_v8 }
 0xc2d   : > { %4158 = vmatprep.subr.bf16.mxu1 %v5206_v42 }
 0xc30   : > { %4159 = vmatpush3.bf16.msra.mxu1 %v4548_v9 }
 0xc33   : > { %v4642_v16 = vpop.eup %4641 }
 0xc34   : > { %v2276_v17 = vadd.f32 1.0, %v4642_v16 }
 0xc35   : > { %v4644_v18 = vpop.eup %4643 }
 0xc36   : > { %4645 = vrcp.f32 %v2276_v17  ;;  %v2278_v55 = vadd.f32 1.0, %v4644_v18 }
 0xc38   : > { %4647 = vrcp.f32 %v2278_v55 }
 0xc39   : > { %4649 = vpow2.f32 %v3710_v30  ;;  %v2429_v30 = vrot.slane %v5841_v25, %v2428_v22 }
 0xc3a   : > { %4651 = vpow2.f32 %v3712_v31 }
 0xc40   : > { %v4646_v62 = vpop.eup %4645 }
 0xc41   : > { %v2288_v20 = vmul.f32 %v6011_v53, %v4646_v62 }
 0xc42   : > { %v4648_v19 = vpop.eup %4647 }
 0xc43   : > { %v2289_v12 = vmul.f32 %v6013_v54, %v4648_v19  ;;  %v4650_v32 = vpop.eup %4649 }
 0xc44   : > { %v4652_v33 = vpop.eup %4651  ;;  %v2277_v63 = vadd.f32 1.0, %v4650_v32 }
 0xc45   : > { %v2290_v21 = vpack.c.bf16 %v2289_v12, %v2288_v20  ;;  %v2279_v34 = vadd.f32 1.0, %v4652_v33  ;;  %v2423_v12 = vrot.slane %v5841_v25, %v5858_v39  ;;  %v4549_v39 = vld [vmem:[%s5770_s13 + $0x100] sm:$0xff]  }
 0xc46   : > { %4653 = vrcp.f32 %v2277_v63 }
 0xc47   : > { %4141 = vmatmul.mubr.bf16.vlgmr.msra.gmra.mrb[16].mxu0 %v2290_v21  ;;  %4655 = vrcp.f32 %v2279_v34  ;;  %v4550_v34 = vld [vmem:[%s5770_s13 + $0x108] sm:$0xff]  }
 0xc48   : > { %4180 = vmatprep.mubr.msk.bf16.mxu0 %vm5208_vm1, %v5206_v42  ;;  %4165 = vmatpush3.bf16.msra.mxu0 %v4549_v39  ;;  %v4587_v39 = vld [vmem:[%s5760_s12 + $0x16c] ss:$12 sps:$4 sm:$0xff]  }
 0xc49   : > { %4166 = vmatprep.subr.bf16.mxu0 %v5206_v42 }
 0xc4c   : > { %4167 = vmatpush3.bf16.msra.mxu0 %v4550_v34  ;;  %v4585_v34 = vld [vmem:[%s5760_s12 + $0x168] ss:$12 sps:$4 sm:$0xff]  }
 0xc4d   : > { %4168 = vmatprep.subr.bf16.mxu0 %v5206_v42 }
 0xc50   : > { %v4654_v24 = vpop.eup %4653 }
 0xc51   : > { %v4656_v40 = vpop.eup %4655  ;;  %v2384_v41 = vsub.f32 1.0, %v4654_v24 }
 0xc52   : > { %v2385_v43 = vsub.f32 1.0, %v4656_v40 }
 0xc53   : > { %v2386_v46 = vmul.f32 %v6011_v53, %v2384_v41  ;;  %v2452_v41 = vsub.s32 5, %v5835_v23 }
 0xc54   : > { %v2387_v50 = vmul.f32 %v6013_v54, %v2385_v43 }
 0xc55   : > { %v2453_v43 = vrot.slane %v5841_v25, %v2452_v41 }
 0xd1a   : > { %v2373_v35 = vpop.f32.mrb[16].mxu0 }
 0xd1b   : > { %4657 = vtanh.f32 %v2373_v35  ;;  %v4142_v36 = vpop.f32.mrb[17].mxu0  ;;  %v4551_v35 = vld [vmem:[%s5770_s13 + $0x110] sm:$0xff]  }
 0xd1c   : > { %v2376_v37 = vpop.f32.mrb[18].mxu0  ;;  %4169 = vmatpush3.bf16.msra.mxu0 %v4551_v35  ;;  %v4552_v36 = vld [vmem:[%s5770_s13 + $0x118] sm:$0xff]  }
 0xd1d   : > { %4659 = vtanh.f32 %v2376_v37  ;;  %v4143_v38 = vpop.f32.mrb[19].mxu0  ;;  %4170 = vmatprep.subr.bf16.mxu0 %v5206_v42  ;;  %v4553_v37 = vld [vmem:[%s5770_s13 + $0x120] sm:$0xff]   ;;  %v4588_v35 = vld [vmem:[%s5760_s12 + $0x170] ss:$12 sps:$4 sm:$0xff]  }
 0xd1e   : > { %v4554_v38 = vld [vmem:[%s5770_s13 + $0x128] sm:$0xff]  }
 0xd20   : > { %4171 = vmatpush3.bf16.msra.mxu0 %v4552_v36  ;;  %v4591_v36 = vld [vmem:[%s5768_s3 + $0x84] ss:$8 sps:$4 sm:$0xff]  }
 0xd21   : > { %4172 = vmatprep.subr.bf16.mxu0 %v5206_v42 }
 0xd24   : > { %4173 = vmatpush3.bf16.msra.mxu0 %v4553_v37  ;;  %v2581_v37 = vsub.s32 6, %v5835_v23 }
 0xd25   : > { %v4658_v44 = vpop.eup %4657  ;;  %4174 = vmatprep.subr.bf16.mxu0 %v5206_v42 }
 0xd26   : > { %v2388_v45 = vmul.f32 %v4658_v44, %v4654_v24  ;;  %v4555_v24 = vld [vmem:[%s5770_s13 + $0x130] sm:$0xff]  }
 0xd27   : > { %v4660_v47 = vpop.eup %4659 }
 0xd28   : > { %v2389_v48 = vmul.f32 %v4660_v47, %v4656_v40  ;;  %v6050_v49 = vadd.f32 %v2388_v45, %v2386_v46  ;;  %4175 = vmatpush3.bf16.msra.mxu0 %v4554_v38  ;;  %v4556_v40 = vld [vmem:[%s5770_s13 + $0x138] sm:$0xff]   ;;  %v4695_v38 = vld [vmem:[%s5781_s1] sm:$0x7f] }
 0xd29   : > { %4176 = vmatprep.subr.bf16.mxu0 %v5206_v42 }
 0xd2a   : > { %2392 = vadd.xlane.f32.xlu1 %v6050_v49  ;;  %v6054_v51 = vadd.f32 %v2389_v48, %v2387_v50 }
 0xd2c   : > { %2394 = vadd.xlane.f32.xlu0 %v6054_v51  ;;  %4177 = vmatpush3.bf16.msra.mxu0 %v4555_v24  ;;  %v2582_v24 = vrot.slane %v4695_v38, %v2581_v37 }
 0xd2d   : > { %4178 = vmatprep.subr.bf16.mxu0 %v5206_v42 }
 0xd30   : > { %4179 = vmatpush3.bf16.msra.mxu0 %v4556_v40 }
 0xd31   : > { %4184 = vmatprep.subr.bf16.mxu0 %v5206_v42 }
 0xdb7   : > { %v2393_v56 = vpop.xlane.xlu1 %2392 }
 0xdb8   : > { %v2396_v53 = vmul.f32 0.03125, %v2393_v56 }
 0xdb9   : > { %v2395_v57 = vpop.xlane.xlu0 %2394 }
 0xdba   : > { %v2398_v58 = vsub.f32 %v6050_v49, %v2396_v53  ;;  %v2397_v54 = vmul.f32 0.03125, %v2395_v57  ;;  %v2406_v10 = vmul.f32 %v2396_v53, %v2396_v53 }
 0xdbc   : > { %v2399_v59 = vsub.f32 %v6054_v51, %v2397_v54  ;;  %v2400_v60 = vmul.f32 %v2398_v58, %v2398_v58  ;;  %v2408_v3 = vmul.f32 96.0, %v2406_v10  ;;  %v2407_v11 = vmul.f32 %v2397_v54, %v2397_v54 }
 0xdbe   : > { %2402 = vadd.xlane.f32.xlu0 %v2400_v60  ;;  %v2401_v61 = vmul.f32 %v2399_v59, %v2399_v59  ;;  %v2409_v16 = vmul.f32 96.0, %v2407_v11  ;;  %v4559_v11 = vld [vmem:[%s5760_s12 + $0xc4] ss:$12 sps:$4 sm:$0xff]  }
 0xdbf   : > { %2886 = vmatprep.subr.bf16.mxu1 %v4559_v11  ;;  %v4597_v11 = vld [vmem:[%s5768_s3 + $0xa4] ss:$8 sps:$4 sm:$0xff]  }
 0xdc2   : > { %2404 = vadd.xlane.f32.xlu0 %v2401_v61 }
 0xe4b   : > { %v2403_v13 = vpop.xlane.xlu0 %2402 }
 0xe4c   : > { %v2410_v14 = vsub.f32 %v2403_v13, %v2408_v3  ;;  %v4557_v13 = vld [vmem:[%s5760_s12 + $0xc0] ss:$12 sps:$4 sm:$0xff]  }
 0xe4e   : > { %v2412_v15 = vmul.f32 0.03125, %v2410_v14  ;;  %v4560_v14 = vld [vmem:[%s5760_s12 + $0xc8] ss:$12 sps:$4 sm:$0xff]  }
 0xe4f   : > { %v2405_v17 = vpop.xlane.xlu0 %2404 }
 0xe50   : > { %v2414_v18 = vadd.f32 1e-05, %v2412_v15  ;;  %v2411_v55 = vsub.f32 %v2405_v17, %v2409_v16  ;;  %v4563_v15 = vld [vmem:[%s5760_s12 + $0xdc] ss:$12 sps:$4 sm:$0xff]   ;;  %v4561_v16 = vld [vmem:[%s5760_s12 + $0xd8] ss:$12 sps:$4 sm:$0xff]  }
 0xe51   : > { %v4564_v17 = vld [vmem:[%s5760_s12 + $0xe0] ss:$12 sps:$4 sm:$0xff]  }
 0xe52   : > { %4661 = vrsqrt.f32 %v2414_v18  ;;  %v2413_v62 = vmul.f32 0.03125, %v2411_v55  ;;  %v4567_v18 = vld [vmem:[%s5760_s12 + $0xf4] ss:$12 sps:$4 sm:$0xff]   ;;  %v4565_v55 = vld [vmem:[%s5760_s12 + $0xf0] ss:$12 sps:$4 sm:$0xff]  }
 0xe54   : > { %v2415_v19 = vadd.f32 1e-05, %v2413_v62  ;;  %v4568_v62 = vld [vmem:[%s5760_s12 + $0xf8] ss:$12 sps:$4 sm:$0xff]  }
 0xe56   : > { %4663 = vrsqrt.f32 %v2415_v19  ;;  %v4571_v19 = vld [vmem:[%s5760_s12 + $0x10c] ss:$12 sps:$4 sm:$0xff]  }
 0xe5c   : > { %v4662_v20 = vpop.eup %4661 }
 0xe5d   : > { %v2418_v21 = vmul.f32 %v4662_v20, %v2398_v58  ;;  %v4569_v20 = vld [vmem:[%s5760_s12 + $0x108] ss:$12 sps:$4 sm:$0xff]  }
 0xe5f   : > { %v2424_v28 = vmul.f32 %v2423_v12, %v2418_v21  ;;  %v4575_v21 = vld [vmem:[%s5760_s12 + $0x124] ss:$12 sps:$4 sm:$0xff]  }
 0xe60   : > { %v4664_v26 = vpop.eup %4663 }
 0xe61   : > { %v2419_v27 = vmul.f32 %v4664_v26, %v2399_v59  ;;  %v2430_v32 = vadd.f32 %v2429_v30, %v2424_v28  ;;  %v4573_v26 = vld [vmem:[%s5760_s12 + $0x120] ss:$12 sps:$4 sm:$0xff]   ;;  %v4579_v28 = vld [vmem:[%s5760_s12 + $0x13c] ss:$12 sps:$4 sm:$0xff]  }
 0xe63   : > { %v2425_v31 = vmul.f32 %v2423_v12, %v2419_v27  ;;  %v4572_v12 = vld [vmem:[%s5760_s12 + $0x110] ss:$12 sps:$4 sm:$0xff]   ;;  %v4576_v27 = vld [vmem:[%s5760_s12 + $0x128] ss:$12 sps:$4 sm:$0xff]  }
 0xe65   : > { %v2431_v33 = vadd.f32 %v2429_v30, %v2425_v31  ;;  %v4577_v30 = vld [vmem:[%s5760_s12 + $0x138] ss:$12 sps:$4 sm:$0xff]   ;;  %v4580_v31 = vld [vmem:[%s5760_s12 + $0x140] ss:$12 sps:$4 sm:$0xff]  }
 0xe67   : > { %v2449_v63 = vpack.c.bf16 %v2431_v33, %v2430_v32  ;;  %v4583_v32 = vld [vmem:[%s5760_s12 + $0x154] ss:$12 sps:$4 sm:$0xff]   ;;  %v4581_v33 = vld [vmem:[%s5760_s12 + $0x150] ss:$12 sps:$4 sm:$0xff]  }
 0xe69   : > { %4161 = vmatmul.mubr.bf16.vlgmr.msra.gmra.mrb[32].mxu1 %v2449_v63  ;;  %v4584_v63 = vld [vmem:[%s5760_s12 + $0x158] ss:$12 sps:$4 sm:$0xff]  }
 0xe6a   : > { %2918 = vmatprep.mubr.bf16.mxu1 %v5207_v4  ;;  %2887 = vmatpush1.bf16.msra.mxu1 %v4557_v13  ;;  %v4595_v13 = vld [vmem:[%s5768_s3 + $0xa0] ss:$8 sps:$4 sm:$0xff]  }
 0xe6b   : > { %2888 = vmatprep.subr.bf16.mxu1 %v4563_v15  ;;  %v4598_v15 = vld [vmem:[%s5768_s3 + $0xb0] ss:$8 sps:$4 sm:$0xff]  }
 0xe6e   : > { %2889 = vmatpush1.bf16.msra.mxu1 %v4561_v16  ;;  %v4603_v16 = vld [vmem:[%s5768_s3 + $0xc4] ss:$8 sps:$4 sm:$0xff]  }
 0xe6f   : > { %2890 = vmatprep.subr.bf16.mxu1 %v4567_v18  ;;  %v4604_v18 = vld [vmem:[%s5768_s3 + $0xd0] ss:$8 sps:$4 sm:$0xff]  }
 0xe72   : > { %2891 = vmatpush1.bf16.msra.mxu1 %v4565_v55  ;;  %v4609_v55 = vld [vmem:[%s5768_s3 + $0xe4] ss:$8 sps:$4 sm:$0xff]  }
 0xe73   : > { %2892 = vmatprep.subr.bf16.mxu1 %v4571_v19  ;;  %v4612_v19 = vld [vmem:[%s5768_s3 + $0xf4] ss:$8 sps:$4 sm:$0xff]  }
 0xe76   : > { %2893 = vmatpush1.bf16.msra.mxu1 %v4569_v20  ;;  %v4610_v20 = vld [vmem:[%s5768_s3 + $0xf0] ss:$8 sps:$4 sm:$0xff]  }
 0xe77   : > { %2894 = vmatprep.subr.bf16.mxu1 %v4575_v21  ;;  %v4613_v21 = vld [vmem:[%s5770_s13 + $0x80] sm:$0xff]  }
 0xe7a   : > { %2895 = vmatpush1.bf16.msra.mxu1 %v4573_v26  ;;  %v4614_v26 = vld [vmem:[%s5770_s13 + $0x88] sm:$0xff]  }
 0xe7b   : > { %2896 = vmatprep.subr.bf16.mxu1 %v4579_v28  ;;  %v4616_v28 = vld [vmem:[%s5770_s13 + $0x98] sm:$0xff]  }
 0xe7e   : > { %2897 = vmatpush1.bf16.msra.mxu1 %v4577_v30  ;;  %v4617_v30 = vld [vmem:[%s5770_s13 + $0xa0] sm:$0xff]  }
 0xe7f   : > { %2898 = vmatprep.subr.bf16.mxu1 %v4583_v32  ;;  %v4619_v32 = vld [vmem:[%s5770_s13 + $0xb0] sm:$0xff]  }
 0xe82   : > { %2899 = vmatpush1.bf16.msra.mxu1 %v4581_v33  ;;  %v4620_v33 = vld [vmem:[%s5770_s13 + $0xb8] sm:$0xff]  }
 0xe83   : > { %2900 = vmatprep.subr.bf16.mxu1 %v4587_v39 }
 0xe86   : > { %2901 = vmatpush1.bf16.msra.mxu1 %v4585_v34 }
 0xe87   : > { %3051 = vmatprep.subr.bf16.mxu1 %v4591_v36 }
 0xf3c   : > { %v2536_v44 = vpop.f32.mrb[32].mxu1 }
 0xf3d   : > { %v2537_v45 = vadd.f32 %v2536_v44, %v2453_v43  ;;  %v4162_v46 = vpop.f32.mrb[33].mxu1 }
 0xf3e   : > { %v2539_v47 = vpop.f32.mrb[34].mxu1 }
 0xf3f   : > { %v2543_v48 = vmul.f32 %v2537_v45, %v2537_v45  ;;  %v2540_v50 = vadd.f32 %v2539_v47, %v2453_v43  ;;  %v4163_v52 = vpop.f32.mrb[35].mxu1 }
 0xf41   : > { %v2545_v56 = vmul.f32 %v2543_v48, %v2537_v45  ;;  %v2544_v53 = vmul.f32 %v2540_v50, %v2540_v50 }
 0xf43   : > { %v2547_v57 = vmul.f32 0.044715, %v2545_v56  ;;  %v2546_v58 = vmul.f32 %v2544_v53, %v2540_v50 }
 0xf45   : > { %v2549_v54 = vadd.f32 %v2547_v57, %v2537_v45  ;;  %v2548_v59 = vmul.f32 0.044715, %v2546_v58 }
 0xf47   : > { %v2551_v60 = vmul.f32 0.7978846, %v2549_v54  ;;  %v2550_v61 = vadd.f32 %v2548_v59, %v2540_v50 }
 0xf49   : > { %4665 = vtanh.f32 %v2551_v60  ;;  %v2552_v0 = vmul.f32 0.7978846, %v2550_v61 }
 0xf4b   : > { %4667 = vtanh.f32 %v2552_v0 }
 0xf53   : > { %v4666_v25 = vpop.eup %4665 }
 0xf54   : > { %v2555_v1 = vadd.f32 1.0, %v4666_v25 }
 0xf55   : > { %v4668_v2 = vpop.eup %4667 }
 0xf56   : > { %v2557_v6 = vmul.f32 0.5, %v2555_v1  ;;  %v2556_v7 = vadd.f32 1.0, %v4668_v2 }
 0xf58   : > { %v2558_v8 = vmul.f32 0.5, %v2556_v7  ;;  %v2559_v9 = vmul.f32 %v2557_v6, %v2537_v45 }
 0xf5a   : > { %v2560_v10 = vmul.f32 %v2558_v8, %v2540_v50  ;;  %v4589_v8 = vld [vmem:[%s5768_s3 + $0x80] ss:$8 sps:$4 sm:$0xff]  }
 0xf5c   : > { %v2578_v3 = vpack.c.bf16 %v2560_v10, %v2559_v9  ;;  %v4594_v10 = vld [vmem:[%s5768_s3 + $0x94] ss:$8 sps:$4 sm:$0xff]  }
 0xf5e   : > { %4181 = vmatmul.mubr.bf16.vlgmr.msra.gmra.mrb[20].mxu0 %v2578_v3  ;;  %v4592_v3 = vld [vmem:[%s5768_s3 + $0x90] ss:$8 sps:$4 sm:$0xff]  }
 0xf5f   : > { %4200 = vmatprep.mubr.msk.bf16.mxu0 %vm5208_vm1, %v5206_v42  ;;  %4185 = vmatpush3.bf16.msra.mxu0 %v4560_v14  ;;  %v4600_v14 = vld [vmem:[%s5768_s3 + $0xb4] ss:$8 sps:$4 sm:$0xff]  }
 0xf60   : > { %4186 = vmatprep.subr.bf16.mxu0 %v5206_v42 }
 0xf63   : > { %4187 = vmatpush3.bf16.msra.mxu0 %v4564_v17  ;;  %v4606_v17 = vld [vmem:[%s5768_s3 + $0xd4] ss:$8 sps:$4 sm:$0xff]  }
 0xf64   : > { %4188 = vmatprep.subr.bf16.mxu0 %v5206_v42 }
 0xf67   : > { %4189 = vmatpush3.bf16.msra.mxu0 %v4568_v62  ;;  %v4607_v62 = vld [vmem:[%s5768_s3 + $0xe0] ss:$8 sps:$4 sm:$0xff]  }
 0xf68   : > { %4190 = vmatprep.subr.bf16.mxu0 %v5206_v42 }
 0xf6b   : > { %4191 = vmatpush3.bf16.msra.mxu0 %v4572_v12  ;;  %v2970_v12 = vpack.c.bf16 %v6054_v51, %v6050_v49 }
 0xf6c   : > { %4192 = vmatprep.subr.bf16.mxu0 %v5206_v42 }
 0xf6f   : > { %4193 = vmatpush3.bf16.msra.mxu0 %v4576_v27  ;;  %v4615_v27 = vld [vmem:[%s5770_s13 + $0x90] sm:$0xff]  }
 0xf70   : > { %4194 = vmatprep.subr.bf16.mxu0 %v5206_v42 }
 0xf73   : > { %4195 = vmatpush3.bf16.msra.mxu0 %v4580_v31  ;;  %v4618_v31 = vld [vmem:[%s5770_s13 + $0xa8] sm:$0xff]  }
 0xf74   : > { %4196 = vmatprep.subr.bf16.mxu0 %v5206_v42 }
 0xf77   : > { %4197 = vmatpush3.bf16.msra.mxu0 %v4584_v63  ;;  %v3101_v63 = vrot.slane %v6037_v5, %v5847_v29 }
 0xf78   : > { %4198 = vmatprep.subr.bf16.mxu0 %v5206_v42 }
 0xf79   : > { %v3111_v39 = vrot.slane %v3101_v63, %v5847_v29 }
 0xf7b   : > { %4199 = vmatpush3.bf16.msra.mxu0 %v4588_v35 }
 0xf7c   : > { %4204 = vmatprep.subr.bf16.mxu0 %v5206_v42 }
0x1031   : > { %v2665_v40 = vpop.f32.mrb[20].mxu0 }
0x1032   : > { %v2666_v41 = vadd.f32 %v2665_v40, %v2582_v24  ;;  %v4182_v43 = vpop.f32.mrb[21].mxu0 }
0x1033   : > { %v2668_v44 = vpop.f32.mrb[22].mxu0 }
0x1034   : > { %v2672_v45 = vmul.f32 %v2666_v41, %v2666_v41  ;;  %v2669_v46 = vadd.f32 %v2668_v44, %v2582_v24  ;;  %v4183_v47 = vpop.f32.mrb[23].mxu0 }
0x1036   : > { %v2674_v48 = vmul.f32 %v2672_v45, %v2666_v41  ;;  %v2673_v50 = vmul.f32 %v2669_v46, %v2669_v46 }
0x1038   : > { %v2676_v52 = vmul.f32 0.044715, %v2674_v48  ;;  %v2675_v56 = vmul.f32 %v2673_v50, %v2669_v46 }
0x103a   : > { %v2678_v53 = vadd.f32 %v2676_v52, %v2666_v41  ;;  %v2677_v57 = vmul.f32 0.044715, %v2675_v56  ;;  %v938_v56 = vld [vmem:[#allocation2] sm:$0xff] }
0x103c   : > { %v2680_v58 = vmul.f32 0.7978846, %v2678_v53  ;;  %v2679_v54 = vadd.f32 %v2677_v57, %v2669_v46  ;;  %v939_v53 = vld [vmem:[#allocation2 + $0x8] sm:$0xff] }
0x103d   : > { %v3897_v57 = vpack.c.bf16 %v939_v53, %v938_v56 }
0x103e   : > { %4669 = vtanh.f32 %v2680_v58  ;;  %v2681_v59 = vmul.f32 0.7978846, %v2679_v54  ;;  %v3105_v58 = vrot.slane %v6037_v5, %v2428_v22 }
0x103f   : > { %3898 = vst [vmem:[%s5787_s20] sm:$0xff] %v3897_v57  }
0x1040   : > { %4671 = vtanh.f32 %v2681_v59  ;;  %v3115_v54 = vrot.slane %v3105_v58, %v5847_v29 }
0x1048   : > { %v4670_v60 = vpop.eup %4669 }
0x1049   : > { %v2684_v61 = vadd.f32 1.0, %v4670_v60 }
0x104a   : > { %v4672_v0 = vpop.eup %4671 }
0x104b   : > { %v2686_v25 = vmul.f32 0.5, %v2684_v61  ;;  %v2685_v1 = vadd.f32 1.0, %v4672_v0 }
0x104d   : > { %v2687_v2 = vmul.f32 0.5, %v2685_v1  ;;  %v2688_v6 = vmul.f32 %v2686_v25, %v2666_v41 }
0x104f   : > { %v2689_v7 = vmul.f32 %v2687_v2, %v2669_v46 }
0x1051   : > { %v2757_v9 = vpack.c.bf16 %v2689_v7, %v2688_v6 }
0x1053   : > { %2919 = vmatmul.mubr.bf16.vlgmr.msra.gmra.mrb[36].mxu1 %v2757_v9  ;;  %4201 = vmatmul.mubr.bf16.vlgmr.msra.gmra.mrb[24].mxu0 %v2757_v9 }
0x1054   : > { %3052 = vmatpush1.bf16.msra.mxu1 %v4589_v8  ;;  %3083 = vmatprep.mubr.bf16.mxu1 %v5207_v4  ;;  %v4601_v4 = vld [vmem:[%s5768_s3 + $0xc0] ss:$8 sps:$4 sm:$0xff]  }
0x1055   : > { %3053 = vmatprep.subr.bf16.mxu1 %v4594_v10  ;;  %4220 = vmatprep.mubr.msk.bf16.mxu0 %vm5208_vm1, %v5206_v42 }
0x1056   : > { %4205 = vmatpush3.bf16.msra.mxu0 %v4613_v21 }
0x1057   : > { %4206 = vmatprep.subr.bf16.mxu0 %v5206_v42 }
0x1058   : > { %3054 = vmatpush1.bf16.msra.mxu1 %v4592_v3 }
0x1059   : > { %3055 = vmatprep.subr.bf16.mxu1 %v4597_v11 }
0x105a   : > { %4207 = vmatpush3.bf16.msra.mxu0 %v4614_v26 }
0x105b   : > { %4208 = vmatprep.subr.bf16.mxu0 %v5206_v42 }
0x105c   : > { %3056 = vmatpush1.bf16.msra.mxu1 %v4595_v13 }
0x105d   : > { %3057 = vmatprep.subr.bf16.mxu1 %v4600_v14 }
0x105e   : > { %4209 = vmatpush3.bf16.msra.mxu0 %v4615_v27 }
0x105f   : > { %4210 = vmatprep.subr.bf16.mxu0 %v5206_v42 }
0x1060   : > { %3058 = vmatpush1.bf16.msra.mxu1 %v4598_v15 }
0x1061   : > { %3059 = vmatprep.subr.bf16.mxu1 %v4603_v16 }
0x1062   : > { %4211 = vmatpush3.bf16.msra.mxu0 %v4616_v28 }
0x1063   : > { %4212 = vmatprep.subr.bf16.mxu0 %v5206_v42 }
0x1064   : > { %3060 = vmatpush1.bf16.msra.mxu1 %v4601_v4 }
0x1065   : > { %3061 = vmatprep.subr.bf16.mxu1 %v4606_v17 }
0x1066   : > { %4213 = vmatpush3.bf16.msra.mxu0 %v4617_v30 }
0x1067   : > { %4214 = vmatprep.subr.bf16.mxu0 %v5206_v42 }
0x1068   : > { %3062 = vmatpush1.bf16.msra.mxu1 %v4604_v18 }
0x1069   : > { %3063 = vmatprep.subr.bf16.mxu1 %v4609_v55 }
0x106a   : > { %4215 = vmatpush3.bf16.msra.mxu0 %v4618_v31 }
0x106b   : > { %4216 = vmatprep.subr.bf16.mxu0 %v5206_v42 }
0x106c   : > { %3064 = vmatpush1.bf16.msra.mxu1 %v4607_v62 }
0x106d   : > { %3065 = vmatprep.subr.bf16.mxu1 %v4612_v19 }
0x106e   : > { %4217 = vmatpush3.bf16.msra.mxu0 %v4619_v32 }
0x106f   : > { %4218 = vmatprep.subr.bf16.mxu0 %v5206_v42 }
0x1070   : > { %3066 = vmatpush1.bf16.msra.mxu1 %v4610_v20 }
0x1072   : > { %4219 = vmatpush3.bf16.msra.mxu0 %v4620_v33 }
0x1073   : > { %3084 = vmatmul.mubr.bf16.vlgmr.msra.gmra.mrb[36].mxu1 %v2970_v12 }
0x1146   : > { %v3085_v34 = vpop.f32.mrb[36].mxu1 }
0x1147   : > { %v3116_v35 = vadd.f32 %v3111_v39, %v3085_v34  ;;  %v3087_v36 = vpop.f32.mrb[37].mxu1 }
0x1148   : > { %v3089_v37 = vpop.f32.mrb[38].mxu1  ;;  %v3117_v59 = vadd.f32 %v3115_v54, %v3087_v36 }
0x1149   : > { %v3873_v38 = vmul.f32 -1.442695, %v3116_v35  ;;  %v3118_v24 = vadd.f32 %v3111_v39, %v3089_v37  ;;  %v3091_v40 = vpop.f32.mrb[39].mxu1 }
0x114a   : > { %v3119_v60 = vadd.f32 %v3115_v54, %v3091_v40  ;;  %v3874_v61 = vmul.f32 -1.442695, %v3117_v59 }
0x114b   : > { %4673 = vpow2.f32 %v3873_v38  ;;  %v3875_v41 = vmul.f32 -1.442695, %v3118_v24 }
0x114c   : > { %v3876_v0 = vmul.f32 -1.442695, %v3119_v60 }
0x114d   : > { %4675 = vpow2.f32 %v3875_v41 }
0x1155   : > { %v4674_v43 = vpop.eup %4673 }
0x1156   : > { %v3132_v42 = vadd.f32 1.0, %v4674_v43 }
0x1157   : > { %v4676_v44 = vpop.eup %4675 }
0x1158   : > { %4677 = vrcp.f32 %v3132_v42  ;;  %v3134_v45 = vadd.f32 1.0, %v4676_v44 }
0x115a   : > { %4679 = vrcp.f32 %v3134_v45 }
0x115b   : > { %4681 = vpow2.f32 %v3874_v61 }
0x115c   : > { %4683 = vpow2.f32 %v3876_v0 }
0x1162   : > { %v4678_v46 = vpop.eup %4677 }
0x1163   : > { %v3144_v48 = vmul.f32 %v4678_v46, %v6050_v49 }
0x1164   : > { %v4680_v47 = vpop.eup %4679 }
0x1165   : > { %v3145_v50 = vmul.f32 %v4680_v47, %v6054_v51  ;;  %v4682_v25 = vpop.eup %4681 }
0x1166   : > { %v4684_v1 = vpop.eup %4683  ;;  %v3133_v2 = vadd.f32 1.0, %v4682_v25 }
0x1167   : > { %v3146_v52 = vpack.c.bf16 %v3145_v50, %v3144_v48  ;;  %v3135_v6 = vadd.f32 1.0, %v4684_v1 }
0x1168   : > { %4685 = vrcp.f32 %v3133_v2 }
0x1169   : > { %4221 = vmatmul.mubr.bf16.vlgmr.msra.gmra.mrb[24].mxu0 %v3146_v52  ;;  %4687 = vrcp.f32 %v3135_v6 }
0x1172   : > { %v4686_v22 = vpop.eup %4685 }
0x1173   : > { %v4688_v29 = vpop.eup %4687  ;;  %v3240_v9 = vsub.f32 1.0, %v4686_v22 }
0x1174   : > { %v3241_v10 = vsub.f32 1.0, %v4688_v29 }
0x1175   : > { %v3242_v11 = vmul.f32 %v3240_v9, %v6050_v49 }
0x1176   : > { %v3243_v16 = vmul.f32 %v3241_v10, %v6054_v51 }
0x123c   : > { %v3229_v7 = vpop.f32.mrb[24].mxu0 }
0x123d   : > { %4689 = vtanh.f32 %v3229_v7  ;;  %v4222_v8 = vpop.f32.mrb[25].mxu0 }
0x123e   : > { %v3232_v23 = vpop.f32.mrb[26].mxu0 }
0x123f   : > { %4691 = vtanh.f32 %v3232_v23  ;;  %v4223_v5 = vpop.f32.mrb[27].mxu0 }
0x1247   : > { %v4690_v3 = vpop.eup %4689 }
0x1248   : > { %v3244_v13 = vmul.f32 %v4690_v3, %v4686_v22  ;;  %3253 = sbr.rel (%p3885_p8) target bundleno = 4687 (0x124f), region = 124 }
0x1249   : > { %v4692_v14 = vpop.eup %4691 }
0x124a   : > { %v3246_v15 = vadd.f32 %v3244_v13, %v3242_v11  ;;  %v3245_v4 = vmul.f32 %v4692_v14, %v4688_v29 }
0x124c   : > { %3248 = vst [vmem:[#allocation2] sm:$0xff] %v3246_v15  ;;  %v3247_v17 = vadd.f32 %v3245_v4, %v3243_v16  ;;  %3254 = vst [vmem:[#allocation23] sm:$0xff] (!%p3885_p8), %v3246_v15 }
0x124e   : > { %3249 = vst [vmem:[#allocation2 + $0x8] sm:$0xff] %v3247_v17  ;;  %3255 = vst [vmem:[#allocation23 + $0x8] sm:$0xff] (!%p3885_p8), %v3247_v17 }
0x124f PF: > { %s5210_s18 = smov [#allocation23]   ;;  %s6367_s30 = sld [smem:[#allocation40_spill]] }
0x1250   : > { %s3270_s27 = sshll.u32 %s5210_s18, 4  ;;  %s3271_s27 = int_to_ptr.vmem [resolvable:$true] %s3270_s27 }
0x1251   : > { %s5046_s28 = scalar_lea.vmem %s3271_s27, 256  ;;  %p5053_p13 = scmp.lt.s32.totalorder %s3271_s27, %s3271_s27 }
0x1252   : > { %p5047_p7 = scmp.ne.s32.totalorder %s3271_s27, %s5046_s28  ;;  %p5054_p6 = scmp.lt.s32.totalorder %s5046_s28, %s5046_s28 }
0x1254   : > { %p5055_p0 = por %p5054_p6, %p5053_p13 }
0x1255   : > { %p6368_p4 = scmp.eq.s32.totalorder %s6367_s30, 1 }
0x1257   : > { %p5048_p5 = pnand %p5047_p7, %p6368_p4 }
0x1259   : > { %p5049_p10 = pneg %p5048_p5 }
0x125b   : > { %p5056_p12 = pnand %p5055_p0, %p5049_p10 }
0x125d   : > { %5059 = shalt.err (!%p5056_p12)
}
0x125e   : > { %s6369_s12 = sld [smem:[#allocation51_spill]]  ;;  %p6370_p9 = pmov %p6368_p4 }
0x1264   : > { %s5060_s15 = scalar_lea.hbm %s6369_s12, 256 }
0x1265   : > { %p5061_p1 = scmp.ne.s32.totalorder %s6369_s12, %s5060_s15  ;;  %p5066_p11 = scmp.lt.u32.totalorder %s5060_s15, %s6369_s12 }
0x1267   : > { %p5062_p3 = pnand %p5061_p1, %p6370_p9 }
0x1269   : > { %p5063_p2 = pneg %p5062_p3 }
0x126b   : > { %p5068_p8 = pnand %p5066_p11, %p5063_p2 }
0x126d   : > { %5071 = shalt.err (!%p5068_p8)
}
0x126e   : > { %s5211_s23 = smov 128   ;;  %s6371_s21 = sld [smem:[#allocation38_spill]] }
0x126f   : > { %s6372_s16 = sld [smem:[#allocation42_spill]]  ;;  %s5212_s17 = smov 8  }
0x1270   : > { %p6373_p7 = pmov %p6368_p4  ;;  %s6374_s25 = sld [smem:[#allocation52_spill]] }
0x1271   : > { %s3288_s5 = sshll.u32 %s5787_s20, 4  ;;  %s3257_s3 = scalar_lea.sflag [#allocation25], %s5747_s14  ;;  %s6211_s5 = int_to_ptr.vmem [resolvable:$true] %s3288_s5 }
0x1272   : > { %4287 = dma.vmem_to_hbm [thread:$0]  (%p6373_p7), %s3271_s27, 256, %s6369_s12, [#allocation5], %s5211_s23, %s5211_s23, %s5212_s17  }
0x1273   : > { %s5072_s26 = scalar_lea.vmem %s6211_s5, 128  ;;  %s5213_s13 = smov [#allocation24]  }
0x1274   : > { %s3888_s22 = sshll.u32 %s6371_s21, 6  ;;  %p5073_p4 = scmp.ne.s32.totalorder %s6211_s5, %s5072_s26 }
0x1275   : > { %p6376_p5 = scmp.ne.s32.totalorder %s6372_s16, 0  ;;  %s5076_s27 = sshll.u32 %s5213_s13, 4  ;;  %s5077_s27 = int_to_ptr.vmem [resolvable:$false] %s5076_s27 }
0x1276   : > { %s6375_s7 = smov %s6374_s25  ;;  %s6208_s15 = scalar_lea.hbm %s6374_s25, %s3888_s22 }
0x1277   : > { %p5074_p10 = pnand %p5073_p4, %p6376_p5  ;;  %s5078_s21 = scalar_lea.vmem %s5077_s27, 256 }
0x1278   : > { %p5079_p6 = scmp.lt.s32.totalorder %s6211_s5, %s5077_s27  ;;  %p5080_p0 = scmp.lt.s32.totalorder %s5078_s21, %s5072_s26 }
0x1279   : > { %p5075_p13 = pneg %p5074_p10 }
0x127a   : > { %p5081_p12 = por %p5080_p0, %p5079_p6 }
0x127c   : > { %p5082_p1 = pnand %p5081_p12, %p5075_p13 }
0x127e   : > { %5085 = shalt.err (!%p5082_p1)
}
0x127f   : > { %s5086_s20 = scalar_lea.hbm %s6208_s15, 128  ;;  %s5090_s24 = scalar_lea.hbm %s6375_s7, 256 }
0x1280   : > { %p5087_p9 = scmp.ne.s32.totalorder %s6208_s15, %s5086_s20  ;;  %p5091_p11 = scmp.lt.u32.totalorder %s6208_s15, %s6375_s7 }
0x1281   : > { %p5092_p8 = scmp.lt.u32.totalorder %s5090_s24, %s5086_s20  ;;  %p5094_p4 = scmp.lt.u32.totalorder %s5086_s20, %s6208_s15 }
0x1282   : > { %p5088_p3 = pnand %p5087_p9, %p6376_p5 }
0x1283   : > { %p5093_p7 = por %p5092_p8, %p5091_p11 }
0x1284   : > { %p5089_p2 = pneg %p5088_p3 }
0x1285   : > { %p5095_p10 = por %p5094_p4, %p5093_p7 }
0x1287   : > { %p5096_p13 = pnand %p5095_p10, %p5089_p2 }
0x1289   : > { %5099 = shalt.err (!%p5096_p13)
}
0x128a   : > { %s5214_s28 = smov 4   ;;  %p6377_p6 = scmp.eq.s32.totalorder %s6367_s30, 1 }
0x128b   : > { %4288 = dma.vmem_to_hbm [thread:$0]  (%p6376_p5), %s6211_s5, 128, %s6208_s15, %s3257_s3, %s5209_s19, %s5211_s23, %s5214_s28  }
0x128c   : > { %5153 = dma.done.wait (%p6377_p6), [#allocation5], 256   ;;  %p6378_p0 = pmov %p6377_p6 }
0x128e   : > { %5155 = vsyncadd (%p6378_p0), [#allocation5], 4294967040 }
0x128f PF: > { %s6379_s25 = sld [smem:[#allocation35_spill]]  ;;  %s6380_s26 = sld [smem:[#allocation43_spill]] }
0x1290   : > { %s6381_s13 = sld [smem:[#allocation39_spill]] }
0x1295   : > { %s3307_s27 = sand.u32 1, %s6379_s25   ;;  %p6382_p12 = scmp.ne.s32.totalorder %s6380_s26, 0 }
0x1296   : > { %p6383_p1 = scmp.ge.s32.totalorder %s6381_s13, 2  ;;  %s3308_s16 = scalar_lea.sflag [#allocation25], %s3307_s27 }
0x1298   : > { %p4331_p9 = pnand %p6383_p1, %p6382_p12 }
0x129a   : > { %5157 = dma.done.wait (!%p4331_p9), %s3308_s16, 128  }
0x129b   : > { %5159 = vsyncadd (!%p4331_p9), %s3308_s16, 4294967168  ;;  %s43_s30 = sadd.s32 1, %s6381_s13   ;;  %s6384_s25 = sld [smem:[#allocation36_spill]] }
0x129c   : > { %p40_p3 = scmp.ge.s32.totalorder %s43_s30, 4   ;;  %s6385_s26 = sld [smem:[#allocation37_spill]] }
0x129d   : > { %s6386_s27 = sld [smem:[#allocation46_spill]]  ;;  %s6387_s14 = sld [smem:[#allocation45_spill]] }
0x129e   : > { %s6388_s28 = smov %s5178_s29  ;;  %42 = sbr.rel (!%p40_p3) target bundleno = 23 (0x17), region = 232 }
0x12a3   : > { %s6389_s29 = smov %s6387_s14 }
0x12a5   :  { %3313 = vsyncpa [#allocation4], 1 }
0x12a6   :  { %3315 = vsyncpa [#allocation4 + $0x1], 1 }
0x12a7   :  { %3316 = vsyncpa [#allocation7], 1 }
0x12a8   :  { %3317 = vsyncpa [#allocation10], 1 }
0x12a9   :  { %3318 = vsyncpa [#allocation13], 1 }
0x12aa   :  { %3320 = vsyncpa [#allocation13 + $0x1], 1 }
0x12ab   :  { %3321 = vsyncpa [#allocation16], 1 }
0x12ac   :  { %3323 = vsyncpa [#allocation16 + $0x1], 1 }
0x12ad   :  { %3324 = vsyncpa [#allocation19], 1 }
0x12ae   :  { %3326 = vsyncpa [#allocation19 + $0x1], 1 }
0x12af   :  { %3327 = vsyncpa [#allocation22], 1 }
0x12b0   :  { %3329 = vsyncpa [#allocation22 + $0x1], 1 }
0x12b1   :  { %3330 = vsyncpa [#allocation5], 1 }
0x12b2   :  { %3332 = vsyncpa [#allocation5 + $0x1], 1 }
0x12b3   :  { %3333 = vsyncpa [#allocation25], 1 }
0x12b4   :  { %3335 = vsyncpa [#allocation25 + $0x1], 1 }

</bundles_post_ra>
